<compile_context>
chip_gen: v6e
topology: v6e:2x2x1
jax: 0.10.0
libtpu: 0.0.40
codegen_flags: <defaults>
</compile_context>

<pallas_src>
import math

import jax
import jax.numpy as jnp
from jax import lax
from jax.experimental import pallas as pl
from jax.experimental.pallas import tpu as pltpu


# -----------------------------------------------------------------------------
# Pallas kernel (one batch tile per grid step)
# -----------------------------------------------------------------------------
def stylelstm_kernel(
    x_ref,        # [L, TB, E] f32  time-major content embeddings (batch tile)
    mask_ref,     # [TB, L]    f32  attention mask (1 valid / 0 pad), lane-dense
    style_ref,    # [TB, S]    cdt  style features
    wih_ref,      # [E, 6E]    cdt  input->hidden, gate order (rf, zf, nf, rb, zb, nb)
    bih_ref,      # [1, 6E]    f32  matching input biases
    whh_ref,      # [6, E, E]  cdt  hidden->hidden, one [E,E] per gate
    bhh_ref,      # [6, E]     f32  matching hidden biases
    wattf_ref,    # [1, E]     f32  attention weight (fwd half)
    wattb_ref,    # [1, E]     f32  attention weight (bwd half)
    batt_ref,     # [1, 1]     f32
    w1f_ref,      # [E, H]     cdt  MLP layer-1, fwd-attended block
    w1b_ref,      # [E, H]     cdt  MLP layer-1, bwd-attended block
    w1s_ref,      # [S, H]     cdt  MLP layer-1, style block
    b1_ref,       # [1, H]     f32
    bnscale_ref,  # [1, H]     f32  folded BatchNorm scale
    bnshift_ref,  # [1, H]     f32  folded BatchNorm shift
    w2_ref,       # [1, H]     f32  output head
    b2_ref,       # [1, 1]     f32
    out_ref,      # [TB, 1]    f32
):
    L, TB, E = x_ref.shape
    f32 = jnp.float32
    cdt = wih_ref.dtype

    # ---- hoisted input->hidden projection: one MXU matmul for both dirs ----
    x2d = x_ref[...].reshape(L * TB, E).astype(cdt)
    gi_all = (jnp.dot(x2d, wih_ref[...], preferred_element_type=f32)
              + bih_ref[...]).reshape(L, TB, 6 * E)
    gi = [gi_all[:, :, k * E:(k + 1) * E] for k in range(6)]   # rf zf nf rb zb nb

    # ---- hoisted recurrent weights / bias broadcasts (outside the loop) ----
    whh_all = whh_ref[...]
    bhh_all = bhh_ref[...]
    whh = [whh_all[k] for k in range(6)]
    bhh = [jnp.broadcast_to(bhh_all[k:k + 1, :], (TB, E)) for k in range(6)]

    def cell(h, gi_r, gi_z, gi_n, w_r, w_z, w_n, b_r, b_z, b_n):
        # PyTorch GRU cell, gate order (r, z, n); gi_* already include b_ih.
        hc = h.astype(cdt)
        gh_r = jnp.dot(hc, w_r, preferred_element_type=f32) + b_r
        gh_z = jnp.dot(hc, w_z, preferred_element_type=f32) + b_z
        gh_n = jnp.dot(hc, w_n, preferred_element_type=f32) + b_n
        r = jax.nn.sigmoid(gi_r + gh_r)
        z = jax.nn.sigmoid(gi_z + gh_z)
        n = jnp.tanh(gi_n + r * gh_n)
        return (1.0 - z) * n + z * h

    # ---- fused fwd+bwd recurrence, statically unrolled, carried in values ----
    hf = jnp.zeros((TB, E), f32)
    hb = jnp.zeros((TB, E), f32)
    fwd_hs = [None] * L
    bwd_hs = [None] * L
    for t in range(L):
        tt = L - 1 - t
        hf = cell(hf, gi[0][t], gi[1][t], gi[2][t],
                  whh[0], whh[1], whh[2], bhh[0], bhh[1], bhh[2])
        hb = cell(hb, gi[3][tt], gi[4][tt], gi[5][tt],
                  whh[3], whh[4], whh[5], bhh[3], bhh[4], bhh[5])
        fwd_hs[t] = hf
        bwd_hs[tt] = hb

    # ---- MaskAttention, lane-dense [TB, L] layout ----
    wf_b = jnp.broadcast_to(wattf_ref[...], (TB, E))
    wb_b = jnp.broadcast_to(wattb_ref[...], (TB, E))
    cols = [jnp.sum(fwd_hs[t] * wf_b + bwd_hs[t] * wb_b, axis=-1, keepdims=True)
            for t in range(L)]
    scores = jnp.concatenate(cols, axis=1) + batt_ref[...]        # [TB, L]
    scores = jnp.where(mask_ref[...] > 0.5, scores, -1e30)
    m = jnp.max(scores, axis=-1, keepdims=True)
    e = jnp.exp(scores - m)
    p = e / jnp.sum(e, axis=-1, keepdims=True)                    # softmax over L

    att_f = jnp.zeros((TB, E), f32)
    att_b = jnp.zeros((TB, E), f32)
    for t in range(L):
        pt = p[:, t:t + 1]
        att_f = att_f + pt * fwd_hs[t]
        att_b = att_b + pt * bwd_hs[t]

    # ---- MLP: Linear -> folded BatchNorm(eval) -> ReLU -> Linear -> sigmoid
    # (Dropout is identity in eval mode.)
    h1 = (jnp.dot(att_f.astype(cdt), w1f_ref[...], preferred_element_type=f32)
          + jnp.dot(att_b.astype(cdt), w1b_ref[...], preferred_element_type=f32)
          + jnp.dot(style_ref[...], w1s_ref[...], preferred_element_type=f32)
          + b1_ref[...])
    h1 = h1 * bnscale_ref[...] + bnshift_ref[...]
    h1 = jnp.maximum(h1, 0.0)
    logit = jnp.sum(h1 * w2_ref[...], axis=-1, keepdims=True) + b2_ref[...]
    out_ref[...] = jax.nn.sigmoid(logit)


# -----------------------------------------------------------------------------
# Wrapper: layout transposes, gate splitting, BN folding, batch-parallel grid
# -----------------------------------------------------------------------------
def style_lstm_forward(params, content_feature, content_masks, style_feature,
                       compute_dtype=jnp.bfloat16, batch_tile=8):
    B, L, E = content_feature.shape
    S = style_feature.shape[1]
    H = params["w1"].shape[0]
    cdt = compute_dtype

    TB = batch_tile
    Bp = ((B + TB - 1) // TB) * TB
    pad = Bp - B

    x = jnp.transpose(content_feature, (1, 0, 2)).astype(jnp.float32)
    x = jnp.pad(x, ((0, 0), (0, pad), (0, 0)))                           # [L, Bp, E]
    mask = jnp.pad(content_masks.astype(jnp.float32), ((0, pad), (0, 0)))  # [Bp, L]
    style = jnp.pad(style_feature.astype(jnp.float32),
                    ((0, pad), (0, 0))).astype(cdt)                      # [Bp, S]

    def gate_split(w):            # [3E, E] -> [Wr.T, Wz.T, Wn.T], each [E, E]
        return [w[k * E:(k + 1) * E, :].T for k in range(3)]

    wih = jnp.concatenate(gate_split(params["w_ih_f"]) + gate_split(params["w_ih_b"]),
                          axis=1).astype(cdt)                            # [E, 6E]
    bih = jnp.concatenate([params["b_ih_f"], params["b_ih_b"]]
                          ).reshape(1, 6 * E).astype(jnp.float32)
    whh = jnp.stack(gate_split(params["w_hh_f"]) + gate_split(params["w_hh_b"]),
                    axis=0).astype(cdt)                                  # [6, E, E]
    bhh = jnp.concatenate([params["b_hh_f"], params["b_hh_b"]]
                          ).reshape(6, E).astype(jnp.float32)

    w_att = params["w_att"].astype(jnp.float32)                          # [1, 2E]
    wattf, wattb = w_att[:, :E], w_att[:, E:]
    batt = params["b_att"].reshape(1, 1).astype(jnp.float32)

    w1 = params["w1"]                                                    # [H, 2E+S]
    w1f = w1[:, :E].T.astype(cdt)
    w1b = w1[:, E:2 * E].T.astype(cdt)
    w1s = w1[:, 2 * E:].T.astype(cdt)
    b1 = params["b1"].reshape(1, H).astype(jnp.float32)

    inv_std = 1.0 / jnp.sqrt(params["bn_var"] + 1e-5)
    bn_scale = (params["bn_gamma"] * inv_std).reshape(1, H).astype(jnp.float32)
    bn_shift = (params["bn_beta"] - params["bn_mean"] * params["bn_gamma"] * inv_std
                ).reshape(1, H).astype(jnp.float32)

    w2 = params["w2"].astype(jnp.float32)                                # [1, H]
    b2 = params["b2"].reshape(1, 1).astype(jnp.float32)

    args = (x, mask, style, wih, bih, whh, bhh, wattf, wattb, batt,
            w1f, w1b, w1s, b1, bn_scale, bn_shift, w2, b2)

    def full_spec(a):             # whole array, replicated across the batch grid
        nd = a.ndim

        def imap(i):
            return (0,) * nd
        return pl.BlockSpec(tuple(a.shape), imap)

    in_specs = [
        pl.BlockSpec((L, TB, E), lambda i: (0, i, 0)),   # x: batch tile
        pl.BlockSpec((TB, L), lambda i: (i, 0)),         # mask
        pl.BlockSpec((TB, S), lambda i: (i, 0)),         # style
    ] + [full_spec(a) for a in args[3:]]

    # Advisory cost hint for XLA scheduling around the custom call.
    flops = (2 * L * Bp * E * 6 * E            # hoisted input projection
             + 2 * L * Bp * E * E * 6          # recurrent gh (3 gates x 2 dirs)
             + 2 * Bp * (2 * E + S) * H        # MLP layer 1
             + 6 * L * Bp * E + 4 * Bp * H)    # attention + BN + head (approx)
    transcendentals = 6 * L * Bp * E + Bp * (L + 1)
    bytes_accessed = sum(int(a.size) * a.dtype.itemsize for a in args) + Bp * 4
    footprint = 2 * bytes_accessed + L * Bp * 6 * E * 4 + (1 << 20)
    vmem_limit = int(min(96 * 1024 * 1024, max(footprint, 4 * 1024 * 1024)))

    out = pl.pallas_call(
        stylelstm_kernel,
        out_shape=jax.ShapeDtypeStruct((Bp, 1), jnp.float32),
        grid=(Bp // TB,),
        in_specs=in_specs,
        out_specs=pl.BlockSpec((TB, 1), lambda i: (i, 0)),
        compiler_params=pltpu.CompilerParams(
            dimension_semantics=("parallel",),
            vmem_limit_bytes=vmem_limit),
        cost_estimate=pl.CostEstimate(flops=flops,
                                      transcendentals=transcendentals,
                                      bytes_accessed=bytes_accessed),
    )(*args)
    return out[:B, 0]   # matches torch.sigmoid(label_pred.squeeze(1)) -> [B]


# -----------------------------------------------------------------------------
# Pure-JAX reference (mirrors the PyTorch module literally, eval mode)
# -----------------------------------------------------------------------------
def reference_forward(p, content_feature, content_masks, style_feature):
    B, L, E = content_feature.shape

    def gru_dir(x_lbe, w_ih, w_hh, b_ih, b_hh):
        def step(h, x_t):
            gi = x_t @ w_ih.T + b_ih
            gh = h @ w_hh.T + b_hh
            r = jax.nn.sigmoid(gi[:, :E] + gh[:, :E])
            z = jax.nn.sigmoid(gi[:, E:2 * E] + gh[:, E:2 * E])
            n = jnp.tanh(gi[:, 2 * E:] + r * gh[:, 2 * E:])
            h = (1.0 - z) * n + z * h
            return h, h
        h0 = jnp.zeros((B, E), jnp.float32)
        _, hs = lax.scan(step, h0, x_lbe)
        return hs

    x_lbe = jnp.transpose(content_feature, (1, 0, 2))
    fwd = gru_dir(x_lbe, p["w_ih_f"], p["w_hh_f"], p["b_ih_f"], p["b_hh_f"])
    bwd = gru_dir(x_lbe[::-1], p["w_ih_b"], p["w_hh_b"], p["b_ih_b"], p["b_hh_b"])[::-1]
    rnn_out = jnp.concatenate([fwd, bwd], axis=-1)            # [L, B, 2E]
    rnn_out = jnp.transpose(rnn_out, (1, 0, 2))               # [B, L, 2E]

    scores = rnn_out @ p["w_att"][0] + p["b_att"][0]          # [B, L]
    scores = jnp.where(content_masks > 0.5, scores, -jnp.inf)
    probs = jax.nn.softmax(scores, axis=-1)
    attended = jnp.einsum("bl,bld->bd", probs, rnn_out)       # [B, 2E]

    shared = jnp.concatenate([attended, style_feature], axis=1)
    h1 = shared @ p["w1"].T + p["b1"]
    h1 = (h1 - p["bn_mean"]) / jnp.sqrt(p["bn_var"] + 1e-5) * p["bn_gamma"] + p["bn_beta"]
    h1 = jax.nn.relu(h1)
    logit = h1 @ p["w2"].T + p["b2"]
    return jax.nn.sigmoid(logit[:, 0])


# -----------------------------------------------------------------------------
# Deterministic parameter init (shapes from the module's __init__)
# -----------------------------------------------------------------------------
def init_params(key, emb_dim, style_dim, mlp_dims):
    E, S, H = emb_dim, style_dim, mlp_dims[0]
    D = 2 * E + S
    ks = jax.random.split(key, 20)

    def u(k, shape, bound):
        return jax.random.uniform(k, shape, jnp.float32, -bound, bound)

    kg = 1.0 / math.sqrt(E)
    ka = 1.0 / math.sqrt(2 * E)
    k1 = 1.0 / math.sqrt(D)
    k2 = 1.0 / math.sqrt(H)
    return dict(
        w_ih_f=u(ks[0], (3 * E, E), kg), w_hh_f=u(ks[1], (3 * E, E), kg),
        b_ih_f=u(ks[2], (3 * E,), kg),   b_hh_f=u(ks[3], (3 * E,), kg),
        w_ih_b=u(ks[4], (3 * E, E), kg), w_hh_b=u(ks[5], (3 * E, E), kg),
        b_ih_b=u(ks[6], (3 * E,), kg),   b_hh_b=u(ks[7], (3 * E,), kg),
        w_att=u(ks[8], (1, 2 * E), ka),  b_att=u(ks[9], (1,), ka),
        w1=u(ks[10], (H, D), k1),        b1=u(ks[11], (H,), k1),
        bn_gamma=1.0 + u(ks[12], (H,), 0.1),
        bn_beta=u(ks[13], (H,), 0.1),
        bn_mean=u(ks[14], (H,), 0.1),
        bn_var=0.75 + jnp.abs(u(ks[15], (H,), 0.5)),
        w2=u(ks[16], (1, H), k2),        b2=u(ks[17], (1,), k2),
    )


if __name__ == "__main__":
    B, L, E, S = 10, 8, 32, 32          # batch, seq, emb_dim (=fea_size), style dim ('en': 32)
    mlp_dims = (64,)

    key = jax.random.PRNGKey(0)
    kx, kst, kp = jax.random.split(key, 3)

    # Stand-in for BERT output (frozen encoder is external to this module).
    content_feature = jax.random.normal(kx, (B, L, E), jnp.float32)
    style_feature = jax.random.normal(kst, (B, S), jnp.float32)
    lengths = jnp.array([L, L - 2, L - 1, L - 3, L, 4, 3, L, 2, 6])
    content_masks = (jnp.arange(L)[None, :] < lengths[:, None]).astype(jnp.float32)

    params = init_params(kp, E, S, mlp_dims)
    ref = reference_forward(params, content_feature, content_masks, style_feature)

    # Exact path (f32 MXU operands): tight check of the kernel structure.
    out_f32 = style_lstm_forward(params, content_feature, content_masks,
                                 style_feature, compute_dtype=jnp.float32)
    out_f32 = jax.block_until_ready(out_f32)
    assert out_f32.shape == (B,), out_f32.shape
    assert bool(jnp.allclose(out_f32, ref, atol=1e-3, rtol=1e-3)), (out_f32, ref)

    # Fast path (bf16 MXU operands, f32 accumulation / gates / softmax / BN).
    out_bf16 = style_lstm_forward(params, content_feature, content_masks,
                                  style_feature, compute_dtype=jnp.bfloat16)
    out_bf16 = jax.block_until_ready(out_bf16)
    assert out_bf16.shape == (B,), out_bf16.shape
    assert bool(jnp.allclose(out_bf16, ref, atol=1e-2, rtol=1e-2)), (out_bf16, ref)

    print("KERNEL_OK")
</pallas_src>

<mosaic_0001>
module attributes {stable_mosaic.version = 11 : i64} {
  func.func @stylelstm_kernel(%arg0: i32, %arg1: memref<8x8x32xf32, #tpu.memory_space<vmem>>, %arg2: memref<8x8xf32, #tpu.memory_space<vmem>>, %arg3: memref<8x32xf32, #tpu.memory_space<vmem>>, %arg4: memref<32x192xf32, #tpu.memory_space<vmem>>, %arg5: memref<1x192xf32, #tpu.memory_space<vmem>>, %arg6: memref<6x32x32xf32, #tpu.memory_space<vmem>>, %arg7: memref<6x32xf32, #tpu.memory_space<vmem>>, %arg8: memref<1x32xf32, #tpu.memory_space<vmem>>, %arg9: memref<1x32xf32, #tpu.memory_space<vmem>>, %arg10: memref<1x1xf32, #tpu.memory_space<vmem>>, %arg11: memref<32x64xf32, #tpu.memory_space<vmem>>, %arg12: memref<32x64xf32, #tpu.memory_space<vmem>>, %arg13: memref<32x64xf32, #tpu.memory_space<vmem>>, %arg14: memref<1x64xf32, #tpu.memory_space<vmem>>, %arg15: memref<1x64xf32, #tpu.memory_space<vmem>>, %arg16: memref<1x64xf32, #tpu.memory_space<vmem>>, %arg17: memref<1x64xf32, #tpu.memory_space<vmem>>, %arg18: memref<1x1xf32, #tpu.memory_space<vmem>>, %arg19: memref<8x1xf32, #tpu.memory_space<vmem>>) attributes {dimension_semantics = [#tpu.dimension_semantics<parallel>], iteration_bounds = array<i64: 2>, scalar_prefetch = 0 : i64, scratch_operands = 0 : i64, tpu.core_type = #tpu.core_type<tc>, window_params = [{transform_indices = @transform_0, window_bounds = array<i64: 8, 8, 32>}, {transform_indices = @transform_1, window_bounds = array<i64: 8, 8>}, {transform_indices = @transform_2, window_bounds = array<i64: 8, 32>}, {pipeline_mode = #tpu.pipeline_mode<synchronous>, transform_indices = @transform_3, window_bounds = array<i64: 32, 192>}, {pipeline_mode = #tpu.pipeline_mode<synchronous>, transform_indices = @transform_4, window_bounds = array<i64: 1, 192>}, {pipeline_mode = #tpu.pipeline_mode<synchronous>, transform_indices = @transform_5, window_bounds = array<i64: 6, 32, 32>}, {pipeline_mode = #tpu.pipeline_mode<synchronous>, transform_indices = @transform_6, window_bounds = array<i64: 6, 32>}, {pipeline_mode = #tpu.pipeline_mode<synchronous>, transform_indices = @transform_7, window_bounds = array<i64: 1, 32>}, {pipeline_mode = #tpu.pipeline_mode<synchronous>, transform_indices = @transform_8, window_bounds = array<i64: 1, 32>}, {pipeline_mode = #tpu.pipeline_mode<synchronous>, transform_indices = @transform_9, window_bounds = array<i64: 1, 1>}, {pipeline_mode = #tpu.pipeline_mode<synchronous>, transform_indices = @transform_10, window_bounds = array<i64: 32, 64>}, {pipeline_mode = #tpu.pipeline_mode<synchronous>, transform_indices = @transform_11, window_bounds = array<i64: 32, 64>}, {pipeline_mode = #tpu.pipeline_mode<synchronous>, transform_indices = @transform_12, window_bounds = array<i64: 32, 64>}, {pipeline_mode = #tpu.pipeline_mode<synchronous>, transform_indices = @transform_13, window_bounds = array<i64: 1, 64>}, {pipeline_mode = #tpu.pipeline_mode<synchronous>, transform_indices = @transform_14, window_bounds = array<i64: 1, 64>}, {pipeline_mode = #tpu.pipeline_mode<synchronous>, transform_indices = @transform_15, window_bounds = array<i64: 1, 64>}, {pipeline_mode = #tpu.pipeline_mode<synchronous>, transform_indices = @transform_16, window_bounds = array<i64: 1, 64>}, {pipeline_mode = #tpu.pipeline_mode<synchronous>, transform_indices = @transform_17, window_bounds = array<i64: 1, 1>}, {transform_indices = @transform_18, window_bounds = array<i64: 8, 1>}]} {
    %c0 = arith.constant 0 : index
    %c0_0 = arith.constant 0 : index
    %c0_1 = arith.constant 0 : index
    %0 = vector.load %arg1[%c0, %c0_0, %c0_1] : memref<8x8x32xf32, #tpu.memory_space<vmem>>, vector<8x8x32xf32>
    %1 = vector.shape_cast %0 : vector<8x8x32xf32> to vector<64x32xf32>
    %c0_2 = arith.constant 0 : index
    %c0_3 = arith.constant 0 : index
    %2 = vector.load %arg4[%c0_2, %c0_3] : memref<32x192xf32, #tpu.memory_space<vmem>>, vector<32x192xf32>
    %cst = arith.constant dense<0.000000e+00> : vector<64x192xf32>
    %3 = tpu.matmul %1, %2, %cst {dimension_numbers = #tpu.dot_dimension_numbers<[1], [0], [0], [1], [0, 0, 1, 1], [], []>} : vector<64x32xf32>, vector<32x192xf32>, vector<64x192xf32> -> vector<64x192xf32>
    %c0_4 = arith.constant 0 : index
    %c0_5 = arith.constant 0 : index
    %4 = vector.load %arg5[%c0_4, %c0_5] : memref<1x192xf32, #tpu.memory_space<vmem>>, vector<1x192xf32>
    %5 = vector.broadcast %4 : vector<1x192xf32> to vector<64x192xf32>
    %6 = arith.addf %3, %5 : vector<64x192xf32>
    %7 = vector.shape_cast %6 : vector<64x192xf32> to vector<8x8x192xf32>
    %8 = vector.extract_strided_slice %7 {offsets = [0, 0, 0], sizes = [8, 8, 32], strides = [1, 1, 1]} : vector<8x8x192xf32> to vector<8x8x32xf32>
    %9 = vector.extract_strided_slice %7 {offsets = [0, 0, 32], sizes = [8, 8, 32], strides = [1, 1, 1]} : vector<8x8x192xf32> to vector<8x8x32xf32>
    %10 = vector.extract_strided_slice %7 {offsets = [0, 0, 64], sizes = [8, 8, 32], strides = [1, 1, 1]} : vector<8x8x192xf32> to vector<8x8x32xf32>
    %11 = vector.extract_strided_slice %7 {offsets = [0, 0, 96], sizes = [8, 8, 32], strides = [1, 1, 1]} : vector<8x8x192xf32> to vector<8x8x32xf32>
    %12 = vector.extract_strided_slice %7 {offsets = [0, 0, 128], sizes = [8, 8, 32], strides = [1, 1, 1]} : vector<8x8x192xf32> to vector<8x8x32xf32>
    %13 = vector.extract_strided_slice %7 {offsets = [0, 0, 160], sizes = [8, 8, 32], strides = [1, 1, 1]} : vector<8x8x192xf32> to vector<8x8x32xf32>
    %c0_6 = arith.constant 0 : index
    %c0_7 = arith.constant 0 : index
    %c0_8 = arith.constant 0 : index
    %14 = vector.load %arg6[%c0_6, %c0_7, %c0_8] : memref<6x32x32xf32, #tpu.memory_space<vmem>>, vector<6x32x32xf32>
    %c0_9 = arith.constant 0 : index
    %c0_10 = arith.constant 0 : index
    %15 = vector.load %arg7[%c0_9, %c0_10] : memref<6x32xf32, #tpu.memory_space<vmem>>, vector<6x32xf32>
    %16 = vector.extract_strided_slice %14 {offsets = [0, 0, 0], sizes = [1, 32, 32], strides = [1, 1, 1]} : vector<6x32x32xf32> to vector<1x32x32xf32>
    %17 = vector.shape_cast %16 : vector<1x32x32xf32> to vector<32x32xf32>
    %18 = vector.extract_strided_slice %14 {offsets = [1, 0, 0], sizes = [1, 32, 32], strides = [1, 1, 1]} : vector<6x32x32xf32> to vector<1x32x32xf32>
    %19 = vector.shape_cast %18 : vector<1x32x32xf32> to vector<32x32xf32>
    %20 = vector.extract_strided_slice %14 {offsets = [2, 0, 0], sizes = [1, 32, 32], strides = [1, 1, 1]} : vector<6x32x32xf32> to vector<1x32x32xf32>
    %21 = vector.shape_cast %20 : vector<1x32x32xf32> to vector<32x32xf32>
    %22 = vector.extract_strided_slice %14 {offsets = [3, 0, 0], sizes = [1, 32, 32], strides = [1, 1, 1]} : vector<6x32x32xf32> to vector<1x32x32xf32>
    %23 = vector.shape_cast %22 : vector<1x32x32xf32> to vector<32x32xf32>
    %24 = vector.extract_strided_slice %14 {offsets = [4, 0, 0], sizes = [1, 32, 32], strides = [1, 1, 1]} : vector<6x32x32xf32> to vector<1x32x32xf32>
    %25 = vector.shape_cast %24 : vector<1x32x32xf32> to vector<32x32xf32>
    %26 = vector.extract_strided_slice %14 {offsets = [5, 0, 0], sizes = [1, 32, 32], strides = [1, 1, 1]} : vector<6x32x32xf32> to vector<1x32x32xf32>
    %27 = vector.shape_cast %26 : vector<1x32x32xf32> to vector<32x32xf32>
    %28 = vector.extract_strided_slice %15 {offsets = [0, 0], sizes = [1, 32], strides = [1, 1]} : vector<6x32xf32> to vector<1x32xf32>
    %29 = vector.shape_cast %28 : vector<1x32xf32> to vector<1x32xf32>
    %30 = vector.broadcast %29 : vector<1x32xf32> to vector<8x32xf32>
    %31 = vector.extract_strided_slice %15 {offsets = [1, 0], sizes = [1, 32], strides = [1, 1]} : vector<6x32xf32> to vector<1x32xf32>
    %32 = vector.shape_cast %31 : vector<1x32xf32> to vector<1x32xf32>
    %33 = vector.broadcast %32 : vector<1x32xf32> to vector<8x32xf32>
    %34 = vector.extract_strided_slice %15 {offsets = [2, 0], sizes = [1, 32], strides = [1, 1]} : vector<6x32xf32> to vector<1x32xf32>
    %35 = vector.shape_cast %34 : vector<1x32xf32> to vector<1x32xf32>
    %36 = vector.broadcast %35 : vector<1x32xf32> to vector<8x32xf32>
    %37 = vector.extract_strided_slice %15 {offsets = [3, 0], sizes = [1, 32], strides = [1, 1]} : vector<6x32xf32> to vector<1x32xf32>
    %38 = vector.shape_cast %37 : vector<1x32xf32> to vector<1x32xf32>
    %39 = vector.broadcast %38 : vector<1x32xf32> to vector<8x32xf32>
    %40 = vector.extract_strided_slice %15 {offsets = [4, 0], sizes = [1, 32], strides = [1, 1]} : vector<6x32xf32> to vector<1x32xf32>
    %41 = vector.shape_cast %40 : vector<1x32xf32> to vector<1x32xf32>
    %42 = vector.broadcast %41 : vector<1x32xf32> to vector<8x32xf32>
    %43 = vector.extract_strided_slice %15 {offsets = [5, 0], sizes = [1, 32], strides = [1, 1]} : vector<6x32xf32> to vector<1x32xf32>
    %44 = vector.shape_cast %43 : vector<1x32xf32> to vector<1x32xf32>
    %45 = vector.broadcast %44 : vector<1x32xf32> to vector<8x32xf32>
    %cst_11 = arith.constant 0.000000e+00 : f32
    %46 = vector.broadcast %cst_11 : f32 to vector<8x32xf32>
    %cst_12 = arith.constant 0.000000e+00 : f32
    %47 = vector.broadcast %cst_12 : f32 to vector<8x32xf32>
    %48 = vector.extract_strided_slice %8 {offsets = [0, 0, 0], sizes = [1, 8, 32], strides = [1, 1, 1]} : vector<8x8x32xf32> to vector<1x8x32xf32>
    %49 = vector.shape_cast %48 : vector<1x8x32xf32> to vector<8x32xf32>
    %50 = vector.extract_strided_slice %9 {offsets = [0, 0, 0], sizes = [1, 8, 32], strides = [1, 1, 1]} : vector<8x8x32xf32> to vector<1x8x32xf32>
    %51 = vector.shape_cast %50 : vector<1x8x32xf32> to vector<8x32xf32>
    %52 = vector.extract_strided_slice %10 {offsets = [0, 0, 0], sizes = [1, 8, 32], strides = [1, 1, 1]} : vector<8x8x32xf32> to vector<1x8x32xf32>
    %53 = vector.shape_cast %52 : vector<1x8x32xf32> to vector<8x32xf32>
    %cst_13 = arith.constant dense<0.000000e+00> : vector<8x32xf32>
    %54 = tpu.matmul %46, %17, %cst_13 {dimension_numbers = #tpu.dot_dimension_numbers<[1], [0], [0], [1], [0, 0, 1, 1], [], []>} : vector<8x32xf32>, vector<32x32xf32>, vector<8x32xf32> -> vector<8x32xf32>
    %55 = arith.addf %54, %30 : vector<8x32xf32>
    %cst_14 = arith.constant dense<0.000000e+00> : vector<8x32xf32>
    %56 = tpu.matmul %46, %19, %cst_14 {dimension_numbers = #tpu.dot_dimension_numbers<[1], [0], [0], [1], [0, 0, 1, 1], [], []>} : vector<8x32xf32>, vector<32x32xf32>, vector<8x32xf32> -> vector<8x32xf32>
    %57 = arith.addf %56, %33 : vector<8x32xf32>
    %cst_15 = arith.constant dense<0.000000e+00> : vector<8x32xf32>
    %58 = tpu.matmul %46, %21, %cst_15 {dimension_numbers = #tpu.dot_dimension_numbers<[1], [0], [0], [1], [0, 0, 1, 1], [], []>} : vector<8x32xf32>, vector<32x32xf32>, vector<8x32xf32> -> vector<8x32xf32>
    %59 = arith.addf %58, %36 : vector<8x32xf32>
    %60 = arith.addf %49, %55 : vector<8x32xf32>
    %61 = arith.negf %60 : vector<8x32xf32>
    %62 = math.exp %61 : vector<8x32xf32>
    %cst_16 = arith.constant 1.000000e+00 : f32
    %63 = vector.broadcast %cst_16 : f32 to vector<8x32xf32>
    %64 = arith.addf %63, %62 : vector<8x32xf32>
    %65 = arith.divf %63, %64 : vector<8x32xf32>
    %66 = arith.addf %51, %57 : vector<8x32xf32>
    %67 = arith.negf %66 : vector<8x32xf32>
    %68 = math.exp %67 : vector<8x32xf32>
    %cst_17 = arith.constant 1.000000e+00 : f32
    %69 = vector.broadcast %cst_17 : f32 to vector<8x32xf32>
    %70 = arith.addf %69, %68 : vector<8x32xf32>
    %71 = arith.divf %69, %70 : vector<8x32xf32>
    %72 = arith.mulf %65, %59 : vector<8x32xf32>
    %73 = arith.addf %53, %72 : vector<8x32xf32>
    %74 = math.tanh %73 : vector<8x32xf32>
    %cst_18 = arith.constant 1.000000e+00 : f32
    %75 = vector.broadcast %cst_18 : f32 to vector<8x32xf32>
    %76 = arith.subf %75, %71 : vector<8x32xf32>
    %77 = arith.mulf %76, %74 : vector<8x32xf32>
    %78 = arith.mulf %71, %46 : vector<8x32xf32>
    %79 = arith.addf %77, %78 : vector<8x32xf32>
    %80 = vector.extract_strided_slice %11 {offsets = [7, 0, 0], sizes = [1, 8, 32], strides = [1, 1, 1]} : vector<8x8x32xf32> to vector<1x8x32xf32>
    %81 = vector.shape_cast %80 : vector<1x8x32xf32> to vector<8x32xf32>
    %82 = vector.extract_strided_slice %12 {offsets = [7, 0, 0], sizes = [1, 8, 32], strides = [1, 1, 1]} : vector<8x8x32xf32> to vector<1x8x32xf32>
    %83 = vector.shape_cast %82 : vector<1x8x32xf32> to vector<8x32xf32>
    %84 = vector.extract_strided_slice %13 {offsets = [7, 0, 0], sizes = [1, 8, 32], strides = [1, 1, 1]} : vector<8x8x32xf32> to vector<1x8x32xf32>
    %85 = vector.shape_cast %84 : vector<1x8x32xf32> to vector<8x32xf32>
    %cst_19 = arith.constant dense<0.000000e+00> : vector<8x32xf32>
    %86 = tpu.matmul %47, %23, %cst_19 {dimension_numbers = #tpu.dot_dimension_numbers<[1], [0], [0], [1], [0, 0, 1, 1], [], []>} : vector<8x32xf32>, vector<32x32xf32>, vector<8x32xf32> -> vector<8x32xf32>
    %87 = arith.addf %86, %39 : vector<8x32xf32>
    %cst_20 = arith.constant dense<0.000000e+00> : vector<8x32xf32>
    %88 = tpu.matmul %47, %25, %cst_20 {dimension_numbers = #tpu.dot_dimension_numbers<[1], [0], [0], [1], [0, 0, 1, 1], [], []>} : vector<8x32xf32>, vector<32x32xf32>, vector<8x32xf32> -> vector<8x32xf32>
    %89 = arith.addf %88, %42 : vector<8x32xf32>
    %cst_21 = arith.constant dense<0.000000e+00> : vector<8x32xf32>
    %90 = tpu.matmul %47, %27, %cst_21 {dimension_numbers = #tpu.dot_dimension_numbers<[1], [0], [0], [1], [0, 0, 1, 1], [], []>} : vector<8x32xf32>, vector<32x32xf32>, vector<8x32xf32> -> vector<8x32xf32>
    %91 = arith.addf %90, %45 : vector<8x32xf32>
    %92 = arith.addf %81, %87 : vector<8x32xf32>
    %93 = arith.negf %92 : vector<8x32xf32>
    %94 = math.exp %93 : vector<8x32xf32>
    %cst_22 = arith.constant 1.000000e+00 : f32
    %95 = vector.broadcast %cst_22 : f32 to vector<8x32xf32>
    %96 = arith.addf %95, %94 : vector<8x32xf32>
    %97 = arith.divf %95, %96 : vector<8x32xf32>
    %98 = arith.addf %83, %89 : vector<8x32xf32>
    %99 = arith.negf %98 : vector<8x32xf32>
    %100 = math.exp %99 : vector<8x32xf32>
    %cst_23 = arith.constant 1.000000e+00 : f32
    %101 = vector.broadcast %cst_23 : f32 to vector<8x32xf32>
    %102 = arith.addf %101, %100 : vector<8x32xf32>
    %103 = arith.divf %101, %102 : vector<8x32xf32>
    %104 = arith.mulf %97, %91 : vector<8x32xf32>
    %105 = arith.addf %85, %104 : vector<8x32xf32>
    %106 = math.tanh %105 : vector<8x32xf32>
    %cst_24 = arith.constant 1.000000e+00 : f32
    %107 = vector.broadcast %cst_24 : f32 to vector<8x32xf32>
    %108 = arith.subf %107, %103 : vector<8x32xf32>
    %109 = arith.mulf %108, %106 : vector<8x32xf32>
    %110 = arith.mulf %103, %47 : vector<8x32xf32>
    %111 = arith.addf %109, %110 : vector<8x32xf32>
    %112 = vector.extract_strided_slice %8 {offsets = [1, 0, 0], sizes = [1, 8, 32], strides = [1, 1, 1]} : vector<8x8x32xf32> to vector<1x8x32xf32>
    %113 = vector.shape_cast %112 : vector<1x8x32xf32> to vector<8x32xf32>
    %114 = vector.extract_strided_slice %9 {offsets = [1, 0, 0], sizes = [1, 8, 32], strides = [1, 1, 1]} : vector<8x8x32xf32> to vector<1x8x32xf32>
    %115 = vector.shape_cast %114 : vector<1x8x32xf32> to vector<8x32xf32>
    %116 = vector.extract_strided_slice %10 {offsets = [1, 0, 0], sizes = [1, 8, 32], strides = [1, 1, 1]} : vector<8x8x32xf32> to vector<1x8x32xf32>
    %117 = vector.shape_cast %116 : vector<1x8x32xf32> to vector<8x32xf32>
    %cst_25 = arith.constant dense<0.000000e+00> : vector<8x32xf32>
    %118 = tpu.matmul %79, %17, %cst_25 {dimension_numbers = #tpu.dot_dimension_numbers<[1], [0], [0], [1], [0, 0, 1, 1], [], []>} : vector<8x32xf32>, vector<32x32xf32>, vector<8x32xf32> -> vector<8x32xf32>
    %119 = arith.addf %118, %30 : vector<8x32xf32>
    %cst_26 = arith.constant dense<0.000000e+00> : vector<8x32xf32>
    %120 = tpu.matmul %79, %19, %cst_26 {dimension_numbers = #tpu.dot_dimension_numbers<[1], [0], [0], [1], [0, 0, 1, 1], [], []>} : vector<8x32xf32>, vector<32x32xf32>, vector<8x32xf32> -> vector<8x32xf32>
    %121 = arith.addf %120, %33 : vector<8x32xf32>
    %cst_27 = arith.constant dense<0.000000e+00> : vector<8x32xf32>
    %122 = tpu.matmul %79, %21, %cst_27 {dimension_numbers = #tpu.dot_dimension_numbers<[1], [0], [0], [1], [0, 0, 1, 1], [], []>} : vector<8x32xf32>, vector<32x32xf32>, vector<8x32xf32> -> vector<8x32xf32>
    %123 = arith.addf %122, %36 : vector<8x32xf32>
    %124 = arith.addf %113, %119 : vector<8x32xf32>
    %125 = arith.negf %124 : vector<8x32xf32>
    %126 = math.exp %125 : vector<8x32xf32>
    %cst_28 = arith.constant 1.000000e+00 : f32
    %127 = vector.broadcast %cst_28 : f32 to vector<8x32xf32>
    %128 = arith.addf %127, %126 : vector<8x32xf32>
    %129 = arith.divf %127, %128 : vector<8x32xf32>
    %130 = arith.addf %115, %121 : vector<8x32xf32>
    %131 = arith.negf %130 : vector<8x32xf32>
    %132 = math.exp %131 : vector<8x32xf32>
    %cst_29 = arith.constant 1.000000e+00 : f32
    %133 = vector.broadcast %cst_29 : f32 to vector<8x32xf32>
    %134 = arith.addf %133, %132 : vector<8x32xf32>
    %135 = arith.divf %133, %134 : vector<8x32xf32>
    %136 = arith.mulf %129, %123 : vector<8x32xf32>
    %137 = arith.addf %117, %136 : vector<8x32xf32>
    %138 = math.tanh %137 : vector<8x32xf32>
    %cst_30 = arith.constant 1.000000e+00 : f32
    %139 = vector.broadcast %cst_30 : f32 to vector<8x32xf32>
    %140 = arith.subf %139, %135 : vector<8x32xf32>
    %141 = arith.mulf %140, %138 : vector<8x32xf32>
    %142 = arith.mulf %135, %79 : vector<8x32xf32>
    %143 = arith.addf %141, %142 : vector<8x32xf32>
    %144 = vector.extract_strided_slice %11 {offsets = [6, 0, 0], sizes = [1, 8, 32], strides = [1, 1, 1]} : vector<8x8x32xf32> to vector<1x8x32xf32>
    %145 = vector.shape_cast %144 : vector<1x8x32xf32> to vector<8x32xf32>
    %146 = vector.extract_strided_slice %12 {offsets = [6, 0, 0], sizes = [1, 8, 32], strides = [1, 1, 1]} : vector<8x8x32xf32> to vector<1x8x32xf32>
    %147 = vector.shape_cast %146 : vector<1x8x32xf32> to vector<8x32xf32>
    %148 = vector.extract_strided_slice %13 {offsets = [6, 0, 0], sizes = [1, 8, 32], strides = [1, 1, 1]} : vector<8x8x32xf32> to vector<1x8x32xf32>
    %149 = vector.shape_cast %148 : vector<1x8x32xf32> to vector<8x32xf32>
    %cst_31 = arith.constant dense<0.000000e+00> : vector<8x32xf32>
    %150 = tpu.matmul %111, %23, %cst_31 {dimension_numbers = #tpu.dot_dimension_numbers<[1], [0], [0], [1], [0, 0, 1, 1], [], []>} : vector<8x32xf32>, vector<32x32xf32>, vector<8x32xf32> -> vector<8x32xf32>
    %151 = arith.addf %150, %39 : vector<8x32xf32>
    %cst_32 = arith.constant dense<0.000000e+00> : vector<8x32xf32>
    %152 = tpu.matmul %111, %25, %cst_32 {dimension_numbers = #tpu.dot_dimension_numbers<[1], [0], [0], [1], [0, 0, 1, 1], [], []>} : vector<8x32xf32>, vector<32x32xf32>, vector<8x32xf32> -> vector<8x32xf32>
    %153 = arith.addf %152, %42 : vector<8x32xf32>
    %cst_33 = arith.constant dense<0.000000e+00> : vector<8x32xf32>
    %154 = tpu.matmul %111, %27, %cst_33 {dimension_numbers = #tpu.dot_dimension_numbers<[1], [0], [0], [1], [0, 0, 1, 1], [], []>} : vector<8x32xf32>, vector<32x32xf32>, vector<8x32xf32> -> vector<8x32xf32>
    %155 = arith.addf %154, %45 : vector<8x32xf32>
    %156 = arith.addf %145, %151 : vector<8x32xf32>
    %157 = arith.negf %156 : vector<8x32xf32>
    %158 = math.exp %157 : vector<8x32xf32>
    %cst_34 = arith.constant 1.000000e+00 : f32
    %159 = vector.broadcast %cst_34 : f32 to vector<8x32xf32>
    %160 = arith.addf %159, %158 : vector<8x32xf32>
    %161 = arith.divf %159, %160 : vector<8x32xf32>
    %162 = arith.addf %147, %153 : vector<8x32xf32>
    %163 = arith.negf %162 : vector<8x32xf32>
    %164 = math.exp %163 : vector<8x32xf32>
    %cst_35 = arith.constant 1.000000e+00 : f32
    %165 = vector.broadcast %cst_35 : f32 to vector<8x32xf32>
    %166 = arith.addf %165, %164 : vector<8x32xf32>
    %167 = arith.divf %165, %166 : vector<8x32xf32>
    %168 = arith.mulf %161, %155 : vector<8x32xf32>
    %169 = arith.addf %149, %168 : vector<8x32xf32>
    %170 = math.tanh %169 : vector<8x32xf32>
    %cst_36 = arith.constant 1.000000e+00 : f32
    %171 = vector.broadcast %cst_36 : f32 to vector<8x32xf32>
    %172 = arith.subf %171, %167 : vector<8x32xf32>
    %173 = arith.mulf %172, %170 : vector<8x32xf32>
    %174 = arith.mulf %167, %111 : vector<8x32xf32>
    %175 = arith.addf %173, %174 : vector<8x32xf32>
    %176 = vector.extract_strided_slice %8 {offsets = [2, 0, 0], sizes = [1, 8, 32], strides = [1, 1, 1]} : vector<8x8x32xf32> to vector<1x8x32xf32>
    %177 = vector.shape_cast %176 : vector<1x8x32xf32> to vector<8x32xf32>
    %178 = vector.extract_strided_slice %9 {offsets = [2, 0, 0], sizes = [1, 8, 32], strides = [1, 1, 1]} : vector<8x8x32xf32> to vector<1x8x32xf32>
    %179 = vector.shape_cast %178 : vector<1x8x32xf32> to vector<8x32xf32>
    %180 = vector.extract_strided_slice %10 {offsets = [2, 0, 0], sizes = [1, 8, 32], strides = [1, 1, 1]} : vector<8x8x32xf32> to vector<1x8x32xf32>
    %181 = vector.shape_cast %180 : vector<1x8x32xf32> to vector<8x32xf32>
    %cst_37 = arith.constant dense<0.000000e+00> : vector<8x32xf32>
    %182 = tpu.matmul %143, %17, %cst_37 {dimension_numbers = #tpu.dot_dimension_numbers<[1], [0], [0], [1], [0, 0, 1, 1], [], []>} : vector<8x32xf32>, vector<32x32xf32>, vector<8x32xf32> -> vector<8x32xf32>
    %183 = arith.addf %182, %30 : vector<8x32xf32>
    %cst_38 = arith.constant dense<0.000000e+00> : vector<8x32xf32>
    %184 = tpu.matmul %143, %19, %cst_38 {dimension_numbers = #tpu.dot_dimension_numbers<[1], [0], [0], [1], [0, 0, 1, 1], [], []>} : vector<8x32xf32>, vector<32x32xf32>, vector<8x32xf32> -> vector<8x32xf32>
    %185 = arith.addf %184, %33 : vector<8x32xf32>
    %cst_39 = arith.constant dense<0.000000e+00> : vector<8x32xf32>
    %186 = tpu.matmul %143, %21, %cst_39 {dimension_numbers = #tpu.dot_dimension_numbers<[1], [0], [0], [1], [0, 0, 1, 1], [], []>} : vector<8x32xf32>, vector<32x32xf32>, vector<8x32xf32> -> vector<8x32xf32>
    %187 = arith.addf %186, %36 : vector<8x32xf32>
    %188 = arith.addf %177, %183 : vector<8x32xf32>
    %189 = arith.negf %188 : vector<8x32xf32>
    %190 = math.exp %189 : vector<8x32xf32>
    %cst_40 = arith.constant 1.000000e+00 : f32
    %191 = vector.broadcast %cst_40 : f32 to vector<8x32xf32>
    %192 = arith.addf %191, %190 : vector<8x32xf32>
    %193 = arith.divf %191, %192 : vector<8x32xf32>
    %194 = arith.addf %179, %185 : vector<8x32xf32>
    %195 = arith.negf %194 : vector<8x32xf32>
    %196 = math.exp %195 : vector<8x32xf32>
    %cst_41 = arith.constant 1.000000e+00 : f32
    %197 = vector.broadcast %cst_41 : f32 to vector<8x32xf32>
    %198 = arith.addf %197, %196 : vector<8x32xf32>
    %199 = arith.divf %197, %198 : vector<8x32xf32>
    %200 = arith.mulf %193, %187 : vector<8x32xf32>
    %201 = arith.addf %181, %200 : vector<8x32xf32>
    %202 = math.tanh %201 : vector<8x32xf32>
    %cst_42 = arith.constant 1.000000e+00 : f32
    %203 = vector.broadcast %cst_42 : f32 to vector<8x32xf32>
    %204 = arith.subf %203, %199 : vector<8x32xf32>
    %205 = arith.mulf %204, %202 : vector<8x32xf32>
    %206 = arith.mulf %199, %143 : vector<8x32xf32>
    %207 = arith.addf %205, %206 : vector<8x32xf32>
    %208 = vector.extract_strided_slice %11 {offsets = [5, 0, 0], sizes = [1, 8, 32], strides = [1, 1, 1]} : vector<8x8x32xf32> to vector<1x8x32xf32>
    %209 = vector.shape_cast %208 : vector<1x8x32xf32> to vector<8x32xf32>
    %210 = vector.extract_strided_slice %12 {offsets = [5, 0, 0], sizes = [1, 8, 32], strides = [1, 1, 1]} : vector<8x8x32xf32> to vector<1x8x32xf32>
    %211 = vector.shape_cast %210 : vector<1x8x32xf32> to vector<8x32xf32>
    %212 = vector.extract_strided_slice %13 {offsets = [5, 0, 0], sizes = [1, 8, 32], strides = [1, 1, 1]} : vector<8x8x32xf32> to vector<1x8x32xf32>
    %213 = vector.shape_cast %212 : vector<1x8x32xf32> to vector<8x32xf32>
    %cst_43 = arith.constant dense<0.000000e+00> : vector<8x32xf32>
    %214 = tpu.matmul %175, %23, %cst_43 {dimension_numbers = #tpu.dot_dimension_numbers<[1], [0], [0], [1], [0, 0, 1, 1], [], []>} : vector<8x32xf32>, vector<32x32xf32>, vector<8x32xf32> -> vector<8x32xf32>
    %215 = arith.addf %214, %39 : vector<8x32xf32>
    %cst_44 = arith.constant dense<0.000000e+00> : vector<8x32xf32>
    %216 = tpu.matmul %175, %25, %cst_44 {dimension_numbers = #tpu.dot_dimension_numbers<[1], [0], [0], [1], [0, 0, 1, 1], [], []>} : vector<8x32xf32>, vector<32x32xf32>, vector<8x32xf32> -> vector<8x32xf32>
    %217 = arith.addf %216, %42 : vector<8x32xf32>
    %cst_45 = arith.constant dense<0.000000e+00> : vector<8x32xf32>
    %218 = tpu.matmul %175, %27, %cst_45 {dimension_numbers = #tpu.dot_dimension_numbers<[1], [0], [0], [1], [0, 0, 1, 1], [], []>} : vector<8x32xf32>, vector<32x32xf32>, vector<8x32xf32> -> vector<8x32xf32>
    %219 = arith.addf %218, %45 : vector<8x32xf32>
    %220 = arith.addf %209, %215 : vector<8x32xf32>
    %221 = arith.negf %220 : vector<8x32xf32>
    %222 = math.exp %221 : vector<8x32xf32>
    %cst_46 = arith.constant 1.000000e+00 : f32
    %223 = vector.broadcast %cst_46 : f32 to vector<8x32xf32>
    %224 = arith.addf %223, %222 : vector<8x32xf32>
    %225 = arith.divf %223, %224 : vector<8x32xf32>
    %226 = arith.addf %211, %217 : vector<8x32xf32>
    %227 = arith.negf %226 : vector<8x32xf32>
    %228 = math.exp %227 : vector<8x32xf32>
    %cst_47 = arith.constant 1.000000e+00 : f32
    %229 = vector.broadcast %cst_47 : f32 to vector<8x32xf32>
    %230 = arith.addf %229, %228 : vector<8x32xf32>
    %231 = arith.divf %229, %230 : vector<8x32xf32>
    %232 = arith.mulf %225, %219 : vector<8x32xf32>
    %233 = arith.addf %213, %232 : vector<8x32xf32>
    %234 = math.tanh %233 : vector<8x32xf32>
    %cst_48 = arith.constant 1.000000e+00 : f32
    %235 = vector.broadcast %cst_48 : f32 to vector<8x32xf32>
    %236 = arith.subf %235, %231 : vector<8x32xf32>
    %237 = arith.mulf %236, %234 : vector<8x32xf32>
    %238 = arith.mulf %231, %175 : vector<8x32xf32>
    %239 = arith.addf %237, %238 : vector<8x32xf32>
    %240 = vector.extract_strided_slice %8 {offsets = [3, 0, 0], sizes = [1, 8, 32], strides = [1, 1, 1]} : vector<8x8x32xf32> to vector<1x8x32xf32>
    %241 = vector.shape_cast %240 : vector<1x8x32xf32> to vector<8x32xf32>
    %242 = vector.extract_strided_slice %9 {offsets = [3, 0, 0], sizes = [1, 8, 32], strides = [1, 1, 1]} : vector<8x8x32xf32> to vector<1x8x32xf32>
    %243 = vector.shape_cast %242 : vector<1x8x32xf32> to vector<8x32xf32>
    %244 = vector.extract_strided_slice %10 {offsets = [3, 0, 0], sizes = [1, 8, 32], strides = [1, 1, 1]} : vector<8x8x32xf32> to vector<1x8x32xf32>
    %245 = vector.shape_cast %244 : vector<1x8x32xf32> to vector<8x32xf32>
    %cst_49 = arith.constant dense<0.000000e+00> : vector<8x32xf32>
    %246 = tpu.matmul %207, %17, %cst_49 {dimension_numbers = #tpu.dot_dimension_numbers<[1], [0], [0], [1], [0, 0, 1, 1], [], []>} : vector<8x32xf32>, vector<32x32xf32>, vector<8x32xf32> -> vector<8x32xf32>
    %247 = arith.addf %246, %30 : vector<8x32xf32>
    %cst_50 = arith.constant dense<0.000000e+00> : vector<8x32xf32>
    %248 = tpu.matmul %207, %19, %cst_50 {dimension_numbers = #tpu.dot_dimension_numbers<[1], [0], [0], [1], [0, 0, 1, 1], [], []>} : vector<8x32xf32>, vector<32x32xf32>, vector<8x32xf32> -> vector<8x32xf32>
    %249 = arith.addf %248, %33 : vector<8x32xf32>
    %cst_51 = arith.constant dense<0.000000e+00> : vector<8x32xf32>
    %250 = tpu.matmul %207, %21, %cst_51 {dimension_numbers = #tpu.dot_dimension_numbers<[1], [0], [0], [1], [0, 0, 1, 1], [], []>} : vector<8x32xf32>, vector<32x32xf32>, vector<8x32xf32> -> vector<8x32xf32>
    %251 = arith.addf %250, %36 : vector<8x32xf32>
    %252 = arith.addf %241, %247 : vector<8x32xf32>
    %253 = arith.negf %252 : vector<8x32xf32>
    %254 = math.exp %253 : vector<8x32xf32>
    %cst_52 = arith.constant 1.000000e+00 : f32
    %255 = vector.broadcast %cst_52 : f32 to vector<8x32xf32>
    %256 = arith.addf %255, %254 : vector<8x32xf32>
    %257 = arith.divf %255, %256 : vector<8x32xf32>
    %258 = arith.addf %243, %249 : vector<8x32xf32>
    %259 = arith.negf %258 : vector<8x32xf32>
    %260 = math.exp %259 : vector<8x32xf32>
    %cst_53 = arith.constant 1.000000e+00 : f32
    %261 = vector.broadcast %cst_53 : f32 to vector<8x32xf32>
    %262 = arith.addf %261, %260 : vector<8x32xf32>
    %263 = arith.divf %261, %262 : vector<8x32xf32>
    %264 = arith.mulf %257, %251 : vector<8x32xf32>
    %265 = arith.addf %245, %264 : vector<8x32xf32>
    %266 = math.tanh %265 : vector<8x32xf32>
    %cst_54 = arith.constant 1.000000e+00 : f32
    %267 = vector.broadcast %cst_54 : f32 to vector<8x32xf32>
    %268 = arith.subf %267, %263 : vector<8x32xf32>
    %269 = arith.mulf %268, %266 : vector<8x32xf32>
    %270 = arith.mulf %263, %207 : vector<8x32xf32>
    %271 = arith.addf %269, %270 : vector<8x32xf32>
    %272 = vector.extract_strided_slice %11 {offsets = [4, 0, 0], sizes = [1, 8, 32], strides = [1, 1, 1]} : vector<8x8x32xf32> to vector<1x8x32xf32>
    %273 = vector.shape_cast %272 : vector<1x8x32xf32> to vector<8x32xf32>
    %274 = vector.extract_strided_slice %12 {offsets = [4, 0, 0], sizes = [1, 8, 32], strides = [1, 1, 1]} : vector<8x8x32xf32> to vector<1x8x32xf32>
    %275 = vector.shape_cast %274 : vector<1x8x32xf32> to vector<8x32xf32>
    %276 = vector.extract_strided_slice %13 {offsets = [4, 0, 0], sizes = [1, 8, 32], strides = [1, 1, 1]} : vector<8x8x32xf32> to vector<1x8x32xf32>
    %277 = vector.shape_cast %276 : vector<1x8x32xf32> to vector<8x32xf32>
    %cst_55 = arith.constant dense<0.000000e+00> : vector<8x32xf32>
    %278 = tpu.matmul %239, %23, %cst_55 {dimension_numbers = #tpu.dot_dimension_numbers<[1], [0], [0], [1], [0, 0, 1, 1], [], []>} : vector<8x32xf32>, vector<32x32xf32>, vector<8x32xf32> -> vector<8x32xf32>
    %279 = arith.addf %278, %39 : vector<8x32xf32>
    %cst_56 = arith.constant dense<0.000000e+00> : vector<8x32xf32>
    %280 = tpu.matmul %239, %25, %cst_56 {dimension_numbers = #tpu.dot_dimension_numbers<[1], [0], [0], [1], [0, 0, 1, 1], [], []>} : vector<8x32xf32>, vector<32x32xf32>, vector<8x32xf32> -> vector<8x32xf32>
    %281 = arith.addf %280, %42 : vector<8x32xf32>
    %cst_57 = arith.constant dense<0.000000e+00> : vector<8x32xf32>
    %282 = tpu.matmul %239, %27, %cst_57 {dimension_numbers = #tpu.dot_dimension_numbers<[1], [0], [0], [1], [0, 0, 1, 1], [], []>} : vector<8x32xf32>, vector<32x32xf32>, vector<8x32xf32> -> vector<8x32xf32>
    %283 = arith.addf %282, %45 : vector<8x32xf32>
    %284 = arith.addf %273, %279 : vector<8x32xf32>
    %285 = arith.negf %284 : vector<8x32xf32>
    %286 = math.exp %285 : vector<8x32xf32>
    %cst_58 = arith.constant 1.000000e+00 : f32
    %287 = vector.broadcast %cst_58 : f32 to vector<8x32xf32>
    %288 = arith.addf %287, %286 : vector<8x32xf32>
    %289 = arith.divf %287, %288 : vector<8x32xf32>
    %290 = arith.addf %275, %281 : vector<8x32xf32>
    %291 = arith.negf %290 : vector<8x32xf32>
    %292 = math.exp %291 : vector<8x32xf32>
    %cst_59 = arith.constant 1.000000e+00 : f32
    %293 = vector.broadcast %cst_59 : f32 to vector<8x32xf32>
    %294 = arith.addf %293, %292 : vector<8x32xf32>
    %295 = arith.divf %293, %294 : vector<8x32xf32>
    %296 = arith.mulf %289, %283 : vector<8x32xf32>
    %297 = arith.addf %277, %296 : vector<8x32xf32>
    %298 = math.tanh %297 : vector<8x32xf32>
    %cst_60 = arith.constant 1.000000e+00 : f32
    %299 = vector.broadcast %cst_60 : f32 to vector<8x32xf32>
    %300 = arith.subf %299, %295 : vector<8x32xf32>
    %301 = arith.mulf %300, %298 : vector<8x32xf32>
    %302 = arith.mulf %295, %239 : vector<8x32xf32>
    %303 = arith.addf %301, %302 : vector<8x32xf32>
    %304 = vector.extract_strided_slice %8 {offsets = [4, 0, 0], sizes = [1, 8, 32], strides = [1, 1, 1]} : vector<8x8x32xf32> to vector<1x8x32xf32>
    %305 = vector.shape_cast %304 : vector<1x8x32xf32> to vector<8x32xf32>
    %306 = vector.extract_strided_slice %9 {offsets = [4, 0, 0], sizes = [1, 8, 32], strides = [1, 1, 1]} : vector<8x8x32xf32> to vector<1x8x32xf32>
    %307 = vector.shape_cast %306 : vector<1x8x32xf32> to vector<8x32xf32>
    %308 = vector.extract_strided_slice %10 {offsets = [4, 0, 0], sizes = [1, 8, 32], strides = [1, 1, 1]} : vector<8x8x32xf32> to vector<1x8x32xf32>
    %309 = vector.shape_cast %308 : vector<1x8x32xf32> to vector<8x32xf32>
    %cst_61 = arith.constant dense<0.000000e+00> : vector<8x32xf32>
    %310 = tpu.matmul %271, %17, %cst_61 {dimension_numbers = #tpu.dot_dimension_numbers<[1], [0], [0], [1], [0, 0, 1, 1], [], []>} : vector<8x32xf32>, vector<32x32xf32>, vector<8x32xf32> -> vector<8x32xf32>
    %311 = arith.addf %310, %30 : vector<8x32xf32>
    %cst_62 = arith.constant dense<0.000000e+00> : vector<8x32xf32>
    %312 = tpu.matmul %271, %19, %cst_62 {dimension_numbers = #tpu.dot_dimension_numbers<[1], [0], [0], [1], [0, 0, 1, 1], [], []>} : vector<8x32xf32>, vector<32x32xf32>, vector<8x32xf32> -> vector<8x32xf32>
    %313 = arith.addf %312, %33 : vector<8x32xf32>
    %cst_63 = arith.constant dense<0.000000e+00> : vector<8x32xf32>
    %314 = tpu.matmul %271, %21, %cst_63 {dimension_numbers = #tpu.dot_dimension_numbers<[1], [0], [0], [1], [0, 0, 1, 1], [], []>} : vector<8x32xf32>, vector<32x32xf32>, vector<8x32xf32> -> vector<8x32xf32>
    %315 = arith.addf %314, %36 : vector<8x32xf32>
    %316 = arith.addf %305, %311 : vector<8x32xf32>
    %317 = arith.negf %316 : vector<8x32xf32>
    %318 = math.exp %317 : vector<8x32xf32>
    %cst_64 = arith.constant 1.000000e+00 : f32
    %319 = vector.broadcast %cst_64 : f32 to vector<8x32xf32>
    %320 = arith.addf %319, %318 : vector<8x32xf32>
    %321 = arith.divf %319, %320 : vector<8x32xf32>
    %322 = arith.addf %307, %313 : vector<8x32xf32>
    %323 = arith.negf %322 : vector<8x32xf32>
    %324 = math.exp %323 : vector<8x32xf32>
    %cst_65 = arith.constant 1.000000e+00 : f32
    %325 = vector.broadcast %cst_65 : f32 to vector<8x32xf32>
    %326 = arith.addf %325, %324 : vector<8x32xf32>
    %327 = arith.divf %325, %326 : vector<8x32xf32>
    %328 = arith.mulf %321, %315 : vector<8x32xf32>
    %329 = arith.addf %309, %328 : vector<8x32xf32>
    %330 = math.tanh %329 : vector<8x32xf32>
    %cst_66 = arith.constant 1.000000e+00 : f32
    %331 = vector.broadcast %cst_66 : f32 to vector<8x32xf32>
    %332 = arith.subf %331, %327 : vector<8x32xf32>
    %333 = arith.mulf %332, %330 : vector<8x32xf32>
    %334 = arith.mulf %327, %271 : vector<8x32xf32>
    %335 = arith.addf %333, %334 : vector<8x32xf32>
    %336 = vector.extract_strided_slice %11 {offsets = [3, 0, 0], sizes = [1, 8, 32], strides = [1, 1, 1]} : vector<8x8x32xf32> to vector<1x8x32xf32>
    %337 = vector.shape_cast %336 : vector<1x8x32xf32> to vector<8x32xf32>
    %338 = vector.extract_strided_slice %12 {offsets = [3, 0, 0], sizes = [1, 8, 32], strides = [1, 1, 1]} : vector<8x8x32xf32> to vector<1x8x32xf32>
    %339 = vector.shape_cast %338 : vector<1x8x32xf32> to vector<8x32xf32>
    %340 = vector.extract_strided_slice %13 {offsets = [3, 0, 0], sizes = [1, 8, 32], strides = [1, 1, 1]} : vector<8x8x32xf32> to vector<1x8x32xf32>
    %341 = vector.shape_cast %340 : vector<1x8x32xf32> to vector<8x32xf32>
    %cst_67 = arith.constant dense<0.000000e+00> : vector<8x32xf32>
    %342 = tpu.matmul %303, %23, %cst_67 {dimension_numbers = #tpu.dot_dimension_numbers<[1], [0], [0], [1], [0, 0, 1, 1], [], []>} : vector<8x32xf32>, vector<32x32xf32>, vector<8x32xf32> -> vector<8x32xf32>
    %343 = arith.addf %342, %39 : vector<8x32xf32>
    %cst_68 = arith.constant dense<0.000000e+00> : vector<8x32xf32>
    %344 = tpu.matmul %303, %25, %cst_68 {dimension_numbers = #tpu.dot_dimension_numbers<[1], [0], [0], [1], [0, 0, 1, 1], [], []>} : vector<8x32xf32>, vector<32x32xf32>, vector<8x32xf32> -> vector<8x32xf32>
    %345 = arith.addf %344, %42 : vector<8x32xf32>
    %cst_69 = arith.constant dense<0.000000e+00> : vector<8x32xf32>
    %346 = tpu.matmul %303, %27, %cst_69 {dimension_numbers = #tpu.dot_dimension_numbers<[1], [0], [0], [1], [0, 0, 1, 1], [], []>} : vector<8x32xf32>, vector<32x32xf32>, vector<8x32xf32> -> vector<8x32xf32>
    %347 = arith.addf %346, %45 : vector<8x32xf32>
    %348 = arith.addf %337, %343 : vector<8x32xf32>
    %349 = arith.negf %348 : vector<8x32xf32>
    %350 = math.exp %349 : vector<8x32xf32>
    %cst_70 = arith.constant 1.000000e+00 : f32
    %351 = vector.broadcast %cst_70 : f32 to vector<8x32xf32>
    %352 = arith.addf %351, %350 : vector<8x32xf32>
    %353 = arith.divf %351, %352 : vector<8x32xf32>
    %354 = arith.addf %339, %345 : vector<8x32xf32>
    %355 = arith.negf %354 : vector<8x32xf32>
    %356 = math.exp %355 : vector<8x32xf32>
    %cst_71 = arith.constant 1.000000e+00 : f32
    %357 = vector.broadcast %cst_71 : f32 to vector<8x32xf32>
    %358 = arith.addf %357, %356 : vector<8x32xf32>
    %359 = arith.divf %357, %358 : vector<8x32xf32>
    %360 = arith.mulf %353, %347 : vector<8x32xf32>
    %361 = arith.addf %341, %360 : vector<8x32xf32>
    %362 = math.tanh %361 : vector<8x32xf32>
    %cst_72 = arith.constant 1.000000e+00 : f32
    %363 = vector.broadcast %cst_72 : f32 to vector<8x32xf32>
    %364 = arith.subf %363, %359 : vector<8x32xf32>
    %365 = arith.mulf %364, %362 : vector<8x32xf32>
    %366 = arith.mulf %359, %303 : vector<8x32xf32>
    %367 = arith.addf %365, %366 : vector<8x32xf32>
    %368 = vector.extract_strided_slice %8 {offsets = [5, 0, 0], sizes = [1, 8, 32], strides = [1, 1, 1]} : vector<8x8x32xf32> to vector<1x8x32xf32>
    %369 = vector.shape_cast %368 : vector<1x8x32xf32> to vector<8x32xf32>
    %370 = vector.extract_strided_slice %9 {offsets = [5, 0, 0], sizes = [1, 8, 32], strides = [1, 1, 1]} : vector<8x8x32xf32> to vector<1x8x32xf32>
    %371 = vector.shape_cast %370 : vector<1x8x32xf32> to vector<8x32xf32>
    %372 = vector.extract_strided_slice %10 {offsets = [5, 0, 0], sizes = [1, 8, 32], strides = [1, 1, 1]} : vector<8x8x32xf32> to vector<1x8x32xf32>
    %373 = vector.shape_cast %372 : vector<1x8x32xf32> to vector<8x32xf32>
    %cst_73 = arith.constant dense<0.000000e+00> : vector<8x32xf32>
    %374 = tpu.matmul %335, %17, %cst_73 {dimension_numbers = #tpu.dot_dimension_numbers<[1], [0], [0], [1], [0, 0, 1, 1], [], []>} : vector<8x32xf32>, vector<32x32xf32>, vector<8x32xf32> -> vector<8x32xf32>
    %375 = arith.addf %374, %30 : vector<8x32xf32>
    %cst_74 = arith.constant dense<0.000000e+00> : vector<8x32xf32>
    %376 = tpu.matmul %335, %19, %cst_74 {dimension_numbers = #tpu.dot_dimension_numbers<[1], [0], [0], [1], [0, 0, 1, 1], [], []>} : vector<8x32xf32>, vector<32x32xf32>, vector<8x32xf32> -> vector<8x32xf32>
    %377 = arith.addf %376, %33 : vector<8x32xf32>
    %cst_75 = arith.constant dense<0.000000e+00> : vector<8x32xf32>
    %378 = tpu.matmul %335, %21, %cst_75 {dimension_numbers = #tpu.dot_dimension_numbers<[1], [0], [0], [1], [0, 0, 1, 1], [], []>} : vector<8x32xf32>, vector<32x32xf32>, vector<8x32xf32> -> vector<8x32xf32>
    %379 = arith.addf %378, %36 : vector<8x32xf32>
    %380 = arith.addf %369, %375 : vector<8x32xf32>
    %381 = arith.negf %380 : vector<8x32xf32>
    %382 = math.exp %381 : vector<8x32xf32>
    %cst_76 = arith.constant 1.000000e+00 : f32
    %383 = vector.broadcast %cst_76 : f32 to vector<8x32xf32>
    %384 = arith.addf %383, %382 : vector<8x32xf32>
    %385 = arith.divf %383, %384 : vector<8x32xf32>
    %386 = arith.addf %371, %377 : vector<8x32xf32>
    %387 = arith.negf %386 : vector<8x32xf32>
    %388 = math.exp %387 : vector<8x32xf32>
    %cst_77 = arith.constant 1.000000e+00 : f32
    %389 = vector.broadcast %cst_77 : f32 to vector<8x32xf32>
    %390 = arith.addf %389, %388 : vector<8x32xf32>
    %391 = arith.divf %389, %390 : vector<8x32xf32>
    %392 = arith.mulf %385, %379 : vector<8x32xf32>
    %393 = arith.addf %373, %392 : vector<8x32xf32>
    %394 = math.tanh %393 : vector<8x32xf32>
    %cst_78 = arith.constant 1.000000e+00 : f32
    %395 = vector.broadcast %cst_78 : f32 to vector<8x32xf32>
    %396 = arith.subf %395, %391 : vector<8x32xf32>
    %397 = arith.mulf %396, %394 : vector<8x32xf32>
    %398 = arith.mulf %391, %335 : vector<8x32xf32>
    %399 = arith.addf %397, %398 : vector<8x32xf32>
    %400 = vector.extract_strided_slice %11 {offsets = [2, 0, 0], sizes = [1, 8, 32], strides = [1, 1, 1]} : vector<8x8x32xf32> to vector<1x8x32xf32>
    %401 = vector.shape_cast %400 : vector<1x8x32xf32> to vector<8x32xf32>
    %402 = vector.extract_strided_slice %12 {offsets = [2, 0, 0], sizes = [1, 8, 32], strides = [1, 1, 1]} : vector<8x8x32xf32> to vector<1x8x32xf32>
    %403 = vector.shape_cast %402 : vector<1x8x32xf32> to vector<8x32xf32>
    %404 = vector.extract_strided_slice %13 {offsets = [2, 0, 0], sizes = [1, 8, 32], strides = [1, 1, 1]} : vector<8x8x32xf32> to vector<1x8x32xf32>
    %405 = vector.shape_cast %404 : vector<1x8x32xf32> to vector<8x32xf32>
    %cst_79 = arith.constant dense<0.000000e+00> : vector<8x32xf32>
    %406 = tpu.matmul %367, %23, %cst_79 {dimension_numbers = #tpu.dot_dimension_numbers<[1], [0], [0], [1], [0, 0, 1, 1], [], []>} : vector<8x32xf32>, vector<32x32xf32>, vector<8x32xf32> -> vector<8x32xf32>
    %407 = arith.addf %406, %39 : vector<8x32xf32>
    %cst_80 = arith.constant dense<0.000000e+00> : vector<8x32xf32>
    %408 = tpu.matmul %367, %25, %cst_80 {dimension_numbers = #tpu.dot_dimension_numbers<[1], [0], [0], [1], [0, 0, 1, 1], [], []>} : vector<8x32xf32>, vector<32x32xf32>, vector<8x32xf32> -> vector<8x32xf32>
    %409 = arith.addf %408, %42 : vector<8x32xf32>
    %cst_81 = arith.constant dense<0.000000e+00> : vector<8x32xf32>
    %410 = tpu.matmul %367, %27, %cst_81 {dimension_numbers = #tpu.dot_dimension_numbers<[1], [0], [0], [1], [0, 0, 1, 1], [], []>} : vector<8x32xf32>, vector<32x32xf32>, vector<8x32xf32> -> vector<8x32xf32>
    %411 = arith.addf %410, %45 : vector<8x32xf32>
    %412 = arith.addf %401, %407 : vector<8x32xf32>
    %413 = arith.negf %412 : vector<8x32xf32>
    %414 = math.exp %413 : vector<8x32xf32>
    %cst_82 = arith.constant 1.000000e+00 : f32
    %415 = vector.broadcast %cst_82 : f32 to vector<8x32xf32>
    %416 = arith.addf %415, %414 : vector<8x32xf32>
    %417 = arith.divf %415, %416 : vector<8x32xf32>
    %418 = arith.addf %403, %409 : vector<8x32xf32>
    %419 = arith.negf %418 : vector<8x32xf32>
    %420 = math.exp %419 : vector<8x32xf32>
    %cst_83 = arith.constant 1.000000e+00 : f32
    %421 = vector.broadcast %cst_83 : f32 to vector<8x32xf32>
    %422 = arith.addf %421, %420 : vector<8x32xf32>
    %423 = arith.divf %421, %422 : vector<8x32xf32>
    %424 = arith.mulf %417, %411 : vector<8x32xf32>
    %425 = arith.addf %405, %424 : vector<8x32xf32>
    %426 = math.tanh %425 : vector<8x32xf32>
    %cst_84 = arith.constant 1.000000e+00 : f32
    %427 = vector.broadcast %cst_84 : f32 to vector<8x32xf32>
    %428 = arith.subf %427, %423 : vector<8x32xf32>
    %429 = arith.mulf %428, %426 : vector<8x32xf32>
    %430 = arith.mulf %423, %367 : vector<8x32xf32>
    %431 = arith.addf %429, %430 : vector<8x32xf32>
    %432 = vector.extract_strided_slice %8 {offsets = [6, 0, 0], sizes = [1, 8, 32], strides = [1, 1, 1]} : vector<8x8x32xf32> to vector<1x8x32xf32>
    %433 = vector.shape_cast %432 : vector<1x8x32xf32> to vector<8x32xf32>
    %434 = vector.extract_strided_slice %9 {offsets = [6, 0, 0], sizes = [1, 8, 32], strides = [1, 1, 1]} : vector<8x8x32xf32> to vector<1x8x32xf32>
    %435 = vector.shape_cast %434 : vector<1x8x32xf32> to vector<8x32xf32>
    %436 = vector.extract_strided_slice %10 {offsets = [6, 0, 0], sizes = [1, 8, 32], strides = [1, 1, 1]} : vector<8x8x32xf32> to vector<1x8x32xf32>
    %437 = vector.shape_cast %436 : vector<1x8x32xf32> to vector<8x32xf32>
    %cst_85 = arith.constant dense<0.000000e+00> : vector<8x32xf32>
    %438 = tpu.matmul %399, %17, %cst_85 {dimension_numbers = #tpu.dot_dimension_numbers<[1], [0], [0], [1], [0, 0, 1, 1], [], []>} : vector<8x32xf32>, vector<32x32xf32>, vector<8x32xf32> -> vector<8x32xf32>
    %439 = arith.addf %438, %30 : vector<8x32xf32>
    %cst_86 = arith.constant dense<0.000000e+00> : vector<8x32xf32>
    %440 = tpu.matmul %399, %19, %cst_86 {dimension_numbers = #tpu.dot_dimension_numbers<[1], [0], [0], [1], [0, 0, 1, 1], [], []>} : vector<8x32xf32>, vector<32x32xf32>, vector<8x32xf32> -> vector<8x32xf32>
    %441 = arith.addf %440, %33 : vector<8x32xf32>
    %cst_87 = arith.constant dense<0.000000e+00> : vector<8x32xf32>
    %442 = tpu.matmul %399, %21, %cst_87 {dimension_numbers = #tpu.dot_dimension_numbers<[1], [0], [0], [1], [0, 0, 1, 1], [], []>} : vector<8x32xf32>, vector<32x32xf32>, vector<8x32xf32> -> vector<8x32xf32>
    %443 = arith.addf %442, %36 : vector<8x32xf32>
    %444 = arith.addf %433, %439 : vector<8x32xf32>
    %445 = arith.negf %444 : vector<8x32xf32>
    %446 = math.exp %445 : vector<8x32xf32>
    %cst_88 = arith.constant 1.000000e+00 : f32
    %447 = vector.broadcast %cst_88 : f32 to vector<8x32xf32>
    %448 = arith.addf %447, %446 : vector<8x32xf32>
    %449 = arith.divf %447, %448 : vector<8x32xf32>
    %450 = arith.addf %435, %441 : vector<8x32xf32>
    %451 = arith.negf %450 : vector<8x32xf32>
    %452 = math.exp %451 : vector<8x32xf32>
    %cst_89 = arith.constant 1.000000e+00 : f32
    %453 = vector.broadcast %cst_89 : f32 to vector<8x32xf32>
    %454 = arith.addf %453, %452 : vector<8x32xf32>
    %455 = arith.divf %453, %454 : vector<8x32xf32>
    %456 = arith.mulf %449, %443 : vector<8x32xf32>
    %457 = arith.addf %437, %456 : vector<8x32xf32>
    %458 = math.tanh %457 : vector<8x32xf32>
    %cst_90 = arith.constant 1.000000e+00 : f32
    %459 = vector.broadcast %cst_90 : f32 to vector<8x32xf32>
    %460 = arith.subf %459, %455 : vector<8x32xf32>
    %461 = arith.mulf %460, %458 : vector<8x32xf32>
    %462 = arith.mulf %455, %399 : vector<8x32xf32>
    %463 = arith.addf %461, %462 : vector<8x32xf32>
    %464 = vector.extract_strided_slice %11 {offsets = [1, 0, 0], sizes = [1, 8, 32], strides = [1, 1, 1]} : vector<8x8x32xf32> to vector<1x8x32xf32>
    %465 = vector.shape_cast %464 : vector<1x8x32xf32> to vector<8x32xf32>
    %466 = vector.extract_strided_slice %12 {offsets = [1, 0, 0], sizes = [1, 8, 32], strides = [1, 1, 1]} : vector<8x8x32xf32> to vector<1x8x32xf32>
    %467 = vector.shape_cast %466 : vector<1x8x32xf32> to vector<8x32xf32>
    %468 = vector.extract_strided_slice %13 {offsets = [1, 0, 0], sizes = [1, 8, 32], strides = [1, 1, 1]} : vector<8x8x32xf32> to vector<1x8x32xf32>
    %469 = vector.shape_cast %468 : vector<1x8x32xf32> to vector<8x32xf32>
    %cst_91 = arith.constant dense<0.000000e+00> : vector<8x32xf32>
    %470 = tpu.matmul %431, %23, %cst_91 {dimension_numbers = #tpu.dot_dimension_numbers<[1], [0], [0], [1], [0, 0, 1, 1], [], []>} : vector<8x32xf32>, vector<32x32xf32>, vector<8x32xf32> -> vector<8x32xf32>
    %471 = arith.addf %470, %39 : vector<8x32xf32>
    %cst_92 = arith.constant dense<0.000000e+00> : vector<8x32xf32>
    %472 = tpu.matmul %431, %25, %cst_92 {dimension_numbers = #tpu.dot_dimension_numbers<[1], [0], [0], [1], [0, 0, 1, 1], [], []>} : vector<8x32xf32>, vector<32x32xf32>, vector<8x32xf32> -> vector<8x32xf32>
    %473 = arith.addf %472, %42 : vector<8x32xf32>
    %cst_93 = arith.constant dense<0.000000e+00> : vector<8x32xf32>
    %474 = tpu.matmul %431, %27, %cst_93 {dimension_numbers = #tpu.dot_dimension_numbers<[1], [0], [0], [1], [0, 0, 1, 1], [], []>} : vector<8x32xf32>, vector<32x32xf32>, vector<8x32xf32> -> vector<8x32xf32>
    %475 = arith.addf %474, %45 : vector<8x32xf32>
    %476 = arith.addf %465, %471 : vector<8x32xf32>
    %477 = arith.negf %476 : vector<8x32xf32>
    %478 = math.exp %477 : vector<8x32xf32>
    %cst_94 = arith.constant 1.000000e+00 : f32
    %479 = vector.broadcast %cst_94 : f32 to vector<8x32xf32>
    %480 = arith.addf %479, %478 : vector<8x32xf32>
    %481 = arith.divf %479, %480 : vector<8x32xf32>
    %482 = arith.addf %467, %473 : vector<8x32xf32>
    %483 = arith.negf %482 : vector<8x32xf32>
    %484 = math.exp %483 : vector<8x32xf32>
    %cst_95 = arith.constant 1.000000e+00 : f32
    %485 = vector.broadcast %cst_95 : f32 to vector<8x32xf32>
    %486 = arith.addf %485, %484 : vector<8x32xf32>
    %487 = arith.divf %485, %486 : vector<8x32xf32>
    %488 = arith.mulf %481, %475 : vector<8x32xf32>
    %489 = arith.addf %469, %488 : vector<8x32xf32>
    %490 = math.tanh %489 : vector<8x32xf32>
    %cst_96 = arith.constant 1.000000e+00 : f32
    %491 = vector.broadcast %cst_96 : f32 to vector<8x32xf32>
    %492 = arith.subf %491, %487 : vector<8x32xf32>
    %493 = arith.mulf %492, %490 : vector<8x32xf32>
    %494 = arith.mulf %487, %431 : vector<8x32xf32>
    %495 = arith.addf %493, %494 : vector<8x32xf32>
    %496 = vector.extract_strided_slice %8 {offsets = [7, 0, 0], sizes = [1, 8, 32], strides = [1, 1, 1]} : vector<8x8x32xf32> to vector<1x8x32xf32>
    %497 = vector.shape_cast %496 : vector<1x8x32xf32> to vector<8x32xf32>
    %498 = vector.extract_strided_slice %9 {offsets = [7, 0, 0], sizes = [1, 8, 32], strides = [1, 1, 1]} : vector<8x8x32xf32> to vector<1x8x32xf32>
    %499 = vector.shape_cast %498 : vector<1x8x32xf32> to vector<8x32xf32>
    %500 = vector.extract_strided_slice %10 {offsets = [7, 0, 0], sizes = [1, 8, 32], strides = [1, 1, 1]} : vector<8x8x32xf32> to vector<1x8x32xf32>
    %501 = vector.shape_cast %500 : vector<1x8x32xf32> to vector<8x32xf32>
    %cst_97 = arith.constant dense<0.000000e+00> : vector<8x32xf32>
    %502 = tpu.matmul %463, %17, %cst_97 {dimension_numbers = #tpu.dot_dimension_numbers<[1], [0], [0], [1], [0, 0, 1, 1], [], []>} : vector<8x32xf32>, vector<32x32xf32>, vector<8x32xf32> -> vector<8x32xf32>
    %503 = arith.addf %502, %30 : vector<8x32xf32>
    %cst_98 = arith.constant dense<0.000000e+00> : vector<8x32xf32>
    %504 = tpu.matmul %463, %19, %cst_98 {dimension_numbers = #tpu.dot_dimension_numbers<[1], [0], [0], [1], [0, 0, 1, 1], [], []>} : vector<8x32xf32>, vector<32x32xf32>, vector<8x32xf32> -> vector<8x32xf32>
    %505 = arith.addf %504, %33 : vector<8x32xf32>
    %cst_99 = arith.constant dense<0.000000e+00> : vector<8x32xf32>
    %506 = tpu.matmul %463, %21, %cst_99 {dimension_numbers = #tpu.dot_dimension_numbers<[1], [0], [0], [1], [0, 0, 1, 1], [], []>} : vector<8x32xf32>, vector<32x32xf32>, vector<8x32xf32> -> vector<8x32xf32>
    %507 = arith.addf %506, %36 : vector<8x32xf32>
    %508 = arith.addf %497, %503 : vector<8x32xf32>
    %509 = arith.negf %508 : vector<8x32xf32>
    %510 = math.exp %509 : vector<8x32xf32>
    %cst_100 = arith.constant 1.000000e+00 : f32
    %511 = vector.broadcast %cst_100 : f32 to vector<8x32xf32>
    %512 = arith.addf %511, %510 : vector<8x32xf32>
    %513 = arith.divf %511, %512 : vector<8x32xf32>
    %514 = arith.addf %499, %505 : vector<8x32xf32>
    %515 = arith.negf %514 : vector<8x32xf32>
    %516 = math.exp %515 : vector<8x32xf32>
    %cst_101 = arith.constant 1.000000e+00 : f32
    %517 = vector.broadcast %cst_101 : f32 to vector<8x32xf32>
    %518 = arith.addf %517, %516 : vector<8x32xf32>
    %519 = arith.divf %517, %518 : vector<8x32xf32>
    %520 = arith.mulf %513, %507 : vector<8x32xf32>
    %521 = arith.addf %501, %520 : vector<8x32xf32>
    %522 = math.tanh %521 : vector<8x32xf32>
    %cst_102 = arith.constant 1.000000e+00 : f32
    %523 = vector.broadcast %cst_102 : f32 to vector<8x32xf32>
    %524 = arith.subf %523, %519 : vector<8x32xf32>
    %525 = arith.mulf %524, %522 : vector<8x32xf32>
    %526 = arith.mulf %519, %463 : vector<8x32xf32>
    %527 = arith.addf %525, %526 : vector<8x32xf32>
    %528 = vector.extract_strided_slice %11 {offsets = [0, 0, 0], sizes = [1, 8, 32], strides = [1, 1, 1]} : vector<8x8x32xf32> to vector<1x8x32xf32>
    %529 = vector.shape_cast %528 : vector<1x8x32xf32> to vector<8x32xf32>
    %530 = vector.extract_strided_slice %12 {offsets = [0, 0, 0], sizes = [1, 8, 32], strides = [1, 1, 1]} : vector<8x8x32xf32> to vector<1x8x32xf32>
    %531 = vector.shape_cast %530 : vector<1x8x32xf32> to vector<8x32xf32>
    %532 = vector.extract_strided_slice %13 {offsets = [0, 0, 0], sizes = [1, 8, 32], strides = [1, 1, 1]} : vector<8x8x32xf32> to vector<1x8x32xf32>
    %533 = vector.shape_cast %532 : vector<1x8x32xf32> to vector<8x32xf32>
    %cst_103 = arith.constant dense<0.000000e+00> : vector<8x32xf32>
    %534 = tpu.matmul %495, %23, %cst_103 {dimension_numbers = #tpu.dot_dimension_numbers<[1], [0], [0], [1], [0, 0, 1, 1], [], []>} : vector<8x32xf32>, vector<32x32xf32>, vector<8x32xf32> -> vector<8x32xf32>
    %535 = arith.addf %534, %39 : vector<8x32xf32>
    %cst_104 = arith.constant dense<0.000000e+00> : vector<8x32xf32>
    %536 = tpu.matmul %495, %25, %cst_104 {dimension_numbers = #tpu.dot_dimension_numbers<[1], [0], [0], [1], [0, 0, 1, 1], [], []>} : vector<8x32xf32>, vector<32x32xf32>, vector<8x32xf32> -> vector<8x32xf32>
    %537 = arith.addf %536, %42 : vector<8x32xf32>
    %cst_105 = arith.constant dense<0.000000e+00> : vector<8x32xf32>
    %538 = tpu.matmul %495, %27, %cst_105 {dimension_numbers = #tpu.dot_dimension_numbers<[1], [0], [0], [1], [0, 0, 1, 1], [], []>} : vector<8x32xf32>, vector<32x32xf32>, vector<8x32xf32> -> vector<8x32xf32>
    %539 = arith.addf %538, %45 : vector<8x32xf32>
    %540 = arith.addf %529, %535 : vector<8x32xf32>
    %541 = arith.negf %540 : vector<8x32xf32>
    %542 = math.exp %541 : vector<8x32xf32>
    %cst_106 = arith.constant 1.000000e+00 : f32
    %543 = vector.broadcast %cst_106 : f32 to vector<8x32xf32>
    %544 = arith.addf %543, %542 : vector<8x32xf32>
    %545 = arith.divf %543, %544 : vector<8x32xf32>
    %546 = arith.addf %531, %537 : vector<8x32xf32>
    %547 = arith.negf %546 : vector<8x32xf32>
    %548 = math.exp %547 : vector<8x32xf32>
    %cst_107 = arith.constant 1.000000e+00 : f32
    %549 = vector.broadcast %cst_107 : f32 to vector<8x32xf32>
    %550 = arith.addf %549, %548 : vector<8x32xf32>
    %551 = arith.divf %549, %550 : vector<8x32xf32>
    %552 = arith.mulf %545, %539 : vector<8x32xf32>
    %553 = arith.addf %533, %552 : vector<8x32xf32>
    %554 = math.tanh %553 : vector<8x32xf32>
    %cst_108 = arith.constant 1.000000e+00 : f32
    %555 = vector.broadcast %cst_108 : f32 to vector<8x32xf32>
    %556 = arith.subf %555, %551 : vector<8x32xf32>
    %557 = arith.mulf %556, %554 : vector<8x32xf32>
    %558 = arith.mulf %551, %495 : vector<8x32xf32>
    %559 = arith.addf %557, %558 : vector<8x32xf32>
    %c0_109 = arith.constant 0 : index
    %c0_110 = arith.constant 0 : index
    %560 = vector.load %arg8[%c0_109, %c0_110] : memref<1x32xf32, #tpu.memory_space<vmem>>, vector<1x32xf32>
    %561 = vector.shape_cast %560 : vector<1x32xf32> to vector<1x32xf32>
    %562 = vector.broadcast %561 : vector<1x32xf32> to vector<8x32xf32>
    %c0_111 = arith.constant 0 : index
    %c0_112 = arith.constant 0 : index
    %563 = vector.load %arg9[%c0_111, %c0_112] : memref<1x32xf32, #tpu.memory_space<vmem>>, vector<1x32xf32>
    %564 = vector.shape_cast %563 : vector<1x32xf32> to vector<1x32xf32>
    %565 = vector.broadcast %564 : vector<1x32xf32> to vector<8x32xf32>
    %566 = arith.mulf %79, %562 : vector<8x32xf32>
    %567 = arith.mulf %559, %565 : vector<8x32xf32>
    %568 = arith.addf %566, %567 : vector<8x32xf32>
    %cst_113 = arith.constant dense<0.000000e+00> : vector<8xf32>
    %569 = vector.multi_reduction <add>, %568, %cst_113 [1] : vector<8x32xf32> to vector<8xf32>
    %570 = vector.shape_cast %569 : vector<8xf32> to vector<8x1xf32>
    %571 = arith.mulf %143, %562 : vector<8x32xf32>
    %572 = arith.mulf %495, %565 : vector<8x32xf32>
    %573 = arith.addf %571, %572 : vector<8x32xf32>
    %cst_114 = arith.constant dense<0.000000e+00> : vector<8xf32>
    %574 = vector.multi_reduction <add>, %573, %cst_114 [1] : vector<8x32xf32> to vector<8xf32>
    %575 = vector.shape_cast %574 : vector<8xf32> to vector<8x1xf32>
    %576 = arith.mulf %207, %562 : vector<8x32xf32>
    %577 = arith.mulf %431, %565 : vector<8x32xf32>
    %578 = arith.addf %576, %577 : vector<8x32xf32>
    %cst_115 = arith.constant dense<0.000000e+00> : vector<8xf32>
    %579 = vector.multi_reduction <add>, %578, %cst_115 [1] : vector<8x32xf32> to vector<8xf32>
    %580 = vector.shape_cast %579 : vector<8xf32> to vector<8x1xf32>
    %581 = arith.mulf %271, %562 : vector<8x32xf32>
    %582 = arith.mulf %367, %565 : vector<8x32xf32>
    %583 = arith.addf %581, %582 : vector<8x32xf32>
    %cst_116 = arith.constant dense<0.000000e+00> : vector<8xf32>
    %584 = vector.multi_reduction <add>, %583, %cst_116 [1] : vector<8x32xf32> to vector<8xf32>
    %585 = vector.shape_cast %584 : vector<8xf32> to vector<8x1xf32>
    %586 = arith.mulf %335, %562 : vector<8x32xf32>
    %587 = arith.mulf %303, %565 : vector<8x32xf32>
    %588 = arith.addf %586, %587 : vector<8x32xf32>
    %cst_117 = arith.constant dense<0.000000e+00> : vector<8xf32>
    %589 = vector.multi_reduction <add>, %588, %cst_117 [1] : vector<8x32xf32> to vector<8xf32>
    %590 = vector.shape_cast %589 : vector<8xf32> to vector<8x1xf32>
    %591 = arith.mulf %399, %562 : vector<8x32xf32>
    %592 = arith.mulf %239, %565 : vector<8x32xf32>
    %593 = arith.addf %591, %592 : vector<8x32xf32>
    %cst_118 = arith.constant dense<0.000000e+00> : vector<8xf32>
    %594 = vector.multi_reduction <add>, %593, %cst_118 [1] : vector<8x32xf32> to vector<8xf32>
    %595 = vector.shape_cast %594 : vector<8xf32> to vector<8x1xf32>
    %596 = arith.mulf %463, %562 : vector<8x32xf32>
    %597 = arith.mulf %175, %565 : vector<8x32xf32>
    %598 = arith.addf %596, %597 : vector<8x32xf32>
    %cst_119 = arith.constant dense<0.000000e+00> : vector<8xf32>
    %599 = vector.multi_reduction <add>, %598, %cst_119 [1] : vector<8x32xf32> to vector<8xf32>
    %600 = vector.shape_cast %599 : vector<8xf32> to vector<8x1xf32>
    %601 = arith.mulf %527, %562 : vector<8x32xf32>
    %602 = arith.mulf %111, %565 : vector<8x32xf32>
    %603 = arith.addf %601, %602 : vector<8x32xf32>
    %cst_120 = arith.constant dense<0.000000e+00> : vector<8xf32>
    %604 = vector.multi_reduction <add>, %603, %cst_120 [1] : vector<8x32xf32> to vector<8xf32>
    %605 = vector.shape_cast %604 : vector<8xf32> to vector<8x1xf32>
    %606 = tpu.concatenate %570, %575, %580, %585, %590, %595, %600, %605 in 1 : vector<8x1xf32>, vector<8x1xf32>, vector<8x1xf32>, vector<8x1xf32>, vector<8x1xf32>, vector<8x1xf32>, vector<8x1xf32>, vector<8x1xf32> -> vector<8x8xf32>
    %c0_121 = arith.constant 0 : index
    %c0_122 = arith.constant 0 : index
    %607 = vector.load %arg10[%c0_121, %c0_122] : memref<1x1xf32, #tpu.memory_space<vmem>>, vector<1x1xf32>
    %608 = vector.broadcast %607 : vector<1x1xf32> to vector<8x8xf32>
    %609 = arith.addf %606, %608 : vector<8x8xf32>
    %c0_123 = arith.constant 0 : index
    %c0_124 = arith.constant 0 : index
    %610 = vector.load %arg2[%c0_123, %c0_124] : memref<8x8xf32, #tpu.memory_space<vmem>>, vector<8x8xf32>
    %cst_125 = arith.constant 5.000000e-01 : f32
    %611 = vector.broadcast %cst_125 : f32 to vector<8x8xf32>
    %612 = arith.cmpf ogt, %610, %611 : vector<8x8xf32>
    %cst_126 = arith.constant -1.000000e+30 : f32
    %613 = vector.broadcast %cst_126 : f32 to vector<8x8xf32>
    %614 = arith.select %612, %609, %613 : vector<8x8xi1>, vector<8x8xf32>
    %cst_127 = arith.constant dense<0xFF800000> : vector<8xf32>
    %615 = vector.multi_reduction <maximumf>, %614, %cst_127 [1] : vector<8x8xf32> to vector<8xf32>
    %616 = vector.shape_cast %615 : vector<8xf32> to vector<8x1xf32>
    %617 = vector.broadcast %616 : vector<8x1xf32> to vector<8x8xf32>
    %618 = arith.subf %614, %617 : vector<8x8xf32>
    %619 = math.exp %618 : vector<8x8xf32>
    %cst_128 = arith.constant dense<0.000000e+00> : vector<8xf32>
    %620 = vector.multi_reduction <add>, %619, %cst_128 [1] : vector<8x8xf32> to vector<8xf32>
    %621 = vector.shape_cast %620 : vector<8xf32> to vector<8x1xf32>
    %622 = vector.broadcast %621 : vector<8x1xf32> to vector<8x8xf32>
    %623 = arith.divf %619, %622 : vector<8x8xf32>
    %cst_129 = arith.constant 0.000000e+00 : f32
    %624 = vector.broadcast %cst_129 : f32 to vector<8x32xf32>
    %cst_130 = arith.constant 0.000000e+00 : f32
    %625 = vector.broadcast %cst_130 : f32 to vector<8x32xf32>
    %626 = vector.extract_strided_slice %623 {offsets = [0, 0], sizes = [8, 1], strides = [1, 1]} : vector<8x8xf32> to vector<8x1xf32>
    %627 = vector.broadcast %626 : vector<8x1xf32> to vector<8x32xf32>
    %628 = arith.mulf %627, %79 : vector<8x32xf32>
    %629 = arith.addf %624, %628 : vector<8x32xf32>
    %630 = vector.broadcast %626 : vector<8x1xf32> to vector<8x32xf32>
    %631 = arith.mulf %630, %559 : vector<8x32xf32>
    %632 = arith.addf %625, %631 : vector<8x32xf32>
    %633 = vector.extract_strided_slice %623 {offsets = [0, 1], sizes = [8, 1], strides = [1, 1]} : vector<8x8xf32> to vector<8x1xf32>
    %634 = vector.broadcast %633 : vector<8x1xf32> to vector<8x32xf32>
    %635 = arith.mulf %634, %143 : vector<8x32xf32>
    %636 = arith.addf %629, %635 : vector<8x32xf32>
    %637 = vector.broadcast %633 : vector<8x1xf32> to vector<8x32xf32>
    %638 = arith.mulf %637, %495 : vector<8x32xf32>
    %639 = arith.addf %632, %638 : vector<8x32xf32>
    %640 = vector.extract_strided_slice %623 {offsets = [0, 2], sizes = [8, 1], strides = [1, 1]} : vector<8x8xf32> to vector<8x1xf32>
    %641 = vector.broadcast %640 : vector<8x1xf32> to vector<8x32xf32>
    %642 = arith.mulf %641, %207 : vector<8x32xf32>
    %643 = arith.addf %636, %642 : vector<8x32xf32>
    %644 = vector.broadcast %640 : vector<8x1xf32> to vector<8x32xf32>
    %645 = arith.mulf %644, %431 : vector<8x32xf32>
    %646 = arith.addf %639, %645 : vector<8x32xf32>
    %647 = vector.extract_strided_slice %623 {offsets = [0, 3], sizes = [8, 1], strides = [1, 1]} : vector<8x8xf32> to vector<8x1xf32>
    %648 = vector.broadcast %647 : vector<8x1xf32> to vector<8x32xf32>
    %649 = arith.mulf %648, %271 : vector<8x32xf32>
    %650 = arith.addf %643, %649 : vector<8x32xf32>
    %651 = vector.broadcast %647 : vector<8x1xf32> to vector<8x32xf32>
    %652 = arith.mulf %651, %367 : vector<8x32xf32>
    %653 = arith.addf %646, %652 : vector<8x32xf32>
    %654 = vector.extract_strided_slice %623 {offsets = [0, 4], sizes = [8, 1], strides = [1, 1]} : vector<8x8xf32> to vector<8x1xf32>
    %655 = vector.broadcast %654 : vector<8x1xf32> to vector<8x32xf32>
    %656 = arith.mulf %655, %335 : vector<8x32xf32>
    %657 = arith.addf %650, %656 : vector<8x32xf32>
    %658 = vector.broadcast %654 : vector<8x1xf32> to vector<8x32xf32>
    %659 = arith.mulf %658, %303 : vector<8x32xf32>
    %660 = arith.addf %653, %659 : vector<8x32xf32>
    %661 = vector.extract_strided_slice %623 {offsets = [0, 5], sizes = [8, 1], strides = [1, 1]} : vector<8x8xf32> to vector<8x1xf32>
    %662 = vector.broadcast %661 : vector<8x1xf32> to vector<8x32xf32>
    %663 = arith.mulf %662, %399 : vector<8x32xf32>
    %664 = arith.addf %657, %663 : vector<8x32xf32>
    %665 = vector.broadcast %661 : vector<8x1xf32> to vector<8x32xf32>
    %666 = arith.mulf %665, %239 : vector<8x32xf32>
    %667 = arith.addf %660, %666 : vector<8x32xf32>
    %668 = vector.extract_strided_slice %623 {offsets = [0, 6], sizes = [8, 1], strides = [1, 1]} : vector<8x8xf32> to vector<8x1xf32>
    %669 = vector.broadcast %668 : vector<8x1xf32> to vector<8x32xf32>
    %670 = arith.mulf %669, %463 : vector<8x32xf32>
    %671 = arith.addf %664, %670 : vector<8x32xf32>
    %672 = vector.broadcast %668 : vector<8x1xf32> to vector<8x32xf32>
    %673 = arith.mulf %672, %175 : vector<8x32xf32>
    %674 = arith.addf %667, %673 : vector<8x32xf32>
    %675 = vector.extract_strided_slice %623 {offsets = [0, 7], sizes = [8, 1], strides = [1, 1]} : vector<8x8xf32> to vector<8x1xf32>
    %676 = vector.broadcast %675 : vector<8x1xf32> to vector<8x32xf32>
    %677 = arith.mulf %676, %527 : vector<8x32xf32>
    %678 = arith.addf %671, %677 : vector<8x32xf32>
    %679 = vector.broadcast %675 : vector<8x1xf32> to vector<8x32xf32>
    %680 = arith.mulf %679, %111 : vector<8x32xf32>
    %681 = arith.addf %674, %680 : vector<8x32xf32>
    %c0_131 = arith.constant 0 : index
    %c0_132 = arith.constant 0 : index
    %682 = vector.load %arg11[%c0_131, %c0_132] : memref<32x64xf32, #tpu.memory_space<vmem>>, vector<32x64xf32>
    %cst_133 = arith.constant dense<0.000000e+00> : vector<8x64xf32>
    %683 = tpu.matmul %678, %682, %cst_133 {dimension_numbers = #tpu.dot_dimension_numbers<[1], [0], [0], [1], [0, 0, 1, 1], [], []>} : vector<8x32xf32>, vector<32x64xf32>, vector<8x64xf32> -> vector<8x64xf32>
    %c0_134 = arith.constant 0 : index
    %c0_135 = arith.constant 0 : index
    %684 = vector.load %arg12[%c0_134, %c0_135] : memref<32x64xf32, #tpu.memory_space<vmem>>, vector<32x64xf32>
    %cst_136 = arith.constant dense<0.000000e+00> : vector<8x64xf32>
    %685 = tpu.matmul %681, %684, %cst_136 {dimension_numbers = #tpu.dot_dimension_numbers<[1], [0], [0], [1], [0, 0, 1, 1], [], []>} : vector<8x32xf32>, vector<32x64xf32>, vector<8x64xf32> -> vector<8x64xf32>
    %686 = arith.addf %683, %685 : vector<8x64xf32>
    %c0_137 = arith.constant 0 : index
    %c0_138 = arith.constant 0 : index
    %687 = vector.load %arg3[%c0_137, %c0_138] : memref<8x32xf32, #tpu.memory_space<vmem>>, vector<8x32xf32>
    %c0_139 = arith.constant 0 : index
    %c0_140 = arith.constant 0 : index
    %688 = vector.load %arg13[%c0_139, %c0_140] : memref<32x64xf32, #tpu.memory_space<vmem>>, vector<32x64xf32>
    %cst_141 = arith.constant dense<0.000000e+00> : vector<8x64xf32>
    %689 = tpu.matmul %687, %688, %cst_141 {dimension_numbers = #tpu.dot_dimension_numbers<[1], [0], [0], [1], [0, 0, 1, 1], [], []>} : vector<8x32xf32>, vector<32x64xf32>, vector<8x64xf32> -> vector<8x64xf32>
    %690 = arith.addf %686, %689 : vector<8x64xf32>
    %c0_142 = arith.constant 0 : index
    %c0_143 = arith.constant 0 : index
    %691 = vector.load %arg14[%c0_142, %c0_143] : memref<1x64xf32, #tpu.memory_space<vmem>>, vector<1x64xf32>
    %692 = vector.broadcast %691 : vector<1x64xf32> to vector<8x64xf32>
    %693 = arith.addf %690, %692 : vector<8x64xf32>
    %c0_144 = arith.constant 0 : index
    %c0_145 = arith.constant 0 : index
    %694 = vector.load %arg15[%c0_144, %c0_145] : memref<1x64xf32, #tpu.memory_space<vmem>>, vector<1x64xf32>
    %695 = vector.broadcast %694 : vector<1x64xf32> to vector<8x64xf32>
    %696 = arith.mulf %693, %695 : vector<8x64xf32>
    %c0_146 = arith.constant 0 : index
    %c0_147 = arith.constant 0 : index
    %697 = vector.load %arg16[%c0_146, %c0_147] : memref<1x64xf32, #tpu.memory_space<vmem>>, vector<1x64xf32>
    %698 = vector.broadcast %697 : vector<1x64xf32> to vector<8x64xf32>
    %699 = arith.addf %696, %698 : vector<8x64xf32>
    %cst_148 = arith.constant 0.000000e+00 : f32
    %700 = vector.broadcast %cst_148 : f32 to vector<8x64xf32>
    %701 = arith.maximumf %699, %700 : vector<8x64xf32>
    %c0_149 = arith.constant 0 : index
    %c0_150 = arith.constant 0 : index
    %702 = vector.load %arg17[%c0_149, %c0_150] : memref<1x64xf32, #tpu.memory_space<vmem>>, vector<1x64xf32>
    %703 = vector.broadcast %702 : vector<1x64xf32> to vector<8x64xf32>
    %704 = arith.mulf %701, %703 : vector<8x64xf32>
    %cst_151 = arith.constant dense<0.000000e+00> : vector<8xf32>
    %705 = vector.multi_reduction <add>, %704, %cst_151 [1] : vector<8x64xf32> to vector<8xf32>
    %706 = vector.shape_cast %705 : vector<8xf32> to vector<8x1xf32>
    %c0_152 = arith.constant 0 : index
    %c0_153 = arith.constant 0 : index
    %707 = vector.load %arg18[%c0_152, %c0_153] : memref<1x1xf32, #tpu.memory_space<vmem>>, vector<1x1xf32>
    %708 = vector.broadcast %707 : vector<1x1xf32> to vector<8x1xf32>
    %709 = arith.addf %706, %708 : vector<8x1xf32>
    %710 = arith.negf %709 : vector<8x1xf32>
    %711 = math.exp %710 : vector<8x1xf32>
    %cst_154 = arith.constant 1.000000e+00 : f32
    %712 = vector.broadcast %cst_154 : f32 to vector<8x1xf32>
    %713 = arith.addf %712, %711 : vector<8x1xf32>
    %714 = arith.divf %712, %713 : vector<8x1xf32>
    %c0_155 = arith.constant 0 : index
    %c0_156 = arith.constant 0 : index
    %715 = vector.load %arg19[%c0_155, %c0_156] : memref<8x1xf32, #tpu.memory_space<vmem>>, vector<8x1xf32>
    tpu.vector_store %arg19[%c0_155, %c0_156], %714 {strides = array<i32>} : memref<8x1xf32, #tpu.memory_space<vmem>>, vector<8x1xf32>,
    return
  }
  func.func @transform_0(%arg0: i32) -> (i32, i32, i32) {
    %c0_i32 = arith.constant 0 : i32
    %c0_i32_0 = arith.constant 0 : i32
    %c0_i32_1 = arith.constant 0 : i32
    return %c0_i32, %arg0, %c0_i32_0 : i32, i32, i32
  }
  func.func @transform_1(%arg0: i32) -> (i32, i32) {
    %c0_i32 = arith.constant 0 : i32
    %c0_i32_0 = arith.constant 0 : i32
    return %arg0, %c0_i32 : i32, i32
  }
  func.func @transform_2(%arg0: i32) -> (i32, i32) {
    %c0_i32 = arith.constant 0 : i32
    %c0_i32_0 = arith.constant 0 : i32
    return %arg0, %c0_i32 : i32, i32
  }
  func.func @transform_3(%arg0: i32) -> (i32, i32) {
    %c0_i32 = arith.constant 0 : i32
    %c0_i32_0 = arith.constant 0 : i32
    %c0_i32_1 = arith.constant 0 : i32
    return %c0_i32, %c0_i32_0 : i32, i32
  }
  func.func @transform_4(%arg0: i32) -> (i32, i32) {
    %c0_i32 = arith.constant 0 : i32
    %c0_i32_0 = arith.constant 0 : i32
    %c0_i32_1 = arith.constant 0 : i32
    return %c0_i32, %c0_i32_0 : i32, i32
  }
  func.func @transform_5(%arg0: i32) -> (i32, i32, i32) {
    %c0_i32 = arith.constant 0 : i32
    %c0_i32_0 = arith.constant 0 : i32
    %c0_i32_1 = arith.constant 0 : i32
    %c0_i32_2 = arith.constant 0 : i32
    return %c0_i32, %c0_i32_0, %c0_i32_1 : i32, i32, i32
  }
  func.func @transform_6(%arg0: i32) -> (i32, i32) {
    %c0_i32 = arith.constant 0 : i32
    %c0_i32_0 = arith.constant 0 : i32
    %c0_i32_1 = arith.constant 0 : i32
    return %c0_i32, %c0_i32_0 : i32, i32
  }
  func.func @transform_7(%arg0: i32) -> (i32, i32) {
    %c0_i32 = arith.constant 0 : i32
    %c0_i32_0 = arith.constant 0 : i32
    %c0_i32_1 = arith.constant 0 : i32
    return %c0_i32, %c0_i32_0 : i32, i32
  }
  func.func @transform_8(%arg0: i32) -> (i32, i32) {
    %c0_i32 = arith.constant 0 : i32
    %c0_i32_0 = arith.constant 0 : i32
    %c0_i32_1 = arith.constant 0 : i32
    return %c0_i32, %c0_i32_0 : i32, i32
  }
  func.func @transform_9(%arg0: i32) -> (i32, i32) {
    %c0_i32 = arith.constant 0 : i32
    %c0_i32_0 = arith.constant 0 : i32
    %c0_i32_1 = arith.constant 0 : i32
    return %c0_i32, %c0_i32_0 : i32, i32
  }
  func.func @transform_10(%arg0: i32) -> (i32, i32) {
    %c0_i32 = arith.constant 0 : i32
    %c0_i32_0 = arith.constant 0 : i32
    %c0_i32_1 = arith.constant 0 : i32
    return %c0_i32, %c0_i32_0 : i32, i32
  }
  func.func @transform_11(%arg0: i32) -> (i32, i32) {
    %c0_i32 = arith.constant 0 : i32
    %c0_i32_0 = arith.constant 0 : i32
    %c0_i32_1 = arith.constant 0 : i32
    return %c0_i32, %c0_i32_0 : i32, i32
  }
  func.func @transform_12(%arg0: i32) -> (i32, i32) {
    %c0_i32 = arith.constant 0 : i32
    %c0_i32_0 = arith.constant 0 : i32
    %c0_i32_1 = arith.constant 0 : i32
    return %c0_i32, %c0_i32_0 : i32, i32
  }
  func.func @transform_13(%arg0: i32) -> (i32, i32) {
    %c0_i32 = arith.constant 0 : i32
    %c0_i32_0 = arith.constant 0 : i32
    %c0_i32_1 = arith.constant 0 : i32
    return %c0_i32, %c0_i32_0 : i32, i32
  }
  func.func @transform_14(%arg0: i32) -> (i32, i32) {
    %c0_i32 = arith.constant 0 : i32
    %c0_i32_0 = arith.constant 0 : i32
    %c0_i32_1 = arith.constant 0 : i32
    return %c0_i32, %c0_i32_0 : i32, i32
  }
  func.func @transform_15(%arg0: i32) -> (i32, i32) {
    %c0_i32 = arith.constant 0 : i32
    %c0_i32_0 = arith.constant 0 : i32
    %c0_i32_1 = arith.constant 0 : i32
    return %c0_i32, %c0_i32_0 : i32, i32
  }
  func.func @transform_16(%arg0: i32) -> (i32, i32) {
    %c0_i32 = arith.constant 0 : i32
    %c0_i32_0 = arith.constant 0 : i32
    %c0_i32_1 = arith.constant 0 : i32
    return %c0_i32, %c0_i32_0 : i32, i32
  }
  func.func @transform_17(%arg0: i32) -> (i32, i32) {
    %c0_i32 = arith.constant 0 : i32
    %c0_i32_0 = arith.constant 0 : i32
    %c0_i32_1 = arith.constant 0 : i32
    return %c0_i32, %c0_i32_0 : i32, i32
  }
  func.func @transform_18(%arg0: i32) -> (i32, i32) {
    %c0_i32 = arith.constant 0 : i32
    %c0_i32_0 = arith.constant 0 : i32
    return %arg0, %c0_i32 : i32, i32
  }
}

</mosaic_0001>

<bundles_post_ra>
// kernel: tpu_custom_call.1
= control target key start
LH: loop header
LB: loop body
LE: loop exit
PB: predicated region body
PF: predicated region fallthrough
CT: control target
= control target key end

     0   :  { %s8436_s0 = inlined_call_operand.hbm [shape: f32[8,16,32], index: 0, kind: input, shape index: {}]   ;;  %s8437_s1 = inlined_call_operand.vmem [shape: f32[16,8], index: 1, kind: input, shape index: {}]   ;;  %s8438_s2 = inlined_call_operand.hbm [shape: f32[16,32], index: 2, kind: input, shape index: {}]   ;;  %s8439_s3 = inlined_call_operand.hbm [shape: f32[32,192], index: 3, kind: input, shape index: {}]   ;;  %s8440_s4 = inlined_call_operand.vmem [shape: f32[1,192], index: 4, kind: input, shape index: {}]   ;;  %s8441_s5 = inlined_call_operand.hbm [shape: f32[6,32,32], index: 5, kind: input, shape index: {}]   ;;  %s8442_s6 = inlined_call_operand.vmem [shape: f32[6,32], index: 6, kind: input, shape index: {}]   ;;  %s8443_s7 = inlined_call_operand.vmem [shape: f32[1,32], index: 7, kind: input, shape index: {}]   ;;  %s8444_s8 = inlined_call_operand.vmem [shape: f32[1,32], index: 8, kind: input, shape index: {}]   ;;  %s8445_s9 = inlined_call_operand.<no memory space> [shape: f32[1,1], index: 9, kind: input, shape index: {}]   ;;  %s8446_s10 = inlined_call_operand.vmem [shape: f32[32,64], index: 10, kind: input, shape index: {}]   ;;  %s8447_s11 = inlined_call_operand.hbm [shape: f32[32,64], index: 11, kind: input, shape index: {}]   ;;  %s8448_s12 = inlined_call_operand.hbm [shape: f32[32,64], index: 12, kind: input, shape index: {}]   ;;  %s8449_s13 = inlined_call_operand.vmem [shape: f32[1,64], index: 13, kind: input, shape index: {}]   ;;  %s8450_s14 = inlined_call_operand.vmem [shape: f32[1,64], index: 14, kind: input, shape index: {}]   ;;  %s8451_s15 = inlined_call_operand.vmem [shape: f32[1,64], index: 15, kind: input, shape index: {}]   ;;  %s8452_s16 = inlined_call_operand.vmem [shape: f32[1,64], index: 16, kind: input, shape index: {}]   ;;  %s8453_s18 = inlined_call_operand.vmem [shape: f32[16,1], index: 18, kind: output, shape index: {}]   ;;  %s8454_s17 = inlined_call_operand.<no memory space> [shape: f32[1,1], index: 17, kind: input, shape index: {}]  }
   0x1   :  { %8474 = sst [smem:[#allocation24_spill]] %s8436_s0  ;;  %v23_v0 = vstv %s8445_s9  ;;  %v25_v1 = vstv %s8454_s17 }
   0x2   :  { %8475 = sst [smem:[#allocation25_spill]] %s8437_s1  ;;  %24 = vst [vmem:[#allocation2] sm:$0x1] %v23_v0  ;;  %26 = vst [vmem:[#allocation3] sm:$0x1] %v25_v1 }
   0x3   :  { %8476 = sst [smem:[#allocation26_spill]] %s8438_s2 }
   0x4   :  { %8477 = sst [smem:[#allocation27_spill]] %s8439_s3 }
   0x5   :  { %8478 = sst [smem:[#allocation28_spill]] %s8441_s5 }
   0x6   :  { %8479 = sst [smem:[#allocation29_spill]] %s8447_s11 }
   0x7   :  { %8480 = sst [smem:[#allocation30_spill]] %s8448_s12 }
   0x8   :  { %8481 = sst [smem:[#allocation31_spill]] %s8451_s15 }
   0x9   :  { %8482 = sst [smem:[#allocation32_spill]] %s8452_s16 }
   0xa   :  { %8483 = sst [smem:[#allocation33_spill]] %s8453_s18 }
   0xb   :  { %27 = vsyncpa [#allocation5], 0 }
   0xc   :  { %29 = vsyncpa [#allocation5 + $0x1], 0 }
   0xd   :  { %30 = vsyncpa [#allocation7], 0 }
   0xe   :  { %32 = vsyncpa [#allocation7 + $0x1], 0 }
   0xf   :  { %33 = vsyncpa [#allocation10], 0 }
  0x10   :  { %34 = vsyncpa [#allocation13], 0  ;;  %s7134_s0 = smov 0   ;;  %s7136_s19 = smov 0  }
  0x11   :  { %s7138_s1 = smov 0   ;;  %s7140_s20 = smov 0  }
  0x12 LB: > { %8484 = sst [smem:[#allocation19_spill]] %s7004_s1  ;;  %s7153_s9 = sadd.s32 4294967295, %s7008_s20   ;;  %s7008_s20 = sphi %s7140_s20, %s8520_s20   ;;  %s7004_s1 = sphi %s7138_s1, %s8522_s1   ;;  %s7000_s19 = sphi %s7136_s19, %s8524_s19   ;;  %s6996_s0 = sphi %s7134_s0, %s8523_s0  }
  0x13   : > { %p60_p0 = scmp.ne.s32.totalorder %s7000_s19, %s6996_s0  ;;  %p8461_p1 = scmp.eq.s32.totalorder %s7153_s9, 0 }
  0x14   : > { %p5562_p2 = scmp.ge.s32.totalorder %s7008_s20, 1  ;;  %p464_p3 = scmp.lt.s32.totalorder %s7008_s20, 3 }
  0x15   : > { %p7161_p4 = por %p8461_p1, %p60_p0  ;;  %s7010_s22 = smov [#allocation8]  }
  0x16   : > { %p7165_p5 = pnand %p5562_p2, %p464_p3  ;;  %s476_s2 = sshll.u32 %s7010_s22, 4  ;;  %s477_s2 = int_to_ptr.vmem [resolvable:$true] %s476_s2 }
  0x17   : > { %s8485_s17 = scalar_select %p7161_p4, 1, 0 }
  0x18   : > { %s8486_s21 = scalar_select %p7165_p5, 1, 0 }
  0x19   : > { %p6513_p6 = pneg %p7165_p5  ;;  %s7011_s24 = smov [#allocation9]  }
  0x1a   : > { %s492_s25 = sshll.u32 %s7011_s24, 4  ;;  %s6809_s26 = scalar_lea.vmem %s477_s2, 1024  ;;  %s493_s25 = int_to_ptr.vmem [resolvable:$true] %s492_s25 }
  0x1b   : > { %p7173_p7 = pnand %p6513_p6, %p8461_p1  ;;  %p6810_p9 = scmp.ne.s32.totalorder %s477_s2, %s6809_s26 }
  0x1c   : > { %p6817_p12 = scmp.lt.s32.totalorder %s477_s2, %s477_s2  ;;  %p6818_p13 = scmp.lt.s32.totalorder %s6809_s26, %s6809_s26 }
  0x1d   : > { %p6800_p8 = pneg %p7173_p7 }
  0x1e   : > { %p6819_p0 = por %p6818_p13, %p6817_p12 }
  0x1f   : > { %p6812_p10 = pnand %p6810_p9, %p6800_p8 }
  0x21   : > { %p6813_p11 = pneg %p6812_p10 }
  0x23   : > { %p6820_p2 = pnand %p6819_p0, %p6813_p11 }
  0x25   : > { %6823 = shalt.err (!%p6820_p2)
}
  0x26   : > { %s8457_s27 = smov 256   ;;  %s7013_s28 = smov 16  }
  0x27   : > { %s8488_s3 = sld [smem:[#allocation27_spill]]  ;;  %s6835_s0 = scalar_lea.vmem %s493_s25, 3072 }
  0x28   : > { %p6836_p3 = scmp.ne.s32.totalorder %s493_s25, %s6835_s0  ;;  %p6843_p10 = scmp.lt.s32.totalorder %s493_s25, %s493_s25 }
  0x29   : > { %p6844_p11 = scmp.lt.s32.totalorder %s6835_s0, %s6835_s0 }
  0x2a   : > { %p6838_p6 = pnand %p6836_p3, %p6800_p8 }
  0x2b   : > { %p6845_p12 = por %p6844_p11, %p6843_p10 }
  0x2c   : > { %p6839_p9 = pneg %p6838_p6 }
  0x2d   : > { %6516 = dma.hbm_to_vmem [thread:$0]  (!%p7173_p7), %s8488_s3, 1024, %s477_s2, [#allocation7], %s8457_s27, %s8457_s27, %s7013_s28  }
  0x2e   : > { %p6846_p13 = pnand %p6845_p12, %p6839_p9 }
  0x30   : > { %6849 = shalt.err (!%p6846_p13)
}
  0x31   : > { %s8458_s22 = smov 128   ;;  %s8459_s24 = smov 8  }
  0x32   : > { %s8489_s5 = sld [smem:[#allocation28_spill]]  ;;  %s7016_s28 = smov [#allocation11]  }
  0x33   : > { %s520_s29 = sshll.u32 %s7016_s28, 4  ;;  %s7017_s30 = smov [#allocation12]   ;;  %s521_s29 = int_to_ptr.vmem [resolvable:$true] %s520_s29 }
  0x34   : > { %s533_s27 = sshll.u32 %s7017_s30, 4  ;;  %s6861_s0 = scalar_lea.vmem %s521_s29, 512  ;;  %s534_s27 = int_to_ptr.vmem [resolvable:$true] %s533_s27 }
  0x35   : > { %p6862_p0 = scmp.ne.s32.totalorder %s521_s29, %s6861_s0  ;;  %p6869_p6 = scmp.lt.s32.totalorder %s521_s29, %s521_s29 }
  0x36   : > { %p6870_p9 = scmp.lt.s32.totalorder %s6861_s0, %s6861_s0 }
  0x37   : > { %p6864_p2 = pnand %p6862_p0, %p6800_p8 }
  0x38   : > { %6519 = dma.hbm_to_vmem [thread:$0]  (!%p7173_p7), %s8489_s5, 3072, %s493_s25, [#allocation10], %s8458_s22, %s8458_s22, %s8459_s24  }
  0x39   : > { %p6865_p3 = pneg %p6864_p2  ;;  %p6871_p10 = por %p6870_p9, %p6869_p6 }
  0x3b   : > { %p6872_p11 = pnand %p6871_p10, %p6865_p3 }
  0x3d   : > { %6875 = shalt.err (!%p6872_p11)
}
  0x3e   : > { %s8490_s11 = sld [smem:[#allocation29_spill]]  ;;  %s6887_s26 = scalar_lea.vmem %s534_s27, 512 }
  0x3f   : > { %p6888_p12 = scmp.ne.s32.totalorder %s534_s27, %s6887_s26  ;;  %p6895_p2 = scmp.lt.s32.totalorder %s534_s27, %s534_s27 }
  0x40   : > { %p6896_p6 = scmp.lt.s32.totalorder %s6887_s26, %s6887_s26 }
  0x41   : > { %p6890_p13 = pnand %p6888_p12, %p6800_p8 }
  0x42   : > { %p6897_p3 = por %p6896_p6, %p6895_p2 }
  0x43   : > { %p6891_p0 = pneg %p6890_p13 }
  0x44   : > { %6522 = dma.hbm_to_vmem [thread:$0]  (!%p7173_p7), %s8490_s11, 512, %s521_s29, [#allocation10], %s8458_s22, %s8458_s22, %s8459_s24  }
  0x45   : > { %p6898_p9 = pnand %p6897_p3, %p6891_p0 }
  0x47   : > { %6901 = shalt.err (!%p6898_p9)
}
  0x48   : > { %s8491_s12 = sld [smem:[#allocation30_spill]]  ;;  %s7223_s29 = sadd.s32 1, %s7008_s20  }
  0x49   : > { %8492 = sst [smem:[#allocation20_spill]] %s7223_s29  ;;  %s44_s23 = ssub.s32 %s7008_s20, %s7223_s29 }
  0x4a   : > { %p45_p8 = scmp.eq.s32.totalorder %s44_s23, 0  ;;  %s47_s0 = sadd.s32 1, %s7004_s1 }
  0x4b   : > { %p54_p10 = scmp.ne.s32.totalorder %s7004_s1, %s7000_s19  ;;  %p55_p11 = scmp.eq.s32.totalorder %s7008_s20, 0 }
  0x4c   : > { %s7232_s25 = scalar_select %p45_p8, %s7004_s1, %s47_s0  }
  0x4d   : > { %p56_p12 = por %p55_p11, %p54_p10  ;;  %p6537_p13 = scmp.lt.s32.totalorder %s7008_s20, 2 }
  0x4e   : > { %6525 = dma.hbm_to_vmem [thread:$0]  (!%p7173_p7), %s8491_s12, 512, %s534_s27, [#allocation13], %s8458_s22, %s8458_s22, %s8459_s24  }
  0x4f   : > { %8493 = sst [smem:[#allocation21_spill]] %s7232_s25  ;;  %s7236_s2 = sand.u32 1, %s7004_s1  }
  0x50   : > { %s8460_s26 = sshll.u32 %s7008_s20, 7  ;;  %s5568_s28 = sshll.u32 %s7236_s2, 6 }
  0x51   : > { %s8494_s22 = sld [smem:[#allocation24_spill]]  ;;  %s566_s23 = scalar_lea.vmem [#allocation4], %s5568_s28 }
  0x52   : > { %s572_s0 = sshll.u32 %s566_s23, 4  ;;  %p7247_p7 = pnand %p6537_p13, %p56_p12  ;;  %s7251_s0 = int_to_ptr.vmem [resolvable:$true] %s572_s0 }
  0x54   : > { %p6904_p2 = pneg %p7247_p7 }
  0x57   : > { %s7245_s24 = scalar_lea.hbm %s8494_s22, %s8460_s26  ;;  %s6907_s30 = scalar_lea.hbm %s8494_s22, 2048 }
  0x58   : > { %s6902_s12 = scalar_lea.hbm %s7245_s24, 1024  ;;  %p6908_p9 = scmp.lt.s32.totalorder %s7245_s24, %s8494_s22 }
  0x59   : > { %p6903_p0 = scmp.ne.s32.totalorder %s7245_s24, %s6902_s12  ;;  %p6909_p8 = scmp.lt.s32.totalorder %s6907_s30, %s6902_s12 }
  0x5b   : > { %p6905_p6 = pnand %p6904_p2, %p6903_p0  ;;  %p6910_p10 = por %p6909_p8, %p6908_p9 }
  0x5d   : > { %p6906_p3 = pneg %p6905_p6 }
  0x5f   : > { %p6911_p11 = pnand %p6910_p10, %p6906_p3 }
  0x61   : > { %6914 = shalt.err (!%p6911_p11)
}
  0x62   : > { %s6915_s5 = scalar_lea.vmem %s7251_s0, 1024  ;;  %s7018_s28 = smov [#allocation4]  }
  0x63   : > { %p6916_p12 = scmp.ne.s32.totalorder %s7251_s0, %s6915_s5  ;;  %s6920_s27 = sshll.u32 %s7018_s28, 4  ;;  %s6921_s27 = int_to_ptr.vmem [resolvable:$false] %s6920_s27 }
  0x64   : > { %s6922_s11 = scalar_lea.vmem %s6921_s27, 2048  ;;  %p6923_p6 = scmp.lt.s32.totalorder %s7251_s0, %s6921_s27 }
  0x65   : > { %p6918_p13 = pnand %p6916_p12, %p6904_p2  ;;  %p6924_p1 = scmp.lt.s32.totalorder %s6922_s11, %s6915_s5 }
  0x67   : > { %p6919_p0 = pneg %p6918_p13  ;;  %p6925_p4 = por %p6924_p1, %p6923_p6 }
  0x69   : > { %p6926_p9 = pnand %p6925_p4, %p6919_p0 }
  0x6b   : > { %6929 = shalt.err (!%p6926_p9)
}
  0x6c   : > { %s8496_s12 = smov 8   ;;  %s8497_s26 = smov 128  }
  0x6d   : > { %s8498_s30 = smov 256   ;;  %s8499_s23 = scalar_lea.sflag [#allocation5], %s7236_s2 }
  0x6e   : > { %6529 = dma.hbm_to_vmem [thread:$0]  (!%p7247_p7), %s7245_s24, 1024, %s7251_s0, %s8499_s23, %s8498_s30, %s8497_s26, %s8496_s12  }
  0x6f   : > { %s5570_s28 = sshll.u32 %s7236_s2, 3  ;;  %s8500_s27 = sshll.u32 %s7008_s20, 7 }
  0x70   : > { %s8501_s22 = sld [smem:[#allocation26_spill]]  ;;  %s593_s1 = scalar_lea.vmem [#allocation6], %s5570_s28 }
  0x71   : > { %s600_s29 = sshll.u32 %s593_s1, 4  ;;  %s8502_s18 = sand.u32 1, %s7008_s20   ;;  %s601_s29 = int_to_ptr.vmem [resolvable:$true] %s600_s29 }
  0x72   : > { %s590_s16 = scalar_lea.sflag [#allocation7], %s8502_s18 }
  0x76   : > { %s7290_s25 = scalar_lea.hbm %s8501_s22, %s8500_s27  ;;  %s6935_s0 = scalar_lea.hbm %s8501_s22, 256 }
  0x77   : > { %s6930_s15 = scalar_lea.hbm %s7290_s25, 128  ;;  %p6936_p8 = scmp.lt.s32.totalorder %s7290_s25, %s8501_s22 }
  0x78   : > { %p6931_p1 = scmp.ne.s32.totalorder %s7290_s25, %s6930_s15  ;;  %p6937_p10 = scmp.lt.s32.totalorder %s6935_s0, %s6930_s15 }
  0x7a   : > { %p6933_p4 = pnand %p6931_p1, %p6904_p2  ;;  %p6938_p11 = por %p6937_p10, %p6936_p8 }
  0x7c   : > { %p6934_p3 = pneg %p6933_p4 }
  0x7e   : > { %p6939_p12 = pnand %p6938_p11, %p6934_p3 }
  0x80   : > { %6942 = shalt.err (!%p6939_p12)
}
  0x81   : > { %s6943_s1 = scalar_lea.vmem %s601_s29, 128  ;;  %s7019_s18 = smov [#allocation6]  }
  0x82   : > { %p6944_p13 = scmp.ne.s32.totalorder %s601_s29, %s6943_s1  ;;  %s6948_s20 = sshll.u32 %s7019_s18, 4  ;;  %s6949_s20 = int_to_ptr.vmem [resolvable:$false] %s6948_s20 }
  0x83   : > { %s6950_s30 = scalar_lea.vmem %s6949_s20, 256  ;;  %p6951_p9 = scmp.lt.s32.totalorder %s601_s29, %s6949_s20 }
  0x84   : > { %p6946_p0 = pnand %p6944_p13, %p6904_p2  ;;  %p6952_p1 = scmp.lt.s32.totalorder %s6950_s30, %s6943_s1 }
  0x86   : > { %p6947_p6 = pneg %p6946_p0  ;;  %p6953_p4 = por %p6952_p1, %p6951_p9 }
  0x88   : > { %p6954_p5 = pnand %p6953_p4, %p6947_p6 }
  0x8a   : > { %6957 = shalt.err (!%p6954_p5)
}
  0x8b   : > { %6532 = dma.hbm_to_vmem [thread:$0]  (!%p7247_p7), %s7290_s25, 128, %s601_s29, %s590_s16  }
  0x8c   : > { %p8503_p3 = scmp.ne.s32.totalorder %s8486_s21, 0 }
  0x8e   : > { %609 = sbr.rel (%p8503_p3) target bundleno = 6320 (0x18b0), region = 92 }
  0x93   : > { %s611_s15 = sand.u32 1, %s7000_s19   ;;  %p8504_p2 = scmp.ne.s32.totalorder %s8485_s17, 0 }
  0x94   : > { %s5573_s23 = sshll.u32 %s611_s15, 6  ;;  %s612_s28 = scalar_lea.sflag [#allocation5], %s611_s15 }
  0x95   : > { %s7315_s27 = scalar_lea.vmem [#allocation4], %s5573_s23 }
  0x96   : > { %6975 = dma.done.wait (%p8504_p2), %s612_s28, 1024  }
  0x97   : > { %6977 = vsyncadd (%p8504_p2), %s612_s28, 4294966272  ;;  %s620_s3 = sand.u32 1, %s7153_s9   ;;  %s5574_s5 = sshll.u32 %s611_s15, 3 }
  0x98   : > { %s621_s16 = scalar_lea.sflag [#allocation7], %s620_s3  ;;  %s7322_s29 = scalar_lea.vmem [#allocation6], %s5574_s5 }
  0x99   : > { %6979 = dma.done.wait (%p8504_p2), %s621_s16, 128  }
  0x9a   : > { %6981 = vsyncadd (%p8504_p2), %s621_s16, 4294967168  ;;  %p8505_p5 = scmp.eq.s32.totalorder %s7153_s9, 0 }
  0x9c   : > { %6983 = dma.done.wait (%p8505_p5), [#allocation7], 1024   ;;  %p8506_p7 = pmov %p8505_p5 }
  0x9d   : > { %p8507_p8 = pmov %p8505_p5 }
  0x9e   : > { %6985 = vsyncadd (%p8506_p7), [#allocation7], 4294966272 }
  0x9f   : > { %6987 = dma.done.wait (%p8507_p8), [#allocation10], 3584   ;;  %p8508_p10 = pmov %p8505_p5 }
  0xa0   : > { %p8509_p11 = pmov %p8505_p5 }
  0xa1   : > { %6989 = vsyncadd (%p8508_p10), [#allocation10], 4294963712 }
  0xa2   : > { %6991 = dma.done.wait (%p8509_p11), [#allocation13], 512   ;;  %p8510_p12 = pmov %p8505_p5 }
  0xa3   : > { %v8470_v2 = vmov 0.0   ;;  %vm7021_vm0 = vmmov 0   ;;  %v724_v3 = vld [vmem:[#allocation8 + $0x38] sm:$0xff]  ;;  %v723_v5 = vld [vmem:[#allocation8 + $0x30] sm:$0xff]  ;;  %v722_v6 = vld [vmem:[#allocation8 + $0x28] sm:$0xff]  ;;  %vm737_vm1 = vcmask 261120   ;;  %v727_v43 = vlaneseq }
  0xa4   : > { %6993 = vsyncadd (%p8510_p12), [#allocation13], 4294966784  ;;  %5932 = vmatprep.subr.mxu1 %v8470_v2  ;;  %5940 = vmatprep.mubr.msk.f32.mxu1 %vm7021_vm0, %v8470_v2  ;;  %v7344_v4 = vld [vmem:[#allocation9 + $0x18] sm:$0xff]  ;;  %v7347_v7 = vld [vmem:[#allocation9 + $0x10] sm:$0xff]  ;;  %s7022_s24 = smov 96   ;;  %s7023_s2 = smov 32  }
  0xa5   : > { %826 = vmatprep.mubr.f32.mxu0 %v8470_v2  ;;  %786 = vmatprep.subr.mxu0 %v724_v3  ;;  %v721_v8 = vld [vmem:[#allocation8 + $0x20] sm:$0xff]  ;;  %v720_v9 = vld [vmem:[#allocation8 + $0x18] sm:$0xff]  ;;  %v7350_v10 = vld [vmem:[#allocation9 + $0x8] sm:$0xff]  ;;  %v7500_v44 = vshrl.u32 %v727_v43, 7  ;;  %s7024_s0 = smov 64   ;;  %p701_p13 = scmp.lt.s32.totalorder %s7153_s9, 1 }
  0xa6   : > { %5933 = vmatpush3.msra.mxu1 %v7344_v4  ;;  %787 = vmatpush1.msra.mxu0 %v723_v5  ;;  %v719_v11 = vld [vmem:[#allocation8 + $0x10] sm:$0xff]  ;;  %v718_v12 = vld [vmem:[#allocation8 + $0x8] sm:$0xff]  ;;  %v7354_v13 = vld [vmem:[#allocation9] sm:$0xff]  ;;  %vm5031_vm2 = vcmask 7168   ;;  %vm5033_vm3 = vcmask 15360   ;;  %vm5035_vm4 = vcmask 23552  }
  0xa7   : > { %5934 = vmatprep.subr.mxu1 %v8470_v2  ;;  %788 = vmatprep.subr.mxu0 %v722_v6  ;;  %v717_v14 = vld [vmem:[#allocation8] sm:$0xff]  ;;  %v709_v15 = vld [vmem:[%s7315_s27] sm:$0xff]  ;;  %v7360_v16 = vld [vmem:[#allocation9 + $0x38] sm:$0xff]  ;;  %v733_v45 = vsub.s32 1, %v7500_v44  ;;  %v729_v48 = vsub.s32 0, %v7500_v44  ;;  %s8526_s9 = smov (!%p701_p13, %s7153_s9), 1 }
  0xa8   : > { %5935 = vmatpush3.msra.mxu1 %v7347_v7  ;;  %789 = vmatpush1.msra.mxu0 %v721_v8  ;;  %v7365_v17 = vld [vmem:[#allocation9 + $0x30] sm:$0xff]  ;;  %v710_v18 = vld [vmem:[%s7315_s27 + $0x8] sm:$0xff]  ;;  %v7372_v19 = vld [vmem:[#allocation9 + $0x28] sm:$0xff]  ;;  %vm5037_vm5 = vcmask 31744   ;;  %s5579_s20 = sshll.u32 %s8526_s9, 3  ;;  %vm5039_vm6 = vcmask 39936  }
  0xa9   : > { %5936 = vmatprep.subr.mxu1 %v8470_v2  ;;  %790 = vmatprep.subr.mxu0 %v720_v9  ;;  %v7377_v20 = vld [vmem:[#allocation9 + $0x98] sm:$0xff]  ;;  %v7380_v21 = vld [vmem:[#allocation9 + $0x20] sm:$0xff]  ;;  %v7394_v24 = vld [vmem:[#allocation9 + $0x50] sm:$0xff]  ;;  %vm5041_vm7 = vcmask 48128   ;;  %s8516_s23 = sld [smem:[#allocation25_spill]]  ;;  %vm5043_vm8 = vcmask 56320  }
  0xaa   : > { %5937 = vmatpush3.msra.mxu1 %v7350_v10  ;;  %791 = vmatpush1.msra.mxu0 %v719_v11  ;;  %v7386_v22 = vld [vmem:[#allocation9 + $0x58] sm:$0xff]  ;;  %v711_v23 = vld [vmem:[%s7315_s27 + $0x10] sm:$0xff]  ;;  %v7399_v25 = vld [vmem:[#allocation9 + $0x90] sm:$0xff]  ;;  %vm5059_vm10 = vcmask 64512   ;;  %s8517_s1 = sld [smem:[#allocation31_spill]]  ;;  %vm5404_vm11 = vcmask 523264  }
  0xab   : > { %5938 = vmatprep.subr.mxu1 %v8470_v2  ;;  %792 = vmatprep.subr.mxu0 %v718_v12  ;;  %v7402_v26 = vld [vmem:[#allocation9 + $0x48] sm:$0xff]  ;;  %v7409_v28 = vld [vmem:[#allocation9 + $0x40] sm:$0xff]  ;;  %v7415_v29 = vld [vmem:[#allocation9 + $0x78] sm:$0xff]  ;;  %s8518_s15 = sld [smem:[#allocation32_spill]] }
  0xac   : > { %5939 = vmatpush3.msra.mxu1 %v7354_v13  ;;  %793 = vmatpush1.msra.mxu0 %v717_v14  ;;  %v712_v27 = vld [vmem:[%s7315_s27 + $0x18] sm:$0xff]  ;;  %v713_v30 = vld [vmem:[%s7315_s27 + $0x20] sm:$0xff]  ;;  %v714_v34 = vld [vmem:[%s7315_s27 + $0x28] sm:$0xff] }
  0xad   : > { %5941 = vmatmul.mubr.f32.vlgmr.msra.gmra.mxu1 %v8470_v2  ;;  %5943 = vmatprep.subr.mxu1 %v8470_v2  ;;  %v7423_v31 = vld [vmem:[#allocation9 + $0x70] sm:$0xff]  ;;  %v7428_v32 = vld [vmem:[#allocation9 + $0x88] sm:$0xff]  ;;  %v7438_v35 = vld [vmem:[#allocation9 + $0x60] sm:$0xff] }
  0xae   : > { %5581 = vmatmul.mubr.msk.f32.vlgmr.msra.gmra.mxu0 %vm737_vm1, %v709_v15  ;;  %5944 = vmatpush3.msra.mxu1 %v7360_v16  ;;  %v7431_v33 = vld [vmem:[#allocation9 + $0x68] sm:$0xff]  ;;  %v7444_v36 = vld [vmem:[#allocation9 + $0xb8] sm:$0xff]  ;;  %v715_v37 = vld [vmem:[%s7315_s27 + $0x30] sm:$0xff] }
  0xaf   : > { %5951 = vmatprep.mubr.msk.f32.mxu1 %vm7021_vm0, %v8470_v2  ;;  %5945 = vmatprep.subr.mxu1 %v8470_v2  ;;  %v7452_v38 = vld [vmem:[#allocation9 + $0xb0] sm:$0xff]  ;;  %v7457_v39 = vld [vmem:[#allocation9 + $0x80] sm:$0xff]  ;;  %v7460_v40 = vld [vmem:[#allocation9 + $0xa8] sm:$0xff]  ;;  %s704_s28 = scalar_lea.vmem %s8516_s23, %s5579_s20 }
  0xb0   : > { %832 = vmatprep.mubr.f32.mxu0 %v8470_v2  ;;  %5946 = vmatpush3.msra.mxu1 %v7365_v17  ;;  %v716_v41 = vld [vmem:[%s7315_s27 + $0x38] sm:$0xff]  ;;  %v7467_v42 = vld [vmem:[#allocation9 + $0xa0] sm:$0xff]  ;;  %s8519_s27 = sld [smem:[#allocation33_spill]] }
  0xb1   : > { %5976 = vmatprep.subr.mxu0 %v8470_v2  ;;  %5947 = vmatprep.subr.mxu1 %v8470_v2  ;;  %v725_v46 = vld [vmem:[%s8440_s4] sm:$0x3] }
  0xb2   : > { %5582 = vmatmul.mubr.msk.f32.gmra.mxu0 %vm737_vm1, %v710_v18  ;;  %5948 = vmatpush3.msra.mxu1 %v7372_v19  ;;  %v7508_v47 = vrot.slane %v725_v46, %v733_v45  ;;  %v7514_v49 = vld [vmem:[%s8442_s6] sm:$0x3f]  ;;  %v730_v51 = vrot.slane %v725_v46, %v729_v48  ;;  %v914_v18 = vsub.s32 3, %v7500_v44 }
  0xb3   : > { %838 = vmatprep.mubr.f32.mxu0 %v8470_v2  ;;  %5949 = vmatprep.subr.mxu1 %v8470_v2  ;;  %v7517_v50 = vrot.slane %v7514_v49, %v729_v48 }
  0xb4   : > { %5977 = vmatpush3.msra.mxu0 %v7377_v20  ;;  %5950 = vmatpush3.msra.mxu1 %v7380_v21  ;;  %v7545_v46 = vrot.slane %v7514_v49, %v914_v18 }
  0xb5   : > { %5978 = vmatprep.subr.mxu0 %v8470_v2  ;;  %5952 = vmatmul.mubr.f32.vlgmr.msra.gmra.mxu1 %v8470_v2 }
  0xb6   : > { %5954 = vmatprep.subr.mxu1 %v8470_v2  ;;  %5962 = vmatprep.mubr.msk.f32.mxu1 %vm7021_vm0, %v8470_v2  ;;  %s708_s3 = scalar_lea.vmem %s8519_s27, %s5579_s20 }
  0xb7   : > { %5955 = vmatpush3.msra.mxu1 %v7386_v22  ;;  %5583 = vmatmul.mubr.msk.f32.gmra.mxu0 %vm737_vm1, %v711_v23 }
  0xb8   : > { %5956 = vmatprep.subr.mxu1 %v8470_v2  ;;  %844 = vmatprep.mubr.f32.mxu0 %v8470_v2 }
  0xb9   : > { %5957 = vmatpush3.msra.mxu1 %v7394_v24  ;;  %5979 = vmatpush3.msra.mxu0 %v7399_v25 }
  0xba   : > { %5958 = vmatprep.subr.mxu1 %v8470_v2  ;;  %5980 = vmatprep.subr.mxu0 %v8470_v2 }
  0xbb   : > { %5959 = vmatpush3.msra.mxu1 %v7402_v26  ;;  %5584 = vmatmul.mubr.msk.f32.gmra.mxu0 %vm737_vm1, %v712_v27 }
  0xbc   : > { %5960 = vmatprep.subr.mxu1 %v8470_v2  ;;  %850 = vmatprep.mubr.f32.mxu0 %v8470_v2 }
  0xbd   : > { %5961 = vmatpush3.msra.mxu1 %v7409_v28  ;;  %5981 = vmatpush3.msra.mxu0 %v7428_v32 }
  0xbe   : > { %5963 = vmatmul.mubr.f32.vlgmr.msra.gmra.mxu1 %v8470_v2  ;;  %5965 = vmatprep.subr.mxu1 %v8470_v2 }
  0xbf   : > { %5966 = vmatpush3.msra.mxu1 %v7415_v29  ;;  %5973 = vmatprep.mubr.msk.f32.mxu1 %vm7021_vm0, %v8470_v2 }
  0xc0   : > { %5967 = vmatprep.subr.mxu1 %v8470_v2  ;;  %5585 = vmatmul.mubr.msk.f32.gmra.mxu0 %vm737_vm1, %v713_v30 }
  0xc1   : > { %5968 = vmatpush3.msra.mxu1 %v7423_v31  ;;  %856 = vmatprep.mubr.f32.mxu0 %v8470_v2 }
  0xc2   : > { %5969 = vmatprep.subr.mxu1 %v8470_v2  ;;  %5982 = vmatprep.subr.mxu0 %v8470_v2 }
  0xc3   : > { %5970 = vmatpush3.msra.mxu1 %v7431_v33  ;;  %5983 = vmatpush3.msra.mxu0 %v7457_v39 }
  0xc4   : > { %5971 = vmatprep.subr.mxu1 %v8470_v2  ;;  %5586 = vmatmul.mubr.msk.f32.gmra.mxu0 %vm737_vm1, %v714_v34 }
  0xc5   : > { %5972 = vmatpush3.msra.mxu1 %v7438_v35  ;;  %862 = vmatprep.mubr.f32.mxu0 %v8470_v2 }
  0xc6   : > { %5974 = vmatmul.mubr.f32.vlgmr.msra.gmra.mxu1 %v8470_v2  ;;  %5987 = vmatprep.subr.mxu1 %v8470_v2 }
  0xc7   : > { %5988 = vmatpush3.msra.mxu1 %v7444_v36  ;;  %5995 = vmatprep.mubr.msk.f32.mxu1 %vm7021_vm0, %v8470_v2 }
  0xc8   : > { %5989 = vmatprep.subr.mxu1 %v8470_v2  ;;  %5587 = vmatmul.mubr.msk.f32.gmra.mxu0 %vm737_vm1, %v715_v37 }
  0xc9   : > { %5990 = vmatpush3.msra.mxu1 %v7452_v38  ;;  %868 = vmatprep.mubr.f32.mxu0 %v8470_v2 }
  0xca   : > { %5991 = vmatprep.subr.mxu1 %v8470_v2  ;;  %5998 = vmatprep.subr.mxu0 %v8470_v2 }
  0xcb   : > { %5992 = vmatpush3.msra.mxu1 %v7460_v40 }
  0xcc   : > { %5993 = vmatprep.subr.mxu1 %v8470_v2  ;;  %5588 = vmatmul.mubr.msk.f32.gmra.mxu0 %vm737_vm1, %v716_v41 }
  0xcd   : > { %5994 = vmatpush3.msra.mxu1 %v7467_v42  ;;  %5984 = vmatprep.mubr.msk.f32.mxu0 %vm7021_vm0, %v8470_v2 }
  0xce   : > { %5996 = vmatmul.mubr.f32.vlgmr.msra.gmra.mxu1 %v8470_v2  ;;  %6009 = vmatprep.subr.mxu1 %v8470_v2 }
  0xcf   : > { %6010 = vmatpush3.msra.mxu1 %v7360_v16  ;;  %6017 = vmatprep.mubr.msk.f32.mxu1 %vm7021_vm0, %v8470_v2 }
  0xd0   : > { %5985 = vmatmul.mubr.f32.vlgmr.msra.gmra.mxu0 %v8470_v2  ;;  %6011 = vmatprep.subr.mxu1 %v8470_v2 }
  0xd1   : > { %5999 = vmatpush3.msra.mxu0 %v7344_v4  ;;  %6012 = vmatpush3.msra.mxu1 %v7365_v17 }
  0xd2   : > { %6000 = vmatprep.subr.mxu0 %v8470_v2  ;;  %6013 = vmatprep.subr.mxu1 %v8470_v2 }
  0xd3   : > { %6001 = vmatpush3.msra.mxu0 %v7347_v7  ;;  %6014 = vmatpush3.msra.mxu1 %v7372_v19 }
  0xd4   : > { %6002 = vmatprep.subr.mxu0 %v8470_v2  ;;  %6015 = vmatprep.subr.mxu1 %v8470_v2 }
  0xd5   : > { %6003 = vmatpush3.msra.mxu0 %v7350_v10  ;;  %6006 = vmatprep.mubr.msk.f32.mxu0 %vm7021_vm0, %v8470_v2 }
  0xd6   : > { %6004 = vmatprep.subr.mxu0 %v8470_v2  ;;  %6016 = vmatpush3.msra.mxu1 %v7380_v21 }
  0xd7   : > { %6005 = vmatpush3.msra.mxu0 %v7354_v13  ;;  %6031 = vmatprep.subr.mxu1 %v8470_v2 }
  0xd8   : > { %6020 = vmatprep.subr.mxu0 %v8470_v2 }
 0x16d   : > { %v993_v52 = vpop.f32.mrf.mxu1 }
 0x16e   : > { %v994_v53 = vadd.f32 %v993_v52, %v7517_v50  ;;  %v828_v54 = vpop.f32.mrf.mxu0 }
 0x16f   : > { %v7520_v55 = vadd.f32 %v828_v54, %v730_v51  ;;  %v5942_v56 = vpop.f32.mrf.mxu1 }
 0x170   : > { %v830_v57 = vpop.f32.mrf.mxu0 }
 0x171   : > { %v1137_v58 = vadd.f32 %v994_v53, %v7520_v55  ;;  %v7524_v59 = vadd.f32 %v830_v57, %v7508_v47 }
 0x172   : > { %v834_v60 = vpop.f32.mrf.mxu0 }
 0x173   : > { %v5589_v61 = vmul.f32 -1.442695, %v1137_v58  ;;  %v7526_v62 = vadd.f32 %v834_v60, %v730_v51  ;;  %v922_v58 = vsub.s32 5, %v7500_v44 }
 0x174   : > { %v836_v63 = vpop.f32.mrf.mxu0 }
 0x175   : > { %6605 = vpow2.f32 %v5589_v61  ;;  %v7529_v0 = vadd.f32 %v836_v63, %v7508_v47  ;;  %v1063_v1 = vpop.f32.mrf.mxu1 }
 0x177   : > { %v5953_v3 = vpop.f32.mrf.mxu1  ;;  %v840_v5 = vpop.f32.mrf.mxu0 }
 0x178   : > { %v7531_v6 = vadd.f32 %v840_v5, %v730_v51  ;;  %v910_v3 = vsub.s32 2, %v7500_v44 }
 0x179   : > { %v842_v8 = vpop.f32.mrf.mxu0 }
 0x17a   : > { %v7534_v9 = vadd.f32 %v842_v8, %v7508_v47 }
 0x17b   : > { %v846_v11 = vpop.f32.mrf.mxu0 }
 0x17c   : > { %v7536_v12 = vadd.f32 %v846_v11, %v730_v51  ;;  %v7562_v11 = vrot.slane %v7514_v49, %v922_v58 }
 0x17d   : > { %v848_v15 = vpop.f32.mrf.mxu0 }
 0x17e   : > { %v1133_v14 = vpop.f32.mrf.mxu1  ;;  %v7540_v23 = vadd.f32 %v848_v15, %v7508_v47 }
 0x180   : > { %v5964_v27 = vpop.f32.mrf.mxu1  ;;  %v852_v30 = vpop.f32.mrf.mxu0 }
 0x181   : > { %v7542_v34 = vadd.f32 %v852_v30, %v730_v51  ;;  %v7568_v27 = vrot.slane %v7514_v49, %v910_v3 }
 0x182   : > { %v6606_v37 = vpop.eup %6605  ;;  %v854_v41 = vpop.f32.mrf.mxu0 }
 0x183   : > { %v1141_v43 = vadd.f32 1.0, %v6606_v37  ;;  %v7548_v48 = vadd.f32 %v854_v41, %v7508_v47  ;;  %v1134_v58 = vadd.f32 %v1133_v14, %v7568_v27 }
 0x184   : > { %v858_v52 = vpop.f32.mrf.mxu0 }
 0x185   : > { %6607 = vrcp.f32 %v1141_v43  ;;  %v7550_v53 = vadd.f32 %v858_v52, %v730_v51  ;;  %v7575_v43 = vrot.slane %v7514_v49, %v733_v45 }
 0x186   : > { %v1236_v54 = vpop.f32.mrf.mxu1  ;;  %v860_v56 = vpop.f32.mrf.mxu0 }
 0x187   : > { %v1237_v57 = vadd.f32 %v1236_v54, %v7545_v46  ;;  %v7555_v60 = vadd.f32 %v860_v56, %v7508_v47 }
 0x188   : > { %v5975_v61 = vpop.f32.mrf.mxu1  ;;  %v864_v63 = vpop.f32.mrf.mxu0 }
 0x189   : > { %1381 = vrot.lane.b32.xlu0 %v1237_v57, %s7022_s24  ;;  %v7559_v5 = vadd.f32 %v864_v63, %v730_v51  ;;  %v1064_v63 = vadd.f32 %v1063_v1, %v7575_v43 }
 0x18a   : > { %v866_v8 = vpop.f32.mrf.mxu0 }
 0x18b   : > { %v7565_v15 = vadd.f32 %v866_v8, %v7508_v47 }
 0x18c   : > { %v870_v18 = vpop.f32.mrf.mxu0 }
 0x18d   : > { %v7570_v30 = vadd.f32 %v870_v18, %v730_v51 }
 0x18e   : > { %v1376_v37 = vpop.f32.mrf.mxu1  ;;  %v872_v41 = vpop.f32.mrf.mxu0 }
 0x18f   : > { %v1377_v52 = vadd.f32 %v1376_v37, %v7562_v11  ;;  %v873_v54 = vadd.f32 %v872_v41, %v7508_v47 }
 0x190   : > { %v5997_v56 = vpop.f32.mrf.mxu1  ;;  %v1306_v57 = vpop.f32.mrf.mxu0 }
 0x191   : > { %1399 = vrot.lane.b32.xlu1 %v1377_v52, %s7022_s24 }
 0x192   : > { %v6608_v61 = vpop.eup %6607  ;;  %v5986_v51 = vpop.f32.mrf.mxu0 }
 0x193   : > { %v1155_v3 = vmul.f32 %v6608_v61, %v1134_v58 }
 0x195   : > { %1145 = vrot.lane.b32.xlu1 %v1064_v63, %s7023_s2  ;;  %1157 = vrot.lane.b32.xlu0 %v1155_v3, %s7024_s0 }
 0x1fb   : > { %v1382_v45 = vpop.permute.xlu0 %1381 }
 0x1fc   : > { %v1384_v47 = vadd.f32 %v1382_v45, %v7570_v30 }
 0x1fe   : > { %v5591_v8 = vmul.f32 -1.442695, %v1384_v47 }
 0x200   : > { %6609 = vpow2.f32 %v5591_v8 }
 0x203   : > { %v1400_v56 = vpop.permute.xlu1 %1399 }
 0x207   : > { %v1158_v18 = vpop.permute.xlu0 %1157  ;;  %v1146_v61 = vpop.permute.xlu1 %1145 }
 0x208   : > { %v1160_v14 = vadd.f32 %v1158_v18, %v7520_v55  ;;  %v1148_v51 = vadd.f32 %v1146_v61, %v7520_v55 }
 0x20a   : > { %6611 = vtanh.f32 %v1160_v14  ;;  %v5590_v63 = vmul.f32 -1.442695, %v1148_v51 }
 0x20d   : > { %v6610_v37 = vpop.eup %6609 }
 0x20e   : > { %v1388_v41 = vadd.f32 1.0, %v6610_v37 }
 0x210   : > { %6613 = vrcp.f32 %v1388_v41 }
 0x211   : > { %6615 = vpow2.f32 %v5590_v63 }
 0x217   : > { %v6612_v1 = vpop.eup %6611 }
 0x218   : > { %1164 = vrot.lane.b32.xlu1 %v6612_v1, %s7022_s24 }
 0x21d   : > { %v6614_v52 = vpop.eup %6613 }
 0x21e   : > { %v1402_v58 = vmul.f32 %v6614_v52, %v1400_v56  ;;  %v6616_v3 = vpop.eup %6615 }
 0x21f   : > { %v1152_v45 = vadd.f32 1.0, %v6616_v3 }
 0x220   : > { %1404 = vrot.lane.b32.xlu0 %v1402_v58, %s7024_s0  ;;  %v918_v58 = vsub.s32 4, %v7500_v44 }
 0x221   : > { %6617 = vrcp.f32 %v1152_v45 }
 0x222   : > { %v7596_v61 = vrot.slane %v7514_v49, %v918_v58 }
 0x224   : > { %v1307_v51 = vadd.f32 %v1306_v57, %v7596_v61 }
 0x226   : > { %v1391_v63 = vadd.f32 %v1307_v51, %v873_v54 }
 0x228   : > { %v5592_v3 = vmul.f32 -1.442695, %v1391_v63 }
 0x22e   : > { %v6618_v47 = vpop.eup %6617 }
 0x22f   : > { %v1162_v8 = vsub.f32 1.0, %v6618_v47  ;;  %v1168_v14 = vmul.f32 0.0, %v6618_v47 }
 0x28a   : > { %v1165_v18 = vpop.permute.xlu1 %1164 }
 0x28b   : > { %v1167_v37 = vmul.f32 %v1165_v18, %v1162_v8 }
 0x28d   : > { %v7589_v41 = vadd.f32 %v1168_v14, %v1167_v37 }
 0x28f   : > { %8511 = vst [vmem:[#allocation22_spill] sm:$0xff] %v7589_v41  ;;  %1418 = vrot.lane.b32.xlu0 %v7589_v41, %s7022_s24 }
 0x292   : > { %v1405_v1 = vpop.permute.xlu0 %1404 }
 0x293   : > { %v1407_v52 = vadd.f32 %v1405_v1, %v873_v54 }
 0x295   : > { %6619 = vtanh.f32 %v1407_v52 }
 0x296   : > { %6621 = vpow2.f32 %v5592_v3 }
 0x2a2   : > { %v6620_v56 = vpop.eup %6619 }
 0x2a3   : > { %1411 = vrot.lane.b32.xlu1 %v6620_v56, %s7022_s24  ;;  %v6622_v45 = vpop.eup %6621 }
 0x2a4   : > { %v1395_v47 = vadd.f32 1.0, %v6622_v45 }
 0x2a6   : > { %6623 = vrcp.f32 %v1395_v47 }
 0x2b3   : > { %v6624_v44 = vpop.eup %6623 }
 0x2b4   : > { %v1409_v49 = vsub.f32 1.0, %v6624_v44  ;;  %v1415_v57 = vmul.f32 0.0, %v6624_v44 }
 0x301   : > { %v1419_v8 = vpop.permute.xlu0 %1418 }
 0x302   : > { %6007 = vmatmul.mubr.msk.f32.vlgmr.msra.gmra.mxu0 %vm737_vm1, %v1419_v8  ;;  %6018 = vmatmul.mubr.msk.f32.vlgmr.msra.gmra.mxu1 %vm737_vm1, %v1419_v8 }
 0x303   : > { %6021 = vmatpush3.msra.mxu0 %v7386_v22  ;;  %6028 = vmatprep.mubr.msk.f32.mxu0 %vm7021_vm0, %v8470_v2 }
 0x304   : > { %6022 = vmatprep.subr.mxu0 %v8470_v2  ;;  %6032 = vmatpush3.msra.mxu1 %v7415_v29 }
 0x305   : > { %6023 = vmatpush3.msra.mxu0 %v7394_v24  ;;  %6033 = vmatprep.subr.mxu1 %v8470_v2 }
 0x306   : > { %6024 = vmatprep.subr.mxu0 %v8470_v2  ;;  %6034 = vmatpush3.msra.mxu1 %v7423_v31 }
 0x307   : > { %6025 = vmatpush3.msra.mxu0 %v7402_v26  ;;  %6035 = vmatprep.subr.mxu1 %v8470_v2 }
 0x308   : > { %6026 = vmatprep.subr.mxu0 %v8470_v2  ;;  %6036 = vmatpush3.msra.mxu1 %v7431_v33 }
 0x309   : > { %6027 = vmatpush3.msra.mxu0 %v7409_v28  ;;  %6037 = vmatprep.subr.mxu1 %v8470_v2 }
 0x30a   : > { %6029 = vmatmul.mubr.msk.f32.vlgmr.msra.gmra.mxu0 %vm737_vm1, %v1419_v8  ;;  %6042 = vmatprep.subr.mxu0 %v8470_v2 }
 0x30b   : > { %6043 = vmatpush3.msra.mxu0 %v7377_v20  ;;  %6038 = vmatpush3.msra.mxu1 %v7438_v35 }
 0x30c   : > { %6044 = vmatprep.subr.mxu0 %v8470_v2  ;;  %6039 = vmatprep.mubr.msk.f32.mxu1 %vm7021_vm0, %v8470_v2 }
 0x30d   : > { %6045 = vmatpush3.msra.mxu0 %v7399_v25  ;;  %6050 = vmatprep.mubr.msk.f32.mxu0 %vm7021_vm0, %v8470_v2 }
 0x30e   : > { %6046 = vmatprep.subr.mxu0 %v8470_v2  ;;  %6053 = vmatprep.subr.mxu1 %v8470_v2 }
 0x30f   : > { %6047 = vmatpush3.msra.mxu0 %v7428_v32 }
 0x310   : > { %6048 = vmatprep.subr.mxu0 %v8470_v2 }
 0x311   : > { %6049 = vmatpush3.msra.mxu0 %v7457_v39 }
 0x312   : > { %6064 = vmatprep.subr.mxu0 %v8470_v2 }
 0x315   : > { %v1412_v54 = vpop.permute.xlu1 %1411 }
 0x316   : > { %v1414_v18 = vmul.f32 %v1412_v54, %v1409_v49 }
 0x318   : > { %v7632_v14 = vadd.f32 %v1415_v57, %v1414_v18 }
 0x31a   : > { %6040 = vmatmul.mubr.msk.f32.vlgmr.msra.gmra.mxu1 %vm737_vm1, %v7632_v14  ;;  %6051 = vmatmul.mubr.msk.f32.vlgmr.msra.gmra.mxu0 %vm737_vm1, %v7632_v14 }
 0x31b   : > { %6054 = vmatpush3.msra.mxu1 %v7444_v36  ;;  %6061 = vmatprep.mubr.msk.f32.mxu1 %vm7021_vm0, %v8470_v2 }
 0x31c   : > { %6055 = vmatprep.subr.mxu1 %v8470_v2  ;;  %6065 = vmatpush3.msra.mxu0 %v7344_v4 }
 0x31d   : > { %6056 = vmatpush3.msra.mxu1 %v7452_v38  ;;  %6066 = vmatprep.subr.mxu0 %v8470_v2 }
 0x31e   : > { %6057 = vmatprep.subr.mxu1 %v8470_v2  ;;  %6067 = vmatpush3.msra.mxu0 %v7347_v7 }
 0x31f   : > { %6058 = vmatpush3.msra.mxu1 %v7460_v40  ;;  %6068 = vmatprep.subr.mxu0 %v8470_v2 }
 0x320   : > { %6059 = vmatprep.subr.mxu1 %v8470_v2  ;;  %6069 = vmatpush3.msra.mxu0 %v7350_v10 }
 0x321   : > { %6060 = vmatpush3.msra.mxu1 %v7467_v42  ;;  %6070 = vmatprep.subr.mxu0 %v8470_v2 }
 0x322   : > { %6062 = vmatmul.mubr.msk.f32.vlgmr.msra.gmra.mxu1 %vm737_vm1, %v7632_v14  ;;  %6075 = vmatprep.subr.mxu1 %v8470_v2 }
 0x323   : > { %6076 = vmatpush3.msra.mxu1 %v7360_v16  ;;  %6071 = vmatpush3.msra.mxu0 %v7354_v13 }
 0x324   : > { %6077 = vmatprep.subr.mxu1 %v8470_v2  ;;  %6072 = vmatprep.mubr.msk.f32.mxu0 %vm7021_vm0, %v8470_v2 }
 0x325   : > { %6078 = vmatpush3.msra.mxu1 %v7365_v17  ;;  %6083 = vmatprep.mubr.msk.f32.mxu1 %vm7021_vm0, %v8470_v2 }
 0x326   : > { %6079 = vmatprep.subr.mxu1 %v8470_v2  ;;  %6086 = vmatprep.subr.mxu0 %v8470_v2 }
 0x327   : > { %6080 = vmatpush3.msra.mxu1 %v7372_v19 }
 0x328   : > { %6081 = vmatprep.subr.mxu1 %v8470_v2 }
 0x329   : > { %6082 = vmatpush3.msra.mxu1 %v7380_v21 }
 0x32a   : > { %6097 = vmatprep.subr.mxu1 %v8470_v2 }
 0x3c2   : > { %v1488_v37 = vpop.f32.mrf.mxu0  ;;  %v1558_v1 = vpop.f32.mrf.mxu1 }
 0x3c3   : > { %v1489_v52 = vadd.f32 %v1488_v37, %v7517_v50 }
 0x3c4   : > { %v6008_v56 = vpop.f32.mrf.mxu0  ;;  %v6019_v58 = vpop.f32.mrf.mxu1 }
 0x3c5   : > { %v1632_v51 = vadd.f32 %v1489_v52, %v7526_v62 }
 0x3c7   : > { %v5596_v63 = vmul.f32 -1.442695, %v1632_v51 }
 0x3c9   : > { %6625 = vpow2.f32 %v5596_v63 }
 0x3ca   : > { %v1628_v3 = vpop.f32.mrf.mxu0 }
 0x3cb   : > { %v1629_v52 = vadd.f32 %v1628_v3, %v7568_v27 }
 0x3cc   : > { %v6030_v45 = vpop.f32.mrf.mxu0 }
 0x3cd   : > { %v1559_v45 = vadd.f32 %v1558_v1, %v7575_v43 }
 0x3d6   : > { %v6626_v47 = vpop.eup %6625 }
 0x3d7   : > { %v1636_v8 = vadd.f32 1.0, %v6626_v47 }
 0x3d9   : > { %6627 = vrcp.f32 %v1636_v8 }
 0x3da   : > { %v1734_v44 = vpop.f32.mrf.mxu1  ;;  %v1804_v49 = vpop.f32.mrf.mxu0 }
 0x3db   : > { %v1735_v54 = vadd.f32 %v1734_v44, %v7545_v46 }
 0x3dc   : > { %v6041_v57 = vpop.f32.mrf.mxu1  ;;  %v6052_v18 = vpop.f32.mrf.mxu0 }
 0x3dd   : > { %1879 = vrot.lane.b32.xlu0 %v1735_v54, %s7022_s24 }
 0x3e2   : > { %v1874_v37 = vpop.f32.mrf.mxu1 }
 0x3e3   : > { %v1875_v56 = vadd.f32 %v1874_v37, %v7562_v11 }
 0x3e4   : > { %v6063_v58 = vpop.f32.mrf.mxu1 }
 0x3e5   : > { %1897 = vrot.lane.b32.xlu0 %v1875_v56, %s7022_s24 }
 0x3e6   : > { %v6628_v51 = vpop.eup %6627 }
 0x3e7   : > { %v1650_v63 = vmul.f32 %v6628_v51, %v1629_v52 }
 0x3e9   : > { %1652 = vrot.lane.b32.xlu1 %v1650_v63, %s7024_s0 }
 0x3ed   : > { %1640 = vrot.lane.b32.xlu1 %v1559_v45, %s7023_s2 }
 0x44f   : > { %v1880_v47 = vpop.permute.xlu0 %1879 }
 0x450   : > { %v1882_v8 = vadd.f32 %v1880_v47, %v7559_v5 }
 0x452   : > { %v5601_v44 = vmul.f32 -1.442695, %v1882_v8 }
 0x454   : > { %6629 = vpow2.f32 %v5601_v44 }
 0x457   : > { %v1898_v58 = vpop.permute.xlu0 %1897 }
 0x45b   : > { %v1653_v54 = vpop.permute.xlu1 %1652 }
 0x45c   : > { %v1655_v57 = vadd.f32 %v1653_v54, %v7526_v62 }
 0x45e   : > { %6631 = vtanh.f32 %v1655_v57 }
 0x45f   : > { %v1641_v52 = vpop.permute.xlu1 %1640 }
 0x460   : > { %v1643_v51 = vadd.f32 %v1641_v52, %v7526_v62 }
 0x461   : > { %v6630_v3 = vpop.eup %6629 }
 0x462   : > { %v1886_v18 = vadd.f32 1.0, %v6630_v3  ;;  %v5597_v63 = vmul.f32 -1.442695, %v1643_v51 }
 0x464   : > { %6633 = vrcp.f32 %v1886_v18 }
 0x465   : > { %6635 = vpow2.f32 %v5597_v63 }
 0x46b   : > { %v6632_v37 = vpop.eup %6631 }
 0x46c   : > { %1659 = vrot.lane.b32.xlu1 %v6632_v37, %s7022_s24 }
 0x471   : > { %v6634_v56 = vpop.eup %6633 }
 0x472   : > { %v1900_v1 = vmul.f32 %v6634_v56, %v1898_v58  ;;  %v6636_v45 = vpop.eup %6635 }
 0x473   : > { %v1647_v47 = vadd.f32 1.0, %v6636_v45 }
 0x474   : > { %1902 = vrot.lane.b32.xlu0 %v1900_v1, %s7024_s0  ;;  %v1805_v1 = vadd.f32 %v1804_v49, %v7596_v61 }
 0x475   : > { %6637 = vrcp.f32 %v1647_v47 }
 0x476   : > { %v1889_v52 = vadd.f32 %v1805_v1, %v7565_v15 }
 0x478   : > { %v5602_v51 = vmul.f32 -1.442695, %v1889_v52 }
 0x482   : > { %v6638_v8 = vpop.eup %6637 }
 0x483   : > { %v1657_v44 = vsub.f32 1.0, %v6638_v8  ;;  %v1663_v57 = vmul.f32 %v6638_v8, %v7589_v41 }
 0x4de   : > { %v1660_v54 = vpop.permute.xlu1 %1659 }
 0x4df   : > { %v1662_v3 = vmul.f32 %v1660_v54, %v1657_v44 }
 0x4e1   : > { %v7686_v18 = vadd.f32 %v1663_v57, %v1662_v3 }
 0x4e3   : > { %1916 = vrot.lane.b32.xlu0 %v7686_v18, %s7022_s24 }
 0x4e6   : > { %v1903_v37 = vpop.permute.xlu0 %1902 }
 0x4e7   : > { %v1905_v56 = vadd.f32 %v1903_v37, %v7565_v15 }
 0x4e9   : > { %6639 = vtanh.f32 %v1905_v56 }
 0x4ea   : > { %6641 = vpow2.f32 %v5602_v51 }
 0x4f6   : > { %v6640_v58 = vpop.eup %6639 }
 0x4f7   : > { %1909 = vrot.lane.b32.xlu1 %v6640_v58, %s7022_s24  ;;  %v6642_v63 = vpop.eup %6641 }
 0x4f8   : > { %v1893_v45 = vadd.f32 1.0, %v6642_v63 }
 0x4fa   : > { %6643 = vrcp.f32 %v1893_v45 }
 0x555   : > { %v1917_v47 = vpop.permute.xlu0 %1916 }
 0x556   : > { %6073 = vmatmul.mubr.msk.f32.vlgmr.msra.gmra.mxu0 %vm737_vm1, %v1917_v47  ;;  %6084 = vmatmul.mubr.msk.f32.vlgmr.msra.gmra.mxu1 %vm737_vm1, %v1917_v47 }
 0x557   : > { %6087 = vmatpush3.msra.mxu0 %v7386_v22  ;;  %6094 = vmatprep.mubr.msk.f32.mxu0 %vm7021_vm0, %v8470_v2 }
 0x558   : > { %6088 = vmatprep.subr.mxu0 %v8470_v2  ;;  %6098 = vmatpush3.msra.mxu1 %v7415_v29 }
 0x559   : > { %6089 = vmatpush3.msra.mxu0 %v7394_v24  ;;  %6099 = vmatprep.subr.mxu1 %v8470_v2 }
 0x55a   : > { %6090 = vmatprep.subr.mxu0 %v8470_v2  ;;  %6100 = vmatpush3.msra.mxu1 %v7423_v31 }
 0x55b   : > { %6091 = vmatpush3.msra.mxu0 %v7402_v26  ;;  %6101 = vmatprep.subr.mxu1 %v8470_v2 }
 0x55c   : > { %6092 = vmatprep.subr.mxu0 %v8470_v2  ;;  %6102 = vmatpush3.msra.mxu1 %v7431_v33 }
 0x55d   : > { %6093 = vmatpush3.msra.mxu0 %v7409_v28  ;;  %6103 = vmatprep.subr.mxu1 %v8470_v2 }
 0x55e   : > { %6095 = vmatmul.mubr.msk.f32.vlgmr.msra.gmra.mxu0 %vm737_vm1, %v1917_v47  ;;  %6108 = vmatprep.subr.mxu0 %v8470_v2 }
 0x55f   : > { %6109 = vmatpush3.msra.mxu0 %v7377_v20  ;;  %6104 = vmatpush3.msra.mxu1 %v7438_v35  ;;  %v6644_v20 = vpop.eup %6643 }
 0x560   : > { %6110 = vmatprep.subr.mxu0 %v8470_v2  ;;  %6105 = vmatprep.mubr.msk.f32.mxu1 %vm7021_vm0, %v8470_v2  ;;  %v1907_v15 = vsub.f32 1.0, %v6644_v20  ;;  %v1913_v44 = vmul.f32 %v6644_v20, %v7632_v14 }
 0x561   : > { %6111 = vmatpush3.msra.mxu0 %v7399_v25  ;;  %6116 = vmatprep.mubr.msk.f32.mxu0 %vm7021_vm0, %v8470_v2 }
 0x562   : > { %6112 = vmatprep.subr.mxu0 %v8470_v2  ;;  %6119 = vmatprep.subr.mxu1 %v8470_v2 }
 0x563   : > { %6113 = vmatpush3.msra.mxu0 %v7428_v32 }
 0x564   : > { %6114 = vmatprep.subr.mxu0 %v8470_v2 }
 0x565   : > { %6115 = vmatpush3.msra.mxu0 %v7457_v39 }
 0x566   : > { %6130 = vmatprep.subr.mxu0 %v8470_v2 }
 0x569   : > { %v1910_v49 = vpop.permute.xlu1 %1909 }
 0x56a   : > { %v1912_v8 = vmul.f32 %v1910_v49, %v1907_v15 }
 0x56c   : > { %v7728_v54 = vadd.f32 %v1913_v44, %v1912_v8 }
 0x56e   : > { %6106 = vmatmul.mubr.msk.f32.vlgmr.msra.gmra.mxu1 %vm737_vm1, %v7728_v54  ;;  %6117 = vmatmul.mubr.msk.f32.vlgmr.msra.gmra.mxu0 %vm737_vm1, %v7728_v54 }
 0x56f   : > { %6120 = vmatpush3.msra.mxu1 %v7444_v36  ;;  %6127 = vmatprep.mubr.msk.f32.mxu1 %vm7021_vm0, %v8470_v2 }
 0x570   : > { %6121 = vmatprep.subr.mxu1 %v8470_v2  ;;  %6131 = vmatpush3.msra.mxu0 %v7344_v4 }
 0x571   : > { %6122 = vmatpush3.msra.mxu1 %v7452_v38  ;;  %6132 = vmatprep.subr.mxu0 %v8470_v2 }
 0x572   : > { %6123 = vmatprep.subr.mxu1 %v8470_v2  ;;  %6133 = vmatpush3.msra.mxu0 %v7347_v7 }
 0x573   : > { %6124 = vmatpush3.msra.mxu1 %v7460_v40  ;;  %6134 = vmatprep.subr.mxu0 %v8470_v2 }
 0x574   : > { %6125 = vmatprep.subr.mxu1 %v8470_v2  ;;  %6135 = vmatpush3.msra.mxu0 %v7350_v10 }
 0x575   : > { %6126 = vmatpush3.msra.mxu1 %v7467_v42  ;;  %6136 = vmatprep.subr.mxu0 %v8470_v2 }
 0x576   : > { %6128 = vmatmul.mubr.msk.f32.vlgmr.msra.gmra.mxu1 %vm737_vm1, %v7728_v54  ;;  %6141 = vmatprep.subr.mxu1 %v8470_v2 }
 0x577   : > { %6142 = vmatpush3.msra.mxu1 %v7360_v16  ;;  %6137 = vmatpush3.msra.mxu0 %v7354_v13 }
 0x578   : > { %6143 = vmatprep.subr.mxu1 %v8470_v2  ;;  %6138 = vmatprep.mubr.msk.f32.mxu0 %vm7021_vm0, %v8470_v2 }
 0x579   : > { %6144 = vmatpush3.msra.mxu1 %v7365_v17  ;;  %6149 = vmatprep.mubr.msk.f32.mxu1 %vm7021_vm0, %v8470_v2 }
 0x57a   : > { %6145 = vmatprep.subr.mxu1 %v8470_v2  ;;  %6152 = vmatprep.subr.mxu0 %v8470_v2 }
 0x57b   : > { %6146 = vmatpush3.msra.mxu1 %v7372_v19 }
 0x57c   : > { %6147 = vmatprep.subr.mxu1 %v8470_v2 }
 0x57d   : > { %6148 = vmatpush3.msra.mxu1 %v7380_v21 }
 0x57e   : > { %6163 = vmatprep.subr.mxu1 %v8470_v2 }
 0x616   : > { %v1986_v4 = vpop.f32.mrf.mxu0  ;;  %v2056_v7 = vpop.f32.mrf.mxu1 }
 0x617   : > { %v1987_v10 = vadd.f32 %v1986_v4, %v7517_v50  ;;  %v2057_v8 = vadd.f32 %v2056_v7, %v7575_v43 }
 0x618   : > { %v6074_v13 = vpop.f32.mrf.mxu0  ;;  %v6085_v16 = vpop.f32.mrf.mxu1 }
 0x619   : > { %v2130_v17 = vadd.f32 %v1987_v10, %v7531_v6 }
 0x61b   : > { %v5606_v57 = vmul.f32 -1.442695, %v2130_v17 }
 0x61d   : > { %6645 = vpow2.f32 %v5606_v57 }
 0x61e   : > { %v2126_v3 = vpop.f32.mrf.mxu0 }
 0x61f   : > { %v2127_v20 = vadd.f32 %v2126_v3, %v7568_v27 }
 0x620   : > { %v6096_v37 = vpop.f32.mrf.mxu0 }
 0x62a   : > { %v6646_v56 = vpop.eup %6645 }
 0x62b   : > { %v2134_v19 = vadd.f32 1.0, %v6646_v56 }
 0x62d   : > { %6647 = vrcp.f32 %v2134_v19 }
 0x62e   : > { %v2232_v58 = vpop.f32.mrf.mxu1  ;;  %v2302_v1 = vpop.f32.mrf.mxu0 }
 0x62f   : > { %v2233_v21 = vadd.f32 %v2232_v58, %v7545_v46 }
 0x630   : > { %v6107_v52 = vpop.f32.mrf.mxu1  ;;  %v6118_v51 = vpop.f32.mrf.mxu0 }
 0x631   : > { %2377 = vrot.lane.b32.xlu0 %v2233_v21, %s7022_s24 }
 0x636   : > { %v2372_v63 = vpop.f32.mrf.mxu1 }
 0x637   : > { %v2373_v45 = vadd.f32 %v2372_v63, %v7562_v11 }
 0x638   : > { %v6129_v47 = vpop.f32.mrf.mxu1 }
 0x639   : > { %2395 = vrot.lane.b32.xlu0 %v2373_v45, %s7022_s24 }
 0x63a   : > { %v6648_v15 = vpop.eup %6647 }
 0x63b   : > { %v2148_v49 = vmul.f32 %v6648_v15, %v2127_v20 }
 0x63d   : > { %2150 = vrot.lane.b32.xlu1 %v2148_v49, %s7024_s0 }
 0x641   : > { %2138 = vrot.lane.b32.xlu1 %v2057_v8, %s7023_s2 }
 0x6a3   : > { %v2378_v44 = vpop.permute.xlu0 %2377 }
 0x6a4   : > { %v2380_v4 = vadd.f32 %v2378_v44, %v7550_v53 }
 0x6a6   : > { %v5611_v10 = vmul.f32 -1.442695, %v2380_v4 }
 0x6a8   : > { %6649 = vpow2.f32 %v5611_v10  ;;  %v2303_v10 = vadd.f32 %v2302_v1, %v7596_v61 }
 0x6ab   : > { %v2396_v56 = vpop.permute.xlu0 %2395 }
 0x6af   : > { %v2151_v13 = vpop.permute.xlu1 %2150 }
 0x6b0   : > { %v2153_v16 = vadd.f32 %v2151_v13, %v7531_v6  ;;  %v2387_v13 = vadd.f32 %v2303_v10, %v7555_v60 }
 0x6b2   : > { %6651 = vtanh.f32 %v2153_v16  ;;  %v5612_v16 = vmul.f32 -1.442695, %v2387_v13 }
 0x6b3   : > { %v2139_v19 = vpop.permute.xlu1 %2138 }
 0x6b4   : > { %v2141_v58 = vadd.f32 %v2139_v19, %v7531_v6 }
 0x6b5   : > { %v6650_v17 = vpop.eup %6649 }
 0x6b6   : > { %v2384_v57 = vadd.f32 1.0, %v6650_v17  ;;  %v5607_v21 = vmul.f32 -1.442695, %v2141_v58 }
 0x6b8   : > { %6653 = vrcp.f32 %v2384_v57 }
 0x6b9   : > { %6655 = vpow2.f32 %v5607_v21 }
 0x6bf   : > { %v6652_v3 = vpop.eup %6651 }
 0x6c0   : > { %2157 = vrot.lane.b32.xlu1 %v6652_v3, %s7022_s24 }
 0x6c5   : > { %v6654_v37 = vpop.eup %6653 }
 0x6c6   : > { %v2398_v7 = vmul.f32 %v6654_v37, %v2396_v56  ;;  %v6656_v52 = vpop.eup %6655 }
 0x6c7   : > { %v2145_v51 = vadd.f32 1.0, %v6656_v52 }
 0x6c8   : > { %2400 = vrot.lane.b32.xlu0 %v2398_v7, %s7024_s0 }
 0x6c9   : > { %6657 = vrcp.f32 %v2145_v51 }
 0x6d6   : > { %v6658_v63 = vpop.eup %6657 }
 0x6d7   : > { %v2155_v45 = vsub.f32 1.0, %v6658_v63  ;;  %v2161_v20 = vmul.f32 %v6658_v63, %v7686_v18 }
 0x732   : > { %v2158_v47 = vpop.permute.xlu1 %2157 }
 0x733   : > { %v2160_v15 = vmul.f32 %v2158_v47, %v2155_v45 }
 0x735   : > { %v7782_v49 = vadd.f32 %v2161_v20, %v2160_v15 }
 0x737   : > { %8512 = vst [vmem:[#allocation23_spill] sm:$0xff] %v7782_v49  ;;  %2414 = vrot.lane.b32.xlu0 %v7782_v49, %s7022_s24 }
 0x73a   : > { %v2401_v8 = vpop.permute.xlu0 %2400 }
 0x73b   : > { %v2403_v44 = vadd.f32 %v2401_v8, %v7555_v60 }
 0x73d   : > { %6659 = vtanh.f32 %v2403_v44 }
 0x73e   : > { %6661 = vpow2.f32 %v5612_v16 }
 0x74a   : > { %v6660_v4 = vpop.eup %6659 }
 0x74b   : > { %2407 = vrot.lane.b32.xlu1 %v6660_v4, %s7022_s24  ;;  %v6662_v17 = vpop.eup %6661 }
 0x74c   : > { %v2391_v57 = vadd.f32 1.0, %v6662_v17 }
 0x74e   : > { %6663 = vrcp.f32 %v2391_v57 }
 0x7a9   : > { %v2415_v3 = vpop.permute.xlu0 %2414 }
 0x7aa   : > { %6139 = vmatmul.mubr.msk.f32.vlgmr.msra.gmra.mxu0 %vm737_vm1, %v2415_v3  ;;  %6150 = vmatmul.mubr.msk.f32.vlgmr.msra.gmra.mxu1 %vm737_vm1, %v2415_v3 }
 0x7ab   : > { %6153 = vmatpush3.msra.mxu0 %v7386_v22  ;;  %6160 = vmatprep.mubr.msk.f32.mxu0 %vm7021_vm0, %v8470_v2  ;;  %v7809_v22 = vld [vmem:[#allocation9 + $0x98] sm:$0xff] }
 0x7ac   : > { %6154 = vmatprep.subr.mxu0 %v8470_v2  ;;  %6164 = vmatpush3.msra.mxu1 %v7415_v29 }
 0x7ad   : > { %6155 = vmatpush3.msra.mxu0 %v7394_v24  ;;  %6165 = vmatprep.subr.mxu1 %v8470_v2  ;;  %v6664_v24 = vpop.eup %6663 }
 0x7ae   : > { %6156 = vmatprep.subr.mxu0 %v8470_v2  ;;  %6166 = vmatpush3.msra.mxu1 %v7423_v31 }
 0x7af   : > { %6157 = vmatpush3.msra.mxu0 %v7402_v26  ;;  %6167 = vmatprep.subr.mxu1 %v8470_v2  ;;  %v2405_v26 = vsub.f32 1.0, %v6664_v24 }
 0x7b0   : > { %6158 = vmatprep.subr.mxu0 %v8470_v2  ;;  %6168 = vmatpush3.msra.mxu1 %v7431_v33  ;;  %v7842_v33 = vld [vmem:[#allocation9 + $0x10] sm:$0xff] }
 0x7b1   : > { %6159 = vmatpush3.msra.mxu0 %v7409_v28  ;;  %6169 = vmatprep.subr.mxu1 %v8470_v2 }
 0x7b2   : > { %6161 = vmatmul.mubr.msk.f32.vlgmr.msra.gmra.mxu0 %vm737_vm1, %v2415_v3  ;;  %6174 = vmatprep.subr.mxu0 %v8470_v2 }
 0x7b3   : > { %6175 = vmatpush3.msra.mxu0 %v7809_v22  ;;  %6170 = vmatpush3.msra.mxu1 %v7438_v35  ;;  %v7848_v35 = vld [vmem:[#allocation9 + $0x8] sm:$0xff] }
 0x7b4   : > { %6176 = vmatprep.subr.mxu0 %v8470_v2  ;;  %6171 = vmatprep.mubr.msk.f32.mxu1 %vm7021_vm0, %v8470_v2 }
 0x7b5   : > { %6177 = vmatpush3.msra.mxu0 %v7399_v25  ;;  %6182 = vmatprep.mubr.msk.f32.mxu0 %vm7021_vm0, %v8470_v2  ;;  %v2411_v25 = vmul.f32 %v6664_v24, %v7728_v54 }
 0x7b6   : > { %6178 = vmatprep.subr.mxu0 %v8470_v2  ;;  %6185 = vmatprep.subr.mxu1 %v8470_v2 }
 0x7b7   : > { %6179 = vmatpush3.msra.mxu0 %v7428_v32  ;;  %v7836_v32 = vld [vmem:[#allocation9 + $0x18] sm:$0xff] }
 0x7b8   : > { %6180 = vmatprep.subr.mxu0 %v8470_v2 }
 0x7b9   : > { %6181 = vmatpush3.msra.mxu0 %v7457_v39  ;;  %v7865_v39 = vld [vmem:[#allocation9 + $0x30] sm:$0xff] }
 0x7ba   : > { %6196 = vmatprep.subr.mxu0 %v8470_v2 }
 0x7bd   : > { %v2408_v28 = vpop.permute.xlu1 %2407 }
 0x7be   : > { %v2410_v29 = vmul.f32 %v2408_v28, %v2405_v26 }
 0x7c0   : > { %v7826_v31 = vadd.f32 %v2411_v25, %v2410_v29 }
 0x7c2   : > { %6172 = vmatmul.mubr.msk.f32.vlgmr.msra.gmra.mxu1 %vm737_vm1, %v7826_v31  ;;  %6183 = vmatmul.mubr.msk.f32.vlgmr.msra.gmra.mxu0 %vm737_vm1, %v7826_v31 }
 0x7c3   : > { %6186 = vmatpush3.msra.mxu1 %v7444_v36  ;;  %6193 = vmatprep.mubr.msk.f32.mxu1 %vm7021_vm0, %v8470_v2  ;;  %v7856_v36 = vld [vmem:[#allocation9 + $0x38] sm:$0xff] }
 0x7c4   : > { %6187 = vmatprep.subr.mxu1 %v8470_v2  ;;  %6197 = vmatpush3.msra.mxu0 %v7836_v32 }
 0x7c5   : > { %6188 = vmatpush3.msra.mxu1 %v7452_v38  ;;  %6198 = vmatprep.subr.mxu0 %v8470_v2  ;;  %v7859_v38 = vld [vmem:[#allocation9] sm:$0xff] }
 0x7c6   : > { %6189 = vmatprep.subr.mxu1 %v8470_v2  ;;  %6199 = vmatpush3.msra.mxu0 %v7842_v33 }
 0x7c7   : > { %6190 = vmatpush3.msra.mxu1 %v7460_v40  ;;  %6200 = vmatprep.subr.mxu0 %v8470_v2  ;;  %v7872_v40 = vld [vmem:[#allocation9 + $0x28] sm:$0xff] }
 0x7c8   : > { %6191 = vmatprep.subr.mxu1 %v8470_v2  ;;  %6201 = vmatpush3.msra.mxu0 %v7848_v35 }
 0x7c9   : > { %6192 = vmatpush3.msra.mxu1 %v7467_v42  ;;  %6202 = vmatprep.subr.mxu0 %v8470_v2  ;;  %v7876_v42 = vld [vmem:[#allocation9 + $0x20] sm:$0xff] }
 0x7ca   : > { %6194 = vmatmul.mubr.msk.f32.vlgmr.msra.gmra.mxu1 %vm737_vm1, %v7826_v31  ;;  %6207 = vmatprep.subr.mxu1 %v8470_v2 }
 0x7cb   : > { %6208 = vmatpush3.msra.mxu1 %v7856_v36  ;;  %6203 = vmatpush3.msra.mxu0 %v7859_v38 }
 0x7cc   : > { %6209 = vmatprep.subr.mxu1 %v8470_v2  ;;  %6204 = vmatprep.mubr.msk.f32.mxu0 %vm7021_vm0, %v8470_v2 }
 0x7cd   : > { %6210 = vmatpush3.msra.mxu1 %v7865_v39  ;;  %6215 = vmatprep.mubr.msk.f32.mxu1 %vm7021_vm0, %v8470_v2 }
 0x7ce   : > { %6211 = vmatprep.subr.mxu1 %v8470_v2  ;;  %6218 = vmatprep.subr.mxu0 %v8470_v2 }
 0x7cf   : > { %6212 = vmatpush3.msra.mxu1 %v7872_v40 }
 0x7d0   : > { %6213 = vmatprep.subr.mxu1 %v8470_v2 }
 0x7d1   : > { %6214 = vmatpush3.msra.mxu1 %v7876_v42 }
 0x7d2   : > { %6229 = vmatprep.subr.mxu1 %v8470_v2 }
 0x86a   : > { %v2484_v60 = vpop.f32.mrf.mxu0  ;;  %v2554_v1 = vpop.f32.mrf.mxu1 }
 0x86b   : > { %v2485_v37 = vadd.f32 %v2484_v60, %v7517_v50  ;;  %v2555_v57 = vadd.f32 %v2554_v1, %v7575_v43 }
 0x86c   : > { %v6140_v56 = vpop.f32.mrf.mxu0  ;;  %v6151_v7 = vpop.f32.mrf.mxu1 }
 0x86d   : > { %v2628_v19 = vadd.f32 %v2485_v37, %v7536_v12 }
 0x86f   : > { %v5616_v58 = vmul.f32 -1.442695, %v2628_v19 }
 0x871   : > { %6665 = vpow2.f32 %v5616_v58 }
 0x872   : > { %v2624_v21 = vpop.f32.mrf.mxu0 }
 0x873   : > { %v2625_v13 = vadd.f32 %v2624_v21, %v7568_v27 }
 0x874   : > { %v6162_v52 = vpop.f32.mrf.mxu0 }
 0x87e   : > { %v6666_v51 = vpop.eup %6665 }
 0x87f   : > { %v2632_v63 = vadd.f32 1.0, %v6666_v51 }
 0x881   : > { %6667 = vrcp.f32 %v2632_v63 }
 0x882   : > { %v2730_v45 = vpop.f32.mrf.mxu1  ;;  %v2800_v47 = vpop.f32.mrf.mxu0 }
 0x883   : > { %v2731_v20 = vadd.f32 %v2730_v45, %v7545_v46 }
 0x884   : > { %v6173_v15 = vpop.f32.mrf.mxu1  ;;  %v6184_v8 = vpop.f32.mrf.mxu0 }
 0x885   : > { %2875 = vrot.lane.b32.xlu0 %v2731_v20, %s7022_s24 }
 0x88a   : > { %v2870_v44 = vpop.f32.mrf.mxu1 }
 0x88b   : > { %v2871_v4 = vadd.f32 %v2870_v44, %v7562_v11 }
 0x88c   : > { %v6195_v10 = vpop.f32.mrf.mxu1 }
 0x88d   : > { %2893 = vrot.lane.b32.xlu0 %v2871_v4, %s7022_s24 }
 0x88e   : > { %v6668_v16 = vpop.eup %6667 }
 0x88f   : > { %v2646_v17 = vmul.f32 %v6668_v16, %v2625_v13  ;;  %v2801_v16 = vadd.f32 %v2800_v47, %v7596_v61  ;;  %v7915_v47 = vld [vmem:[#allocation9 + $0x50] sm:$0xff] }
 0x891   : > { %2648 = vrot.lane.b32.xlu1 %v2646_v17, %s7024_s0  ;;  %v2885_v17 = vadd.f32 %v2801_v16, %v7548_v48 }
 0x895   : > { %2636 = vrot.lane.b32.xlu1 %v2555_v57, %s7023_s2  ;;  %v5622_v57 = vmul.f32 -1.442695, %v2885_v17 }
 0x8f7   : > { %v2876_v3 = vpop.permute.xlu0 %2875 }
 0x8f8   : > { %v2878_v24 = vadd.f32 %v2876_v3, %v7542_v34 }
 0x8fa   : > { %v5621_v26 = vmul.f32 -1.442695, %v2878_v24 }
 0x8fc   : > { %6669 = vpow2.f32 %v5621_v26 }
 0x8ff   : > { %v2894_v7 = vpop.permute.xlu0 %2893 }
 0x903   : > { %v2649_v28 = vpop.permute.xlu1 %2648 }
 0x904   : > { %v2651_v29 = vadd.f32 %v2649_v28, %v7536_v12  ;;  %v7906_v28 = vld [vmem:[#allocation9 + $0x58] sm:$0xff] }
 0x906   : > { %6671 = vtanh.f32 %v2651_v29  ;;  %v7920_v29 = vld [vmem:[#allocation9 + $0x70] sm:$0xff] }
 0x907   : > { %v2637_v19 = vpop.permute.xlu1 %2636 }
 0x908   : > { %v2639_v58 = vadd.f32 %v2637_v19, %v7536_v12 }
 0x909   : > { %v6670_v25 = vpop.eup %6669 }
 0x90a   : > { %v2882_v60 = vadd.f32 1.0, %v6670_v25  ;;  %v5617_v21 = vmul.f32 -1.442695, %v2639_v58  ;;  %v7923_v25 = vld [vmem:[#allocation9 + $0x48] sm:$0xff]  ;;  %v7955_v58 = vld [vmem:[#allocation9 + $0x80] sm:$0xff] }
 0x90c   : > { %6673 = vrcp.f32 %v2882_v60  ;;  %v7928_v60 = vld [vmem:[#allocation9 + $0x68] sm:$0xff] }
 0x90d   : > { %6675 = vpow2.f32 %v5617_v21 }
 0x913   : > { %v6672_v37 = vpop.eup %6671 }
 0x914   : > { %2655 = vrot.lane.b32.xlu1 %v6672_v37, %s7022_s24  ;;  %v7931_v37 = vld [vmem:[#allocation9 + $0x40] sm:$0xff] }
 0x919   : > { %v6674_v56 = vpop.eup %6673 }
 0x91a   : > { %v2896_v1 = vmul.f32 %v6674_v56, %v2894_v7  ;;  %v6676_v52 = vpop.eup %6675  ;;  %v7938_v56 = vld [vmem:[#allocation9 + $0x60] sm:$0xff]  ;;  %v7944_v7 = vld [vmem:[#allocation9 + $0x90] sm:$0xff] }
 0x91b   : > { %v2643_v51 = vadd.f32 1.0, %v6676_v52 }
 0x91c   : > { %2898 = vrot.lane.b32.xlu0 %v2896_v1, %s7024_s0  ;;  %v7951_v1 = vld [vmem:[#allocation9 + $0x88] sm:$0xff] }
 0x91d   : > { %6677 = vrcp.f32 %v2643_v51 }
 0x92a   : > { %v6678_v63 = vpop.eup %6677 }
 0x92b   : > { %v2653_v45 = vsub.f32 1.0, %v6678_v63  ;;  %v2659_v15 = vmul.f32 %v6678_v63, %v7782_v49 }
 0x986   : > { %v2656_v20 = vpop.permute.xlu1 %2655 }
 0x987   : > { %v2658_v8 = vmul.f32 %v2656_v20, %v2653_v45  ;;  %v7966_v20 = vld [vmem:[#allocation9 + $0xb8] sm:$0xff] }
 0x989   : > { %v7896_v44 = vadd.f32 %v2659_v15, %v2658_v8  ;;  %v7973_v15 = vld [vmem:[#allocation9 + $0xb0] sm:$0xff]  ;;  %v7979_v8 = vld [vmem:[#allocation9 + $0xa8] sm:$0xff] }
 0x98b   : > { %2912 = vrot.lane.b32.xlu0 %v7896_v44, %s7022_s24 }
 0x98e   : > { %v2899_v4 = vpop.permute.xlu0 %2898 }
 0x98f   : > { %v2901_v10 = vadd.f32 %v2899_v4, %v7548_v48  ;;  %v7912_v48 = vld [vmem:[#allocation9 + $0x78] sm:$0xff]  ;;  %v7985_v4 = vld [vmem:[#allocation9 + $0xa0] sm:$0xff] }
 0x991   : > { %6679 = vtanh.f32 %v2901_v10 }
 0x992   : > { %6681 = vpow2.f32 %v5622_v57 }
 0x99e   : > { %v6680_v13 = vpop.eup %6679 }
 0x99f   : > { %2905 = vrot.lane.b32.xlu1 %v6680_v13, %s7022_s24  ;;  %v6682_v3 = vpop.eup %6681 }
 0x9a0   : > { %v2889_v24 = vadd.f32 1.0, %v6682_v3 }
 0x9a2   : > { %6683 = vrcp.f32 %v2889_v24 }
 0x9af   : > { %v6684_v19 = vpop.eup %6683 }
 0x9b0   : > { %v2903_v21 = vsub.f32 1.0, %v6684_v19  ;;  %v2909_v63 = vmul.f32 %v6684_v19, %v7826_v31 }
 0x9fd   : > { %v2913_v26 = vpop.permute.xlu0 %2912 }
 0x9fe   : > { %6205 = vmatmul.mubr.msk.f32.vlgmr.msra.gmra.mxu0 %vm737_vm1, %v2913_v26  ;;  %6216 = vmatmul.mubr.msk.f32.vlgmr.msra.gmra.mxu1 %vm737_vm1, %v2913_v26 }
 0x9ff   : > { %6219 = vmatpush3.msra.mxu0 %v7906_v28  ;;  %6226 = vmatprep.mubr.msk.f32.mxu0 %vm7021_vm0, %v8470_v2 }
 0xa00   : > { %6220 = vmatprep.subr.mxu0 %v8470_v2  ;;  %6230 = vmatpush3.msra.mxu1 %v7912_v48 }
 0xa01   : > { %6221 = vmatpush3.msra.mxu0 %v7915_v47  ;;  %6231 = vmatprep.subr.mxu1 %v8470_v2 }
 0xa02   : > { %6222 = vmatprep.subr.mxu0 %v8470_v2  ;;  %6232 = vmatpush3.msra.mxu1 %v7920_v29 }
 0xa03   : > { %6223 = vmatpush3.msra.mxu0 %v7923_v25  ;;  %6233 = vmatprep.subr.mxu1 %v8470_v2 }
 0xa04   : > { %6224 = vmatprep.subr.mxu0 %v8470_v2  ;;  %6234 = vmatpush3.msra.mxu1 %v7928_v60 }
 0xa05   : > { %6225 = vmatpush3.msra.mxu0 %v7931_v37  ;;  %6235 = vmatprep.subr.mxu1 %v8470_v2 }
 0xa06   : > { %6227 = vmatmul.mubr.msk.f32.vlgmr.msra.gmra.mxu0 %vm737_vm1, %v2913_v26  ;;  %6240 = vmatprep.subr.mxu0 %v8470_v2 }
 0xa07   : > { %6241 = vmatpush3.msra.mxu0 %v7809_v22  ;;  %6236 = vmatpush3.msra.mxu1 %v7938_v56 }
 0xa08   : > { %6242 = vmatprep.subr.mxu0 %v8470_v2  ;;  %6237 = vmatprep.mubr.msk.f32.mxu1 %vm7021_vm0, %v8470_v2 }
 0xa09   : > { %6243 = vmatpush3.msra.mxu0 %v7944_v7  ;;  %6248 = vmatprep.mubr.msk.f32.mxu0 %vm7021_vm0, %v8470_v2 }
 0xa0a   : > { %6244 = vmatprep.subr.mxu0 %v8470_v2  ;;  %6251 = vmatprep.subr.mxu1 %v8470_v2 }
 0xa0b   : > { %6245 = vmatpush3.msra.mxu0 %v7951_v1 }
 0xa0c   : > { %6246 = vmatprep.subr.mxu0 %v8470_v2 }
 0xa0d   : > { %6247 = vmatpush3.msra.mxu0 %v7955_v58 }
 0xa0e   : > { %6262 = vmatprep.subr.mxu0 %v8470_v2 }
 0xa11   : > { %v2906_v52 = vpop.permute.xlu1 %2905 }
 0xa12   : > { %v2908_v51 = vmul.f32 %v2906_v52, %v2903_v21 }
 0xa14   : > { %v7960_v45 = vadd.f32 %v2909_v63, %v2908_v51 }
 0xa16   : > { %6238 = vmatmul.mubr.msk.f32.vlgmr.msra.gmra.mxu1 %vm737_vm1, %v7960_v45  ;;  %6249 = vmatmul.mubr.msk.f32.vlgmr.msra.gmra.mxu0 %vm737_vm1, %v7960_v45 }
 0xa17   : > { %6252 = vmatpush3.msra.mxu1 %v7966_v20  ;;  %6259 = vmatprep.mubr.msk.f32.mxu1 %vm7021_vm0, %v8470_v2 }
 0xa18   : > { %6253 = vmatprep.subr.mxu1 %v8470_v2  ;;  %6263 = vmatpush3.msra.mxu0 %v7836_v32 }
 0xa19   : > { %6254 = vmatpush3.msra.mxu1 %v7973_v15  ;;  %6264 = vmatprep.subr.mxu0 %v8470_v2 }
 0xa1a   : > { %6255 = vmatprep.subr.mxu1 %v8470_v2  ;;  %6265 = vmatpush3.msra.mxu0 %v7842_v33 }
 0xa1b   : > { %6256 = vmatpush3.msra.mxu1 %v7979_v8  ;;  %6266 = vmatprep.subr.mxu0 %v8470_v2 }
 0xa1c   : > { %6257 = vmatprep.subr.mxu1 %v8470_v2  ;;  %6267 = vmatpush3.msra.mxu0 %v7848_v35 }
 0xa1d   : > { %6258 = vmatpush3.msra.mxu1 %v7985_v4  ;;  %6268 = vmatprep.subr.mxu0 %v8470_v2 }
 0xa1e   : > { %6260 = vmatmul.mubr.msk.f32.vlgmr.msra.gmra.mxu1 %vm737_vm1, %v7960_v45  ;;  %6273 = vmatprep.subr.mxu1 %v8470_v2 }
 0xa1f   : > { %6274 = vmatpush3.msra.mxu1 %v7856_v36  ;;  %6269 = vmatpush3.msra.mxu0 %v7859_v38 }
 0xa20   : > { %6275 = vmatprep.subr.mxu1 %v8470_v2  ;;  %6270 = vmatprep.mubr.msk.f32.mxu0 %vm7021_vm0, %v8470_v2 }
 0xa21   : > { %6276 = vmatpush3.msra.mxu1 %v7865_v39  ;;  %6281 = vmatprep.mubr.msk.f32.mxu1 %vm7021_vm0, %v8470_v2 }
 0xa22   : > { %6277 = vmatprep.subr.mxu1 %v8470_v2  ;;  %6284 = vmatprep.subr.mxu0 %v8470_v2 }
 0xa23   : > { %6278 = vmatpush3.msra.mxu1 %v7872_v40 }
 0xa24   : > { %6279 = vmatprep.subr.mxu1 %v8470_v2 }
 0xa25   : > { %6280 = vmatpush3.msra.mxu1 %v7876_v42 }
 0xa26   : > { %6295 = vmatprep.subr.mxu1 %v8470_v2 }
 0xabe   : > { %v2982_v10 = vpop.f32.mrf.mxu0  ;;  %v3052_v13 = vpop.f32.mrf.mxu1 }
 0xabf   : > { %v2983_v16 = vadd.f32 %v2982_v10, %v7517_v50 }
 0xac0   : > { %v6206_v17 = vpop.f32.mrf.mxu0  ;;  %v6217_v57 = vpop.f32.mrf.mxu1 }
 0xac1   : > { %v3126_v3 = vadd.f32 %v2983_v16, %v7542_v34 }
 0xac3   : > { %v5626_v24 = vmul.f32 -1.442695, %v3126_v3 }
 0xac5   : > { %6685 = vpow2.f32 %v5626_v24 }
 0xac6   : > { %v3122_v26 = vpop.f32.mrf.mxu0 }
 0xac7   : > { %v3123_v16 = vadd.f32 %v3122_v26, %v7568_v27 }
 0xac8   : > { %v6228_v19 = vpop.f32.mrf.mxu0 }
 0xac9   : > { %v3053_v19 = vadd.f32 %v3052_v13, %v7575_v43 }
 0xad2   : > { %v6686_v21 = vpop.eup %6685 }
 0xad3   : > { %v3130_v52 = vadd.f32 1.0, %v6686_v21 }
 0xad5   : > { %6687 = vrcp.f32 %v3130_v52 }
 0xad6   : > { %v3228_v51 = vpop.f32.mrf.mxu1  ;;  %v3298_v63 = vpop.f32.mrf.mxu0 }
 0xad7   : > { %v3229_v41 = vadd.f32 %v3228_v51, %v7545_v46 }
 0xad8   : > { %v6239_v2 = vpop.f32.mrf.mxu1  ;;  %v6250_v49 = vpop.f32.mrf.mxu0 }
 0xad9   : > { %3373 = vrot.lane.b32.xlu0 %v3229_v41, %s7022_s24 }
 0xade   : > { %v3368_v10 = vpop.f32.mrf.mxu1 }
 0xadf   : > { %v3369_v17 = vadd.f32 %v3368_v10, %v7562_v11 }
 0xae0   : > { %v6261_v57 = vpop.f32.mrf.mxu1 }
 0xae1   : > { %3391 = vrot.lane.b32.xlu0 %v3369_v17, %s7022_s24 }
 0xae2   : > { %v6688_v3 = vpop.eup %6687 }
 0xae3   : > { %v3144_v24 = vmul.f32 %v6688_v3, %v3123_v16 }
 0xae5   : > { %3146 = vrot.lane.b32.xlu1 %v3144_v24, %s7024_s0 }
 0xae9   : > { %3134 = vrot.lane.b32.xlu1 %v3053_v19, %s7023_s2 }
 0xb4b   : > { %v3374_v2 = vpop.permute.xlu0 %3373 }
 0xb4c   : > { %v3376_v49 = vadd.f32 %v3374_v2, %v7536_v12 }
 0xb4e   : > { %v5631_v41 = vmul.f32 -1.442695, %v3376_v49 }
 0xb50   : > { %6689 = vpow2.f32 %v5631_v41 }
 0xb53   : > { %v3392_v57 = vpop.permute.xlu0 %3391 }
 0xb57   : > { %v3147_v21 = vpop.permute.xlu1 %3146 }
 0xb58   : > { %v3149_v52 = vadd.f32 %v3147_v21, %v7542_v34 }
 0xb5a   : > { %6691 = vtanh.f32 %v3149_v52 }
 0xb5b   : > { %v3135_v16 = vpop.permute.xlu1 %3134 }
 0xb5c   : > { %v3137_v12 = vadd.f32 %v3135_v16, %v7542_v34 }
 0xb5d   : > { %v6690_v26 = vpop.eup %6689 }
 0xb5e   : > { %v3380_v51 = vadd.f32 1.0, %v6690_v26  ;;  %v5627_v3 = vmul.f32 -1.442695, %v3137_v12 }
 0xb60   : > { %6693 = vrcp.f32 %v3380_v51 }
 0xb61   : > { %6695 = vpow2.f32 %v5627_v3 }
 0xb67   : > { %v6692_v10 = vpop.eup %6691 }
 0xb68   : > { %3153 = vrot.lane.b32.xlu1 %v6692_v10, %s7022_s24 }
 0xb6d   : > { %v6694_v17 = vpop.eup %6693 }
 0xb6e   : > { %v3394_v13 = vmul.f32 %v6694_v17, %v3392_v57  ;;  %v6696_v24 = vpop.eup %6695  ;;  %v3299_v17 = vadd.f32 %v3298_v63, %v7596_v61 }
 0xb6f   : > { %v3141_v19 = vadd.f32 1.0, %v6696_v24  ;;  %v8513_v24 = vmov 0.0  }
 0xb70   : > { %3396 = vrot.lane.b32.xlu0 %v3394_v13, %s7024_s0  ;;  %v3383_v57 = vadd.f32 %v3299_v17, %v7540_v23 }
 0xb71   : > { %6697 = vrcp.f32 %v3141_v19 }
 0xb72   : > { %v5632_v13 = vmul.f32 -1.442695, %v3383_v57 }
 0xb7e   : > { %v6698_v2 = vpop.eup %6697 }
 0xb7f   : > { %v3151_v49 = vsub.f32 1.0, %v6698_v2  ;;  %v3157_v21 = vmul.f32 %v6698_v2, %v7896_v44 }
 0xbda   : > { %v3154_v41 = vpop.permute.xlu1 %3153 }
 0xbdb   : > { %v3156_v52 = vmul.f32 %v3154_v41, %v3151_v49 }
 0xbdd   : > { %v8022_v26 = vadd.f32 %v3157_v21, %v3156_v52 }
 0xbdf   : > { %3410 = vrot.lane.b32.xlu0 %v8022_v26, %s7022_s24 }
 0xbe2   : > { %v3397_v51 = vpop.permute.xlu0 %3396 }
 0xbe3   : > { %v3399_v10 = vadd.f32 %v3397_v51, %v7540_v23 }
 0xbe5   : > { %6699 = vtanh.f32 %v3399_v10 }
 0xbe6   : > { %6701 = vpow2.f32 %v5632_v13 }
 0xbf2   : > { %v6700_v34 = vpop.eup %6699 }
 0xbf3   : > { %3403 = vrot.lane.b32.xlu1 %v6700_v34, %s7022_s24  ;;  %v6702_v16 = vpop.eup %6701 }
 0xbf4   : > { %v3387_v12 = vadd.f32 1.0, %v6702_v16 }
 0xbf6   : > { %6703 = vrcp.f32 %v3387_v12 }
 0xc03   : > { %v6704_v23 = vpop.eup %6703 }
 0xc04   : > { %v3401_v63 = vsub.f32 1.0, %v6704_v23  ;;  %v3407_v49 = vmul.f32 %v6704_v23, %v7960_v45 }
 0xc51   : > { %v3411_v3 = vpop.permute.xlu0 %3410 }
 0xc52   : > { %6271 = vmatmul.mubr.msk.f32.vlgmr.msra.gmra.mxu0 %vm737_vm1, %v3411_v3  ;;  %6282 = vmatmul.mubr.msk.f32.vlgmr.msra.gmra.mxu1 %vm737_vm1, %v3411_v3 }
 0xc53   : > { %6285 = vmatpush3.msra.mxu0 %v7906_v28  ;;  %6292 = vmatprep.mubr.msk.f32.mxu0 %vm7021_vm0, %v8513_v24 }
 0xc54   : > { %6286 = vmatprep.subr.mxu0 %v8513_v24  ;;  %6296 = vmatpush3.msra.mxu1 %v7912_v48 }
 0xc55   : > { %6287 = vmatpush3.msra.mxu0 %v7915_v47  ;;  %6297 = vmatprep.subr.mxu1 %v8513_v24 }
 0xc56   : > { %6288 = vmatprep.subr.mxu0 %v8513_v24  ;;  %6298 = vmatpush3.msra.mxu1 %v7920_v29 }
 0xc57   : > { %6289 = vmatpush3.msra.mxu0 %v7923_v25  ;;  %6299 = vmatprep.subr.mxu1 %v8513_v24 }
 0xc58   : > { %6290 = vmatprep.subr.mxu0 %v8513_v24  ;;  %6300 = vmatpush3.msra.mxu1 %v7928_v60 }
 0xc59   : > { %6291 = vmatpush3.msra.mxu0 %v7931_v37  ;;  %6301 = vmatprep.subr.mxu1 %v8513_v24 }
 0xc5a   : > { %6293 = vmatmul.mubr.msk.f32.vlgmr.msra.gmra.mxu0 %vm737_vm1, %v3411_v3  ;;  %6306 = vmatprep.subr.mxu0 %v8513_v24 }
 0xc5b   : > { %6307 = vmatpush3.msra.mxu0 %v7809_v22  ;;  %6302 = vmatpush3.msra.mxu1 %v7938_v56 }
 0xc5c   : > { %6308 = vmatprep.subr.mxu0 %v8513_v24  ;;  %6303 = vmatprep.mubr.msk.f32.mxu1 %vm7021_vm0, %v8513_v24 }
 0xc5d   : > { %6309 = vmatpush3.msra.mxu0 %v7944_v7  ;;  %6314 = vmatprep.mubr.msk.f32.mxu0 %vm7021_vm0, %v8513_v24 }
 0xc5e   : > { %6310 = vmatprep.subr.mxu0 %v8513_v24  ;;  %6317 = vmatprep.subr.mxu1 %v8513_v24 }
 0xc5f   : > { %6311 = vmatpush3.msra.mxu0 %v7951_v1 }
 0xc60   : > { %6312 = vmatprep.subr.mxu0 %v8513_v24 }
 0xc61   : > { %6313 = vmatpush3.msra.mxu0 %v7955_v58 }
 0xc62   : > { %6328 = vmatprep.subr.mxu0 %v8513_v24 }
 0xc65   : > { %v3404_v19 = vpop.permute.xlu1 %3403 }
 0xc66   : > { %v3406_v2 = vmul.f32 %v3404_v19, %v3401_v63 }
 0xc68   : > { %v8064_v41 = vadd.f32 %v3407_v49, %v3406_v2 }
 0xc6a   : > { %6304 = vmatmul.mubr.msk.f32.vlgmr.msra.gmra.mxu1 %vm737_vm1, %v8064_v41  ;;  %6315 = vmatmul.mubr.msk.f32.vlgmr.msra.gmra.mxu0 %vm737_vm1, %v8064_v41 }
 0xc6b   : > { %6318 = vmatpush3.msra.mxu1 %v7966_v20  ;;  %6325 = vmatprep.mubr.msk.f32.mxu1 %vm7021_vm0, %v8513_v24 }
 0xc6c   : > { %6319 = vmatprep.subr.mxu1 %v8513_v24  ;;  %6329 = vmatpush3.msra.mxu0 %v7836_v32 }
 0xc6d   : > { %6320 = vmatpush3.msra.mxu1 %v7973_v15  ;;  %6330 = vmatprep.subr.mxu0 %v8513_v24 }
 0xc6e   : > { %6321 = vmatprep.subr.mxu1 %v8513_v24  ;;  %6331 = vmatpush3.msra.mxu0 %v7842_v33 }
 0xc6f   : > { %6322 = vmatpush3.msra.mxu1 %v7979_v8  ;;  %6332 = vmatprep.subr.mxu0 %v8513_v24 }
 0xc70   : > { %6323 = vmatprep.subr.mxu1 %v8513_v24  ;;  %6333 = vmatpush3.msra.mxu0 %v7848_v35 }
 0xc71   : > { %6324 = vmatpush3.msra.mxu1 %v7985_v4  ;;  %6334 = vmatprep.subr.mxu0 %v8513_v24 }
 0xc72   : > { %6326 = vmatmul.mubr.msk.f32.vlgmr.msra.gmra.mxu1 %vm737_vm1, %v8064_v41  ;;  %6339 = vmatprep.subr.mxu1 %v8513_v24 }
 0xc73   : > { %6340 = vmatpush3.msra.mxu1 %v7856_v36  ;;  %6335 = vmatpush3.msra.mxu0 %v7859_v38 }
 0xc74   : > { %6341 = vmatprep.subr.mxu1 %v8513_v24  ;;  %6336 = vmatprep.mubr.msk.f32.mxu0 %vm7021_vm0, %v8513_v24 }
 0xc75   : > { %6342 = vmatpush3.msra.mxu1 %v7865_v39  ;;  %6347 = vmatprep.mubr.msk.f32.mxu1 %vm7021_vm0, %v8513_v24 }
 0xc76   : > { %6343 = vmatprep.subr.mxu1 %v8513_v24  ;;  %6350 = vmatprep.subr.mxu0 %v8513_v24 }
 0xc77   : > { %6344 = vmatpush3.msra.mxu1 %v7872_v40 }
 0xc78   : > { %6345 = vmatprep.subr.mxu1 %v8513_v24 }
 0xc79   : > { %6346 = vmatpush3.msra.mxu1 %v7876_v42 }
 0xc7a   : > { %6361 = vmatprep.subr.mxu1 %v8513_v24 }
 0xd12   : > { %v3480_v21 = vpop.f32.mrf.mxu0  ;;  %v3550_v52 = vpop.f32.mrf.mxu1 }
 0xd13   : > { %v3481_v51 = vadd.f32 %v3480_v21, %v7517_v50 }
 0xd14   : > { %v6272_v10 = vpop.f32.mrf.mxu0  ;;  %v6283_v34 = vpop.f32.mrf.mxu1 }
 0xd15   : > { %v3624_v17 = vadd.f32 %v3481_v51, %v7550_v53 }
 0xd17   : > { %v5636_v57 = vmul.f32 -1.442695, %v3624_v17 }
 0xd19   : > { %6705 = vpow2.f32 %v5636_v57 }
 0xd1a   : > { %v3620_v13 = vpop.f32.mrf.mxu0 }
 0xd1b   : > { %v3621_v51 = vadd.f32 %v3620_v13, %v7568_v27 }
 0xd1c   : > { %v6294_v16 = vpop.f32.mrf.mxu0 }
 0xd1d   : > { %v3551_v16 = vadd.f32 %v3550_v52, %v7575_v43 }
 0xd26   : > { %v6706_v12 = vpop.eup %6705 }
 0xd27   : > { %v3628_v3 = vadd.f32 1.0, %v6706_v12 }
 0xd29   : > { %6707 = vrcp.f32 %v3628_v3 }
 0xd2a   : > { %v3726_v23 = vpop.f32.mrf.mxu1  ;;  %v3796_v63 = vpop.f32.mrf.mxu0 }
 0xd2b   : > { %v3727_v19 = vadd.f32 %v3726_v23, %v7545_v46 }
 0xd2c   : > { %v6305_v2 = vpop.f32.mrf.mxu1  ;;  %v6316_v49 = vpop.f32.mrf.mxu0 }
 0xd2d   : > { %3871 = vrot.lane.b32.xlu0 %v3727_v19, %s7022_s24 }
 0xd32   : > { %v3866_v21 = vpop.f32.mrf.mxu1 }
 0xd33   : > { %v3867_v10 = vadd.f32 %v3866_v21, %v7562_v11 }
 0xd34   : > { %v6327_v34 = vpop.f32.mrf.mxu1 }
 0xd35   : > { %3889 = vrot.lane.b32.xlu0 %v3867_v10, %s7022_s24 }
 0xd36   : > { %v6708_v17 = vpop.eup %6707 }
 0xd37   : > { %v3642_v57 = vmul.f32 %v6708_v17, %v3621_v51 }
 0xd39   : > { %3644 = vrot.lane.b32.xlu1 %v3642_v57, %s7024_s0 }
 0xd3d   : > { %3632 = vrot.lane.b32.xlu1 %v3551_v16, %s7023_s2 }
 0xd9f   : > { %v3872_v12 = vpop.permute.xlu0 %3871 }
 0xda0   : > { %v3874_v3 = vadd.f32 %v3872_v12, %v7531_v6 }
 0xda2   : > { %v5641_v23 = vmul.f32 -1.442695, %v3874_v3 }
 0xda4   : > { %6709 = vpow2.f32 %v5641_v23 }
 0xda7   : > { %v3890_v34 = vpop.permute.xlu0 %3889 }
 0xdab   : > { %v3645_v19 = vpop.permute.xlu1 %3644 }
 0xdac   : > { %v3647_v2 = vadd.f32 %v3645_v19, %v7550_v53 }
 0xdae   : > { %6711 = vtanh.f32 %v3647_v2 }
 0xdaf   : > { %v3633_v51 = vpop.permute.xlu1 %3632 }
 0xdb0   : > { %v3635_v6 = vadd.f32 %v3633_v51, %v7550_v53 }
 0xdb1   : > { %v6710_v13 = vpop.eup %6709 }
 0xdb2   : > { %v3878_v49 = vadd.f32 1.0, %v6710_v13  ;;  %v5637_v17 = vmul.f32 -1.442695, %v3635_v6 }
 0xdb4   : > { %6713 = vrcp.f32 %v3878_v49 }
 0xdb5   : > { %6715 = vpow2.f32 %v5637_v17 }
 0xdbb   : > { %v6712_v21 = vpop.eup %6711 }
 0xdbc   : > { %3651 = vrot.lane.b32.xlu1 %v6712_v21, %s7022_s24 }
 0xdc1   : > { %v6714_v10 = vpop.eup %6713 }
 0xdc2   : > { %v3892_v52 = vmul.f32 %v6714_v10, %v3890_v34  ;;  %v6716_v57 = vpop.eup %6715  ;;  %v3797_v10 = vadd.f32 %v3796_v63, %v7596_v61 }
 0xdc3   : > { %v3639_v16 = vadd.f32 1.0, %v6716_v57 }
 0xdc4   : > { %3894 = vrot.lane.b32.xlu0 %v3892_v52, %s7024_s0  ;;  %v3881_v34 = vadd.f32 %v3797_v10, %v7534_v9 }
 0xdc5   : > { %6717 = vrcp.f32 %v3639_v16 }
 0xdc6   : > { %v5642_v52 = vmul.f32 -1.442695, %v3881_v34 }
 0xdd2   : > { %v6718_v12 = vpop.eup %6717 }
 0xdd3   : > { %v3649_v3 = vsub.f32 1.0, %v6718_v12  ;;  %v3655_v19 = vmul.f32 %v6718_v12, %v8022_v26 }
 0xe2e   : > { %v3652_v23 = vpop.permute.xlu1 %3651 }
 0xe2f   : > { %v3654_v2 = vmul.f32 %v3652_v23, %v3649_v3 }
 0xe31   : > { %v8118_v13 = vadd.f32 %v3655_v19, %v3654_v2 }
 0xe33   : > { %3908 = vrot.lane.b32.xlu0 %v8118_v13, %s7022_s24 }
 0xe36   : > { %v3895_v49 = vpop.permute.xlu0 %3894 }
 0xe37   : > { %v3897_v21 = vadd.f32 %v3895_v49, %v7534_v9 }
 0xe39   : > { %6719 = vtanh.f32 %v3897_v21 }
 0xe3a   : > { %6721 = vpow2.f32 %v5642_v52 }
 0xe46   : > { %v6720_v53 = vpop.eup %6719 }
 0xe47   : > { %3901 = vrot.lane.b32.xlu1 %v6720_v53, %s7022_s24  ;;  %v6722_v51 = vpop.eup %6721 }
 0xe48   : > { %v3885_v6 = vadd.f32 1.0, %v6722_v51 }
 0xe4a   : > { %6723 = vrcp.f32 %v3885_v6 }
 0xe57   : > { %v6724_v9 = vpop.eup %6723 }
 0xe58   : > { %v3905_v16 = vmul.f32 %v6724_v9, %v8064_v41 }
 0xea5   : > { %v3909_v17 = vpop.permute.xlu0 %3908 }
 0xea6   : > { %6337 = vmatmul.mubr.msk.f32.vlgmr.msra.gmra.mxu0 %vm737_vm1, %v3909_v17  ;;  %6348 = vmatmul.mubr.msk.f32.vlgmr.msra.gmra.mxu1 %vm737_vm1, %v3909_v17 }
 0xea7   : > { %6351 = vmatpush3.msra.mxu0 %v7906_v28  ;;  %6358 = vmatprep.mubr.msk.f32.mxu0 %vm7021_vm0, %v8513_v24 }
 0xea8   : > { %6352 = vmatprep.subr.mxu0 %v8513_v24  ;;  %6362 = vmatpush3.msra.mxu1 %v7912_v48 }
 0xea9   : > { %6353 = vmatpush3.msra.mxu0 %v7915_v47  ;;  %6363 = vmatprep.subr.mxu1 %v8513_v24 }
 0xeaa   : > { %6354 = vmatprep.subr.mxu0 %v8513_v24  ;;  %6364 = vmatpush3.msra.mxu1 %v7920_v29 }
 0xeab   : > { %6355 = vmatpush3.msra.mxu0 %v7923_v25  ;;  %6365 = vmatprep.subr.mxu1 %v8513_v24 }
 0xeac   : > { %6356 = vmatprep.subr.mxu0 %v8513_v24  ;;  %6366 = vmatpush3.msra.mxu1 %v7928_v60 }
 0xead   : > { %6357 = vmatpush3.msra.mxu0 %v7931_v37  ;;  %6367 = vmatprep.subr.mxu1 %v8513_v24 }
 0xeae   : > { %6359 = vmatmul.mubr.msk.f32.vlgmr.msra.gmra.mxu0 %vm737_vm1, %v3909_v17  ;;  %6372 = vmatprep.subr.mxu0 %v8513_v24 }
 0xeaf   : > { %6373 = vmatpush3.msra.mxu0 %v7809_v22  ;;  %6368 = vmatpush3.msra.mxu1 %v7938_v56  ;;  %v3899_v22 = vsub.f32 1.0, %v6724_v9 }
 0xeb0   : > { %6374 = vmatprep.subr.mxu0 %v8513_v24  ;;  %6369 = vmatprep.mubr.msk.f32.mxu1 %vm7021_vm0, %v8513_v24 }
 0xeb1   : > { %6375 = vmatpush3.msra.mxu0 %v7944_v7  ;;  %6380 = vmatprep.mubr.msk.f32.mxu0 %vm7021_vm0, %v8513_v24 }
 0xeb2   : > { %6376 = vmatprep.subr.mxu0 %v8513_v24  ;;  %6383 = vmatprep.subr.mxu1 %v8513_v24 }
 0xeb3   : > { %6377 = vmatpush3.msra.mxu0 %v7951_v1 }
 0xeb4   : > { %6378 = vmatprep.subr.mxu0 %v8513_v24 }
 0xeb5   : > { %6379 = vmatpush3.msra.mxu0 %v7955_v58 }
 0xeb6   : > { %6394 = vmatprep.subr.mxu0 %v8513_v24 }
 0xeb9   : > { %v3902_v63 = vpop.permute.xlu1 %3901 }
 0xeba   : > { %v3904_v57 = vmul.f32 %v3902_v63, %v3899_v22 }
 0xebc   : > { %v8160_v12 = vadd.f32 %v3905_v16, %v3904_v57 }
 0xebe   : > { %6370 = vmatmul.mubr.msk.f32.vlgmr.msra.gmra.mxu1 %vm737_vm1, %v8160_v12  ;;  %6381 = vmatmul.mubr.msk.f32.vlgmr.msra.gmra.mxu0 %vm737_vm1, %v8160_v12 }
 0xebf   : > { %6384 = vmatpush3.msra.mxu1 %v7966_v20  ;;  %6391 = vmatprep.mubr.msk.f32.mxu1 %vm7021_vm0, %v8513_v24 }
 0xec0   : > { %6385 = vmatprep.subr.mxu1 %v8513_v24  ;;  %6395 = vmatpush3.msra.mxu0 %v7836_v32 }
 0xec1   : > { %6386 = vmatpush3.msra.mxu1 %v7973_v15  ;;  %6396 = vmatprep.subr.mxu0 %v8513_v24 }
 0xec2   : > { %6387 = vmatprep.subr.mxu1 %v8513_v24  ;;  %6397 = vmatpush3.msra.mxu0 %v7842_v33 }
 0xec3   : > { %6388 = vmatpush3.msra.mxu1 %v7979_v8  ;;  %6398 = vmatprep.subr.mxu0 %v8513_v24 }
 0xec4   : > { %6389 = vmatprep.subr.mxu1 %v8513_v24  ;;  %6399 = vmatpush3.msra.mxu0 %v7848_v35 }
 0xec5   : > { %6390 = vmatpush3.msra.mxu1 %v7985_v4  ;;  %6400 = vmatprep.subr.mxu0 %v8513_v24 }
 0xec6   : > { %6392 = vmatmul.mubr.msk.f32.vlgmr.msra.gmra.mxu1 %vm737_vm1, %v8160_v12  ;;  %6405 = vmatprep.subr.mxu1 %v8513_v24 }
 0xec7   : > { %6406 = vmatpush3.msra.mxu1 %v7856_v36  ;;  %6401 = vmatpush3.msra.mxu0 %v7859_v38 }
 0xec8   : > { %6407 = vmatprep.subr.mxu1 %v8513_v24  ;;  %6402 = vmatprep.mubr.msk.f32.mxu0 %vm7021_vm0, %v8513_v24 }
 0xec9   : > { %6408 = vmatpush3.msra.mxu1 %v7865_v39  ;;  %6413 = vmatprep.mubr.msk.f32.mxu1 %vm7021_vm0, %v8513_v24 }
 0xeca   : > { %6409 = vmatprep.subr.mxu1 %v8513_v24  ;;  %6416 = vmatprep.subr.mxu0 %v8513_v24 }
 0xecb   : > { %6410 = vmatpush3.msra.mxu1 %v7872_v40 }
 0xecc   : > { %6411 = vmatprep.subr.mxu1 %v8513_v24 }
 0xecd   : > { %6412 = vmatpush3.msra.mxu1 %v7876_v42 }
 0xece   : > { %6427 = vmatprep.subr.mxu1 %v8513_v24 }
 0xf66   : > { %v3978_v32 = vpop.f32.mrf.mxu0  ;;  %v4048_v33 = vpop.f32.mrf.mxu1 }
 0xf67   : > { %v3979_v35 = vadd.f32 %v3978_v32, %v7517_v50  ;;  %v4049_v22 = vadd.f32 %v4048_v33, %v7575_v43 }
 0xf68   : > { %v6338_v36 = vpop.f32.mrf.mxu0  ;;  %v6349_v38 = vpop.f32.mrf.mxu1 }
 0xf69   : > { %v4122_v39 = vadd.f32 %v3979_v35, %v7559_v5 }
 0xf6b   : > { %v5646_v3 = vmul.f32 -1.442695, %v4122_v39 }
 0xf6d   : > { %6725 = vpow2.f32 %v5646_v3 }
 0xf6e   : > { %v4118_v23 = vpop.f32.mrf.mxu0 }
 0xf6f   : > { %v4119_v6 = vadd.f32 %v4118_v23, %v7568_v27 }
 0xf70   : > { %v6360_v19 = vpop.f32.mrf.mxu0 }
 0xf7a   : > { %v6726_v2 = vpop.eup %6725 }
 0xf7b   : > { %v4126_v40 = vadd.f32 1.0, %v6726_v2 }
 0xf7d   : > { %6727 = vrcp.f32 %v4126_v40 }
 0xf7e   : > { %v4224_v49 = vpop.f32.mrf.mxu1  ;;  %v4294_v21 = vpop.f32.mrf.mxu0 }
 0xf7f   : > { %v4225_v42 = vadd.f32 %v4224_v49, %v7545_v46 }
 0xf80   : > { %v6371_v53 = vpop.f32.mrf.mxu1  ;;  %v6382_v10 = vpop.f32.mrf.mxu0 }
 0xf81   : > { %4369 = vrot.lane.b32.xlu0 %v4225_v42, %s7022_s24 }
 0xf86   : > { %v4364_v34 = vpop.f32.mrf.mxu1 }
 0xf87   : > { %v4365_v52 = vadd.f32 %v4364_v34, %v7562_v11 }
 0xf88   : > { %v6393_v51 = vpop.f32.mrf.mxu1 }
 0xf89   : > { %4387 = vrot.lane.b32.xlu0 %v4365_v52, %s7022_s24 }
 0xf8a   : > { %v6728_v17 = vpop.eup %6727 }
 0xf8b   : > { %v4140_v9 = vmul.f32 %v6728_v17, %v4119_v6 }
 0xf8d   : > { %4142 = vrot.lane.b32.xlu1 %v4140_v9, %s7024_s0  ;;  %v4295_v9 = vadd.f32 %v4294_v21, %v7596_v61 }
 0xf91   : > { %4130 = vrot.lane.b32.xlu1 %v4049_v22, %s7023_s2  ;;  %v4379_v22 = vadd.f32 %v4295_v9, %v7529_v0 }
 0xff3   : > { %v4370_v63 = vpop.permute.xlu0 %4369 }
 0xff4   : > { %v4372_v57 = vadd.f32 %v4370_v63, %v7526_v62  ;;  %v5652_v63 = vmul.f32 -1.442695, %v4379_v22 }
 0xff6   : > { %v5651_v16 = vmul.f32 -1.442695, %v4372_v57 }
 0xff8   : > { %6729 = vpow2.f32 %v5651_v16 }
 0xffb   : > { %v4388_v23 = vpop.permute.xlu0 %4387 }
 0xfff   : > { %v4143_v32 = vpop.permute.xlu1 %4142 }
0x1000   : > { %v4145_v35 = vadd.f32 %v4143_v32, %v7559_v5 }
0x1002   : > { %6731 = vtanh.f32 %v4145_v35 }
0x1003   : > { %v4131_v19 = vpop.permute.xlu1 %4130 }
0x1004   : > { %v4133_v62 = vadd.f32 %v4131_v19, %v7559_v5 }
0x1005   : > { %v6730_v36 = vpop.eup %6729 }
0x1006   : > { %v4376_v38 = vadd.f32 1.0, %v6730_v36  ;;  %v5647_v2 = vmul.f32 -1.442695, %v4133_v62 }
0x1008   : > { %6733 = vrcp.f32 %v4376_v38 }
0x1009   : > { %6735 = vpow2.f32 %v5647_v2 }
0x100f   : > { %v6732_v39 = vpop.eup %6731 }
0x1010   : > { %4149 = vrot.lane.b32.xlu1 %v6732_v39, %s7022_s24 }
0x1015   : > { %v6734_v3 = vpop.eup %6733 }
0x1016   : > { %v4390_v33 = vmul.f32 %v6734_v3, %v4388_v23  ;;  %v6736_v40 = vpop.eup %6735 }
0x1017   : > { %v4137_v49 = vadd.f32 1.0, %v6736_v40 }
0x1018   : > { %4392 = vrot.lane.b32.xlu0 %v4390_v33, %s7024_s0 }
0x1019   : > { %6737 = vrcp.f32 %v4137_v49 }
0x1026   : > { %v6738_v42 = vpop.eup %6737 }
0x1027   : > { %v4147_v53 = vsub.f32 1.0, %v6738_v42  ;;  %v4153_v34 = vmul.f32 %v6738_v42, %v8118_v13 }
0x1082   : > { %v4150_v10 = vpop.permute.xlu1 %4149 }
0x1083   : > { %v4152_v52 = vmul.f32 %v4150_v10, %v4147_v53 }
0x1085   : > { %v8214_v51 = vadd.f32 %v4153_v34, %v4152_v52 }
0x1087   : > { %4406 = vrot.lane.b32.xlu0 %v8214_v51, %s7022_s24 }
0x108a   : > { %v4393_v6 = vpop.permute.xlu0 %4392 }
0x108b   : > { %v4395_v17 = vadd.f32 %v4393_v6, %v7529_v0  ;;  %v6797_v0 = vld [vmem:[#allocation9 + $0x98] sm:$0xff] }
0x108d   : > { %6739 = vtanh.f32 %v4395_v17 }
0x108e   : > { %6741 = vpow2.f32 %v5652_v63 }
0x109a   : > { %v6740_v5 = vpop.eup %6739 }
0x109b   : > { %4399 = vrot.lane.b32.xlu1 %v6740_v5, %s7022_s24  ;;  %v6742_v57 = vpop.eup %6741 }
0x109c   : > { %v4383_v16 = vadd.f32 1.0, %v6742_v57 }
0x109e   : > { %6743 = vrcp.f32 %v4383_v16 }
0x10f9   : > { %v4407_v32 = vpop.permute.xlu0 %4406 }
0x10fa   : > { %6403 = vmatmul.mubr.msk.f32.vlgmr.msra.gmra.mxu0 %vm737_vm1, %v4407_v32  ;;  %6414 = vmatmul.mubr.msk.f32.vlgmr.msra.gmra.mxu1 %vm737_vm1, %v4407_v32 }
0x10fb   : > { %6417 = vmatpush3.msra.mxu0 %v7906_v28  ;;  %6424 = vmatprep.mubr.msk.f32.mxu0 %vm7021_vm0, %v8513_v24  ;;  %v6744_v28 = vpop.eup %6743 }
0x10fc   : > { %6418 = vmatprep.subr.mxu0 %v8513_v24  ;;  %6428 = vmatpush3.msra.mxu1 %v7912_v48  ;;  %v4397_v48 = vsub.f32 1.0, %v6744_v28 }
0x10fd   : > { %6419 = vmatpush3.msra.mxu0 %v7915_v47  ;;  %6429 = vmatprep.subr.mxu1 %v8513_v24 }
0x10fe   : > { %6420 = vmatprep.subr.mxu0 %v8513_v24  ;;  %6430 = vmatpush3.msra.mxu1 %v7920_v29 }
0x10ff   : > { %6421 = vmatpush3.msra.mxu0 %v7923_v25  ;;  %6431 = vmatprep.subr.mxu1 %v8513_v24  ;;  %v4403_v25 = vmul.f32 %v6744_v28, %v8160_v12 }
0x1100   : > { %6422 = vmatprep.subr.mxu0 %v8513_v24  ;;  %6432 = vmatpush3.msra.mxu1 %v7928_v60 }
0x1101   : > { %6423 = vmatpush3.msra.mxu0 %v7931_v37  ;;  %6433 = vmatprep.subr.mxu1 %v8513_v24 }
0x1102   : > { %6425 = vmatmul.mubr.msk.f32.vlgmr.msra.gmra.mxu0 %vm737_vm1, %v4407_v32  ;;  %6438 = vmatprep.subr.mxu0 %v8513_v24 }
0x1103   : > { %6439 = vmatpush3.msra.mxu0 %v6797_v0  ;;  %6434 = vmatpush3.msra.mxu1 %v7938_v56  ;;  %v5663_v0 = vld [vmem:[%s8443_s7] ss:$0 sm:$0xff] }
0x1104   : > { %6440 = vmatprep.subr.mxu0 %v8513_v24  ;;  %6435 = vmatprep.mubr.msk.f32.mxu1 %vm7021_vm0, %v8513_v24 }
0x1105   : > { %6441 = vmatpush3.msra.mxu0 %v7944_v7  ;;  %6446 = vmatprep.mubr.msk.f32.mxu0 %vm7021_vm0, %v8513_v24 }
0x1106   : > { %6442 = vmatprep.subr.mxu0 %v8513_v24  ;;  %6449 = vmatprep.subr.mxu1 %v8513_v24 }
0x1107   : > { %6443 = vmatpush3.msra.mxu0 %v7951_v1 }
0x1108   : > { %6444 = vmatprep.subr.mxu0 %v8513_v24 }
0x1109   : > { %6445 = vmatpush3.msra.mxu0 %v7955_v58 }
0x110a   : > { %6460 = vmatprep.subr.mxu0 %v8513_v24 }
0x110d   : > { %v4400_v47 = vpop.permute.xlu1 %4399 }
0x110e   : > { %v4402_v29 = vmul.f32 %v4400_v47, %v4397_v48 }
0x1110   : > { %v8255_v60 = vadd.f32 %v4403_v25, %v4402_v29 }
0x1112   : > { %6436 = vmatmul.mubr.msk.f32.vlgmr.msra.gmra.mxu1 %vm737_vm1, %v8255_v60  ;;  %6447 = vmatmul.mubr.msk.f32.vlgmr.msra.gmra.mxu0 %vm737_vm1, %v8255_v60 }
0x1113   : > { %6450 = vmatpush3.msra.mxu1 %v7966_v20  ;;  %6457 = vmatprep.mubr.msk.f32.mxu1 %vm7021_vm0, %v8513_v24 }
0x1114   : > { %6451 = vmatprep.subr.mxu1 %v8513_v24  ;;  %6468 = vmatprep.mubr.msk.f32.mxu0 %vm7021_vm0, %v8513_v24 }
0x1115   : > { %6452 = vmatpush3.msra.mxu1 %v7973_v15 }
0x1116   : > { %6453 = vmatprep.subr.mxu1 %v8513_v24 }
0x1117   : > { %6454 = vmatpush3.msra.mxu1 %v7979_v8 }
0x1118   : > { %6455 = vmatprep.subr.mxu1 %v8513_v24 }
0x1119   : > { %6456 = vmatpush3.msra.mxu1 %v7985_v4 }
0x111a   : > { %6458 = vmatmul.mubr.msk.f32.vlgmr.msra.gmra.mxu1 %vm737_vm1, %v8255_v60  ;;  %6471 = vmatprep.subr.mxu1 %v8513_v24 }
0x111b   : > { %6479 = vmatprep.mubr.msk.f32.mxu1 %vm7021_vm0, %v8513_v24 }
0x11ba   : > { %v4476_v37 = vpop.f32.mrf.mxu0  ;;  %v4546_v56 = vpop.f32.mrf.mxu1 }
0x11bb   : > { %v4477_v7 = vadd.f32 %v4476_v37, %v7517_v50  ;;  %v4547_v49 = vadd.f32 %v4546_v56, %v7575_v43  ;;  %v5664_v43 = vld [vmem:[%s8444_s8] ss:$0 sm:$0xff] }
0x11bc   : > { %v6404_v1 = vpop.f32.mrf.mxu0  ;;  %v6415_v58 = vpop.f32.mrf.mxu1  ;;  %v4934_v17 = vmul.f32 %v5664_v43, %v8255_v60  ;;  %v4962_v9 = vmul.f32 %v5664_v43, %v8064_v41  ;;  %v4990_v22 = vmul.f32 %v5664_v43, %v7826_v31  ;;  %v5018_v63 = vmul.f32 %v5664_v43, %v7632_v14 }
0x11bd   : > { %v4620_v20 = vadd.f32 %v4477_v7, %v7570_v30  ;;  %v4948_v28 = vmul.f32 %v5664_v43, %v8160_v12 }
0x11bf   : > { %v5656_v15 = vmul.f32 -1.442695, %v4620_v20 }
0x11c1   : > { %6745 = vpow2.f32 %v5656_v15 }
0x11c2   : > { %v4616_v8 = vpop.f32.mrf.mxu0 }
0x11c3   : > { %v4617_v62 = vadd.f32 %v4616_v8, %v7568_v27 }
0x11c4   : > { %v6426_v4 = vpop.f32.mrf.mxu0 }
0x11ce   : > { %v6746_v21 = vpop.eup %6745 }
0x11cf   : > { %v4624_v35 = vadd.f32 1.0, %v6746_v21 }
0x11d1   : > { %6747 = vrcp.f32 %v4624_v35 }
0x11d2   : > { %v4722_v36 = vpop.f32.mrf.mxu1  ;;  %v4792_v38 = vpop.f32.mrf.mxu0 }
0x11d3   : > { %v4723_v39 = vadd.f32 %v4722_v36, %v7545_v46  ;;  %v4793_v48 = vadd.f32 %v4792_v38, %v7596_v61 }
0x11d4   : > { %v6437_v3 = vpop.f32.mrf.mxu1  ;;  %v6448_v23 = vpop.f32.mrf.mxu0 }
0x11d5   : > { %4867 = vrot.lane.b32.xlu0 %v4723_v39, %s7022_s24  ;;  %v4877_v47 = vadd.f32 %v4793_v48, %v7524_v59 }
0x11d7   : > { %v5662_v29 = vmul.f32 -1.442695, %v4877_v47 }
0x11da   : > { %v4862_v50 = vpop.f32.mrf.mxu1 }
0x11db   : > { %v4863_v33 = vadd.f32 %v4862_v50, %v7562_v11 }
0x11dc   : > { %v6459_v19 = vpop.f32.mrf.mxu1 }
0x11dd   : > { %4885 = vrot.lane.b32.xlu1 %v4863_v33, %s7022_s24 }
0x11de   : > { %v6748_v2 = vpop.eup %6747 }
0x11df   : > { %v4638_v40 = vmul.f32 %v6748_v2, %v4617_v62  ;;  %v4976_v2 = vmul.f32 %v5664_v43, %v7960_v45 }
0x11e1   : > { %4640 = vrot.lane.b32.xlu1 %v4638_v40, %s7024_s0 }
0x11e5   : > { %4628 = vrot.lane.b32.xlu1 %v4547_v49, %s7023_s2 }
0x1247   : > { %v4868_v46 = vpop.permute.xlu0 %4867 }
0x1248   : > { %v4870_v42 = vadd.f32 %v4868_v46, %v7520_v55 }
0x124a   : > { %v5661_v53 = vmul.f32 -1.442695, %v4870_v42 }
0x124c   : > { %6749 = vpow2.f32 %v5661_v53 }
0x124f   : > { %v4886_v10 = vpop.permute.xlu1 %4885 }
0x1253   : > { %v4641_v11 = vpop.permute.xlu1 %4640 }
0x1254   : > { %v4643_v34 = vadd.f32 %v4641_v11, %v7570_v30 }
0x1256   : > { %6751 = vtanh.f32 %v4643_v34  ;;  %v8514_v34 = vld [vmem:[#allocation23_spill] sm:$0xff] }
0x1257   : > { %v4629_v25 = vpop.permute.xlu1 %4628 }
0x1258   : > { %v4631_v37 = vadd.f32 %v4629_v25, %v7570_v30  ;;  %v7025_v25 = vmov 0  }
0x1259   : > { %v6750_v27 = vpop.eup %6749  ;;  %6595 = vset.pattern.permute.xlu1 %v7025_v25  ;;  %6596 = vset.pattern.permute.xlu0 %v7025_v25  ;;  %v7029_v25 = vmov 3  }
0x125a   : > { %v4874_v52 = vadd.f32 1.0, %v6750_v27  ;;  %v5657_v56 = vmul.f32 -1.442695, %v4631_v37 }
0x125c   : > { %6753 = vrcp.f32 %v4874_v52 }
0x1263   : > { %v6752_v6 = vpop.eup %6751 }
0x1264   : > { %4647 = vrot.lane.b32.xlu1 %v6752_v6, %s7022_s24 }
0x1268   : > { %4936 = vrot.lane.b32.xlu1 %v4934_v17, %s7023_s2 }
0x1269   : > { %v6754_v55 = vpop.eup %6753 }
0x126a   : > { %v4888_v5 = vmul.f32 %v6754_v55, %v4886_v10  ;;  %v5004_v10 = vmul.f32 %v5664_v43, %v7728_v54 }
0x126c   : > { %4890 = vrot.lane.b32.xlu0 %v4888_v5, %s7024_s0  ;;  %4964 = vrot.lane.b32.xlu1 %v4962_v9, %s7023_s2  ;;  %v8515_v9 = vld [vmem:[#allocation22_spill] sm:$0xff] }
0x1270   : > { %4992 = vrot.lane.b32.xlu1 %v4990_v22, %s7023_s2 }
0x1274   : > { %5020 = vrot.lane.b32.xlu1 %v5018_v63, %s7023_s2 }
0x12d6   : > { %v4648_v15 = vpop.permute.xlu1 %4647 }
0x12da   : > { %v4937_v21 = vpop.permute.xlu1 %4936 }
0x12de   : > { %v4891_v57 = vpop.permute.xlu0 %4890  ;;  %v4965_v23 = vpop.permute.xlu1 %4964 }
0x12df   : > { %v4893_v16 = vadd.f32 %v4891_v57, %v7524_v59 }
0x12e1   : > { %6755 = vtanh.f32 %v4893_v16 }
0x12e2   : > { %6757 = vpow2.f32 %v5662_v29  ;;  %v4993_v42 = vpop.permute.xlu1 %4992 }
0x12e3   : > { %6759 = vpow2.f32 %v5657_v56 }
0x12e6   : > { %v5021_v55 = vpop.permute.xlu1 %5020 }
0x12ee   : > { %v6756_v32 = vpop.eup %6755 }
0x12ef   : > { %4897 = vrot.lane.b32.xlu0 %v6756_v32, %s7022_s24  ;;  %v6758_v7 = vpop.eup %6757 }
0x12f0   : > { %v4881_v1 = vadd.f32 1.0, %v6758_v7  ;;  %v6760_v58 = vpop.eup %6759 }
0x12f1   : > { %v4635_v20 = vadd.f32 1.0, %v6760_v58 }
0x12f2   : > { %6761 = vrcp.f32 %v4881_v1 }
0x12f3   : > { %4916 = vrot.lane.b32.xlu0 %v5663_v0, %s7023_s2  ;;  %6763 = vrcp.f32 %v4635_v20 }
0x12f7   : > { %4950 = vrot.lane.b32.xlu0 %v4948_v28, %s7023_s2 }
0x12ff   : > { %v6762_v8 = vpop.eup %6761 }
0x1300   : > { %v4895_v4 = vsub.f32 1.0, %v6762_v8  ;;  %v4901_v59 = vmul.f32 %v6762_v8, %v8255_v60  ;;  %v6764_v38 = vpop.eup %6763 }
0x1301   : > { %v4645_v50 = vsub.f32 1.0, %v6764_v38  ;;  %v4651_v40 = vmul.f32 %v6764_v38, %v8214_v51 }
0x1303   : > { %v4650_v62 = vmul.f32 %v4648_v15, %v4645_v50 }
0x1305   : > { %v8325_v53 = vadd.f32 %v4651_v40, %v4650_v62 }
0x1361   : > { %v4898_v61 = vpop.permute.xlu0 %4897 }
0x1362   : > { %v4900_v35 = vmul.f32 %v4898_v61, %v4895_v4 }
0x1364   : > { %v8314_v36 = vadd.f32 %v4901_v59, %v4900_v35 }
0x1365   : > { %v4917_v30 = vpop.permute.xlu0 %4916 }
0x1366   : > { %v4920_v39 = vmul.f32 %v5664_v43, %v8314_v36  ;;  %v4933_v3 = vmul.f32 %v4917_v30, %v7686_v18  ;;  %v4961_v19 = vmul.f32 %v4917_v30, %v7896_v44  ;;  %v4989_v46 = vmul.f32 %v4917_v30, %v8118_v13 }
0x1367   : > { %v4947_v27 = vmul.f32 %v4917_v30, %v8514_v34  ;;  %v5017_v6 = vmul.f32 %v4917_v30, %v8325_v53  ;;  %v4919_v22 = vmul.f32 %v4917_v30, %v8515_v9  ;;  %v4975_v32 = vmul.f32 %v4917_v30, %v8022_v26 }
0x1368   : > { %4922 = vrot.lane.b32.xlu0 %v4920_v39, %s7023_s2  ;;  %v4939_v33 = vadd.f32 %v4937_v21, %v4933_v3  ;;  %v4967_v49 = vadd.f32 %v4965_v23, %v4961_v19  ;;  %v4995_v52 = vadd.f32 %v4993_v42, %v4989_v46  ;;  %v5003_v48 = vmul.f32 %v4917_v30, %v8214_v51  ;;  %v5665_v30 = vld [vmem:[#allocation2] ss:$0 sm:$0xff] }
0x1369   : > { %v4951_v11 = vpop.permute.xlu0 %4950  ;;  %v5023_v5 = vadd.f32 %v5021_v55, %v5017_v6 }
0x136a   : > { %4941 = vrot.lane.b32.xlu1 %v4939_v33, %s7022_s24  ;;  %v4953_v17 = vadd.f32 %v4951_v11, %v4947_v27  ;;  %v5056_v27 = vld [vmem:[%s704_s28] sm:$0xff] }
0x136b   : > { %vm5057_vm9 = vcmp.gt.f32.partialorder %v5056_v27, 0.5 }
0x136c   : > { %4978 = vrot.lane.b32.xlu0 %v4976_v2, %s7023_s2 }
0x136e   : > { %4969 = vrot.lane.b32.xlu1 %v4967_v49, %s7022_s24 }
0x1370   : > { %5006 = vrot.lane.b32.xlu0 %v5004_v10, %s7023_s2 }
0x1372   : > { %4997 = vrot.lane.b32.xlu1 %v4995_v52, %s7022_s24 }
0x1374   : > { %4955 = vrot.lane.b32.xlu0 %v4953_v17, %s7022_s24 }
0x1376   : > { %5025 = vrot.lane.b32.xlu1 %v5023_v5, %s7022_s24 }
0x13da   : > { %v4923_v43 = vpop.permute.xlu0 %4922 }
0x13db   : > { %v4925_v63 = vadd.f32 %v4923_v43, %v4919_v22 }
0x13dc   : > { %v4942_v57 = vpop.permute.xlu1 %4941 }
0x13dd   : > { %4927 = vrot.lane.b32.xlu0 %v4925_v63, %s7022_s24  ;;  %v4944_v16 = vsel %vm737_vm1, %v4942_v57, 0.0 }
0x13de   : > { %4945 = vadd.xlane.f32.xlu1 %v4944_v16  ;;  %v4979_v0 = vpop.permute.xlu0 %4978 }
0x13df   : > { %v4981_v28 = vadd.f32 %v4979_v0, %v4975_v32  ;;  %v7026_v32 = vmov 1  }
0x13e0   : > { %v4970_v7 = vpop.permute.xlu1 %4969 }
0x13e1   : > { %4983 = vrot.lane.b32.xlu0 %v4981_v28, %s7022_s24  ;;  %v4972_v1 = vsel %vm737_vm1, %v4970_v7, 0.0  ;;  %v5143_v7 = vld [vmem:[#allocation11 + $0x18] sm:$0xff] }
0x13e2   : > { %v5007_v47 = vpop.permute.xlu0 %5006  ;;  %6461 = vmatpush3.msra.mxu0 %v5143_v7  ;;  %v5671_v7 = vld [vmem:[%s8517_s1] ss:$0 sm:$0xff] }
0x13e3   : > { %v5009_v29 = vadd.f32 %v5007_v47, %v5003_v48  ;;  %v7027_v47 = vmov 2   ;;  %6462 = vmatprep.subr.mxu0 %v8513_v24 }
0x13e4   : > { %v4998_v58 = vpop.permute.xlu1 %4997 }
0x13e5   : > { %5011 = vrot.lane.b32.xlu0 %v5009_v29, %s7022_s24  ;;  %v5000_v4 = vsel %vm737_vm1, %v4998_v58, 0.0  ;;  %v7028_v29 = vmov 7   ;;  %v7032_v58 = vmov 6  }
0x13e6   : > { %v4956_v37 = vpop.permute.xlu0 %4955 }
0x13e7   : > { %v4958_v56 = vsel %vm737_vm1, %v4956_v37, 0.0  ;;  %v7030_v37 = vmov 4  }
0x13e8   : > { %v5026_v61 = vpop.permute.xlu1 %5025 }
0x13e9   : > { %v5028_v59 = vsel %vm737_vm1, %v5026_v61, 0.0  ;;  %v5136_v61 = vld [vmem:[%s8446_s10] sm:$0xff] }
0x1404   : > { %4959 = vadd.xlane.f32.xlu0 %v4958_v56  ;;  %v7031_v56 = vmov 5  }
0x1408   : > { %4973 = vadd.xlane.f32.xlu0 %v4972_v1  ;;  %v5142_v1 = vld [vmem:[#allocation11 + $0x10] sm:$0xff] }
0x1409   : > { %6463 = vmatpush3.msra.mxu0 %v5142_v1 }
0x140a   : > { %6464 = vmatprep.subr.mxu0 %v8513_v24 }
0x144f   : > { %v4928_v20 = vpop.permute.xlu0 %4927 }
0x1450   : > { %v4930_v15 = vsel %vm737_vm1, %v4928_v20, 0.0  ;;  %v5141_v20 = vld [vmem:[#allocation11 + $0x8] sm:$0xff] }
0x1451   : > { %4931 = vadd.xlane.f32.xlu0 %v4930_v15  ;;  %v5140_v15 = vld [vmem:[#allocation11] sm:$0xff]  ;;  %6465 = vmatpush3.msra.mxu0 %v5141_v20  ;;  %v5672_v20 = vld [vmem:[%s8518_s15] ss:$0 sm:$0xff] }
0x1452   : > { %6466 = vmatprep.subr.mxu0 %v8513_v24 }
0x1453   : > { %v4984_v8 = vpop.permute.xlu0 %4983  ;;  %6467 = vmatpush3.msra.mxu0 %v5140_v15 }
0x1454   : > { %v4986_v21 = vsel %vm737_vm1, %v4984_v8, 0.0  ;;  %v5139_v8 = vld [vmem:[%s8446_s10 + $0x18] sm:$0xff]  ;;  %6482 = vmatprep.subr.mxu0 %v8513_v24 }
0x1455   : > { %5001 = vadd.xlane.f32.xlu0 %v5000_v4  ;;  %4987 = vadd.xlane.f32.xlu1 %v4986_v21  ;;  %v5138_v4 = vld [vmem:[%s8446_s10 + $0x10] sm:$0xff]  ;;  %v5137_v21 = vld [vmem:[%s8446_s10 + $0x8] sm:$0xff] }
0x1456   : > { %6472 = vmatpush3.msra.mxu1 %v5139_v8 }
0x1457   : > { %v5012_v35 = vpop.permute.xlu0 %5011  ;;  %6473 = vmatprep.subr.mxu1 %v8513_v24 }
0x1458   : > { %v5014_v38 = vsel %vm737_vm1, %v5012_v35, 0.0  ;;  %6474 = vmatpush3.msra.mxu1 %v5138_v4 }
0x1459   : > { %5029 = vadd.xlane.f32.xlu0 %v5028_v59  ;;  %5015 = vadd.xlane.f32.xlu1 %v5014_v38 }
0x145a   : > { %6475 = vmatprep.subr.mxu1 %v8513_v24 }
0x145b   : > { %6476 = vmatpush3.msra.mxu1 %v5137_v21  ;;  %v5673_v21 = vld [vmem:[#allocation3] ss:$0 sm:$0xff] }
0x145c   : > { %6477 = vmatprep.subr.mxu1 %v8513_v24 }
0x145d   : > { %6478 = vmatpush3.msra.mxu1 %v5136_v61 }
0x1467   : > { %v4946_v23 = vpop.xlane.xlu1 %4945 }
0x146a   : > { %5052 = vperm.xlu1 %6595, %v5665_v30  }
0x146e   : > { %6597 = vset.pattern.permute.xlu1 %v7026_v32 }
0x148d   : > { %v4960_v39 = vpop.xlane.xlu0 %4959 }
0x1491   : > { %v4974_v3 = vpop.xlane.xlu0 %4973 }
0x14da   : > { %v4932_v50 = vpop.xlane.xlu0 %4931 }
0x14db   : > { %v5032_v33 = vsel %vm5031_vm2, %v4932_v50, %v4946_v23 }
0x14dc   : > { %v5034_v19 = vsel %vm5033_vm3, %v5032_v33, %v4960_v39 }
0x14dd   : > { %v5036_v62 = vsel %vm5035_vm4, %v5034_v19, %v4974_v3 }
0x14de   : > { %v4988_v2 = vpop.xlane.xlu1 %4987  ;;  %v5002_v40 = vpop.xlane.xlu0 %5001 }
0x14df   : > { %v5038_v49 = vsel %vm5037_vm5, %v5036_v62, %v4988_v2 }
0x14e0   : > { %v5040_v46 = vsel %vm5039_vm6, %v5038_v49, %v5002_v40 }
0x14e2   : > { %v5016_v42 = vpop.xlane.xlu1 %5015  ;;  %v5030_v11 = vpop.xlane.xlu0 %5029 }
0x14e3   : > { %v5042_v10 = vsel %vm5041_vm7, %v5040_v46, %v5016_v42 }
0x14e4   : > { %v5044_v6 = vsel %vm5043_vm8, %v5042_v10, %v5030_v11 }
0x14e6   : > { %v5053_v52 = vpop.permute.xlu1 %5052 }
0x14e7   : > { %v5055_v17 = vadd.f32 %v5053_v52, %v5044_v6 }
0x14e9   : > { %v5058_v55 = vsel %vm5057_vm9, %v5055_v17, -1e+30 }
0x14ea   : > { %v5060_v5 = vsel %vm5059_vm10, %v5058_v55, -inf }
0x14eb   : > { %5061 = vmax.xlane.f32.xlu0 %v5060_v5 }
0x1574   : > { %v5062_v22 = vpop.xlane.xlu0 %5061 }
0x1575   : > { %v5063_v43 = vsub.f32 %v5058_v55, %v5062_v22 }
0x1577   : > { %v5064_v63 = vmul.f32 1.442695, %v5063_v43 }
0x1579   : > { %6765 = vpow2.f32 %v5064_v63 }
0x1586   : > { %v6766_v57 = vpop.eup %6765 }
0x1587   : > { %v5066_v16 = vsel %vm5059_vm10, %v6766_v57, 0.0 }
0x1588   : > { %5067 = vadd.xlane.f32.xlu0 %v5066_v16 }
0x1611   : > { %v5068_v0 = vpop.xlane.xlu0 %5067 }
0x1612   : > { %6767 = vrcp.f32 %v5068_v0 }
0x161f   : > { %v6768_v28 = vpop.eup %6767 }
0x1620   : > { %v5070_v48 = vmul.f32 %v6768_v28, %v6766_v57 }
0x1622   : > { %5081 = vperm.xlu1 %6597, %v5070_v48   ;;  %5073 = vperm.xlu0 %6596, %v5070_v48  }
0x1626   : > { %6598 = vset.pattern.permute.xlu1 %v7027_v47  ;;  %6604 = vset.pattern.permute.xlu0 %v7028_v29 }
0x1627   : > { %5089 = vperm.xlu1 %6598, %v5070_v48  }
0x162b   : > { %6599 = vset.pattern.permute.xlu1 %v7029_v25 }
0x162c   : > { %5097 = vperm.xlu1 %6599, %v5070_v48  }
0x1630   : > { %6600 = vset.pattern.permute.xlu1 %v7030_v37 }
0x1631   : > { %5105 = vperm.xlu1 %6600, %v5070_v48  }
0x1635   : > { %6601 = vset.pattern.permute.xlu1 %v7031_v56 }
0x1636   : > { %5113 = vperm.xlu1 %6601, %v5070_v48  }
0x163a   : > { %6602 = vset.pattern.permute.xlu1 %v7032_v58 }
0x163b   : > { %5121 = vperm.xlu1 %6602, %v5070_v48  }
0x163f   : > { %6603 = vset.pattern.permute.xlu1 %v7028_v29  ;;  %v5669_v29 = vld [vmem:[%s8449_s13] ss:$0 sm:$0xff] }
0x1640   : > { %5129 = vperm.xlu1 %6603, %v5070_v48  }
0x169d   : > { %v5082_v35 = vpop.permute.xlu1 %5081  ;;  %v5074_v30 = vpop.permute.xlu0 %5073 }
0x169e   : > { %v5084_v3 = vmul.f32 %v5082_v35, %v7686_v18  ;;  %v5086_v23 = vmul.f32 %v5082_v35, %v8255_v60  ;;  %v5076_v50 = vmul.f32 %v5074_v30, %v8515_v9  ;;  %v5078_v33 = vmul.f32 %v5074_v30, %v8314_v36 }
0x16a0   : > { %v5085_v40 = vadd.f32 %v5084_v3, %v5076_v50  ;;  %v5087_v49 = vadd.f32 %v5086_v23, %v5078_v33 }
0x16a2   : > { %v5090_v59 = vpop.permute.xlu1 %5089 }
0x16a3   : > { %v5092_v19 = vmul.f32 %v5090_v59, %v8514_v34  ;;  %v5094_v62 = vmul.f32 %v5090_v59, %v8160_v12 }
0x16a5   : > { %v5093_v10 = vadd.f32 %v5092_v19, %v5085_v40  ;;  %v5095_v11 = vadd.f32 %v5094_v62, %v5087_v49 }
0x16a7   : > { %v5098_v38 = vpop.permute.xlu1 %5097 }
0x16a8   : > { %v5100_v46 = vmul.f32 %v5098_v38, %v7896_v44  ;;  %v5102_v42 = vmul.f32 %v5098_v38, %v8064_v41 }
0x16aa   : > { %v5101_v9 = vadd.f32 %v5100_v46, %v5093_v10  ;;  %v5103_v27 = vadd.f32 %v5102_v42, %v5095_v11 }
0x16ac   : > { %v5106_v39 = vpop.permute.xlu1 %5105 }
0x16ad   : > { %v5108_v18 = vmul.f32 %v5106_v39, %v8022_v26  ;;  %v5110_v60 = vmul.f32 %v5106_v39, %v7960_v45 }
0x16af   : > { %v5109_v52 = vadd.f32 %v5108_v18, %v5101_v9  ;;  %v5111_v6 = vadd.f32 %v5110_v60, %v5103_v27 }
0x16b1   : > { %v5114_v2 = vpop.permute.xlu1 %5113 }
0x16b2   : > { %v5116_v36 = vmul.f32 %v5114_v2, %v8118_v13  ;;  %v5118_v34 = vmul.f32 %v5114_v2, %v7826_v31  ;;  %v5296_v31 = vld [vmem:[#allocation12 + $0x18] sm:$0xff] }
0x16b4   : > { %v5117_v41 = vadd.f32 %v5116_v36, %v5109_v52  ;;  %v5119_v55 = vadd.f32 %v5118_v34, %v5111_v6 }
0x16b6   : > { %v5122_v12 = vpop.permute.xlu1 %5121 }
0x16b7   : > { %v5124_v17 = vmul.f32 %v5122_v12, %v8214_v51  ;;  %v5126_v44 = vmul.f32 %v5122_v12, %v7728_v54  ;;  %v5295_v51 = vld [vmem:[#allocation12 + $0x10] sm:$0xff]  ;;  %v5294_v54 = vld [vmem:[#allocation12 + $0x8] sm:$0xff] }
0x16b9   : > { %v5125_v22 = vadd.f32 %v5124_v17, %v5117_v41  ;;  %v5127_v26 = vadd.f32 %v5126_v44, %v5119_v55 }
0x16bb   : > { %v5130_v5 = vpop.permute.xlu1 %5129 }
0x16bc   : > { %v5132_v45 = vmul.f32 %v5130_v5, %v8325_v53  ;;  %v5134_v43 = vmul.f32 %v5130_v5, %v7632_v14  ;;  %v5293_v53 = vld [vmem:[#allocation12] sm:$0xff]  ;;  %v5292_v14 = vld [vmem:[%s7322_s29] sm:$0xff] }
0x16be   : > { %v5133_v13 = vadd.f32 %v5132_v45, %v5125_v22  ;;  %v5135_v63 = vadd.f32 %v5134_v43, %v5127_v26 }
0x16c0   : > { %6469 = vmatmul.mubr.msk.f32.vlgmr.msra.gmra.mxu0 %vm737_vm1, %v5135_v63  ;;  %5218 = vrot.lane.b32.xlu1 %v5133_v13, %s7022_s24 }
0x16c1   : > { %6483 = vmatpush3.msra.mxu0 %v5296_v31  ;;  %6490 = vmatprep.mubr.msk.f32.mxu0 %vm7021_vm0, %v8513_v24 }
0x16c2   : > { %6484 = vmatprep.subr.mxu0 %v8513_v24 }
0x16c3   : > { %6485 = vmatpush3.msra.mxu0 %v5295_v51 }
0x16c4   : > { %6486 = vmatprep.subr.mxu0 %v8513_v24 }
0x16c5   : > { %6487 = vmatpush3.msra.mxu0 %v5294_v54 }
0x16c6   : > { %6488 = vmatprep.subr.mxu0 %v8513_v24  ;;  %v5670_v24 = vld [vmem:[%s8450_s14] ss:$0 sm:$0xff] }
0x16c7   : > { %6489 = vmatpush3.msra.mxu0 %v5293_v53 }
0x16c8   : > { %6491 = vmatmul.mubr.msk.f32.vlgmr.msra.gmra.mxu0 %vm737_vm1, %v5292_v14 }
0x1732   : > { %v5219_v57 = vpop.permute.xlu1 %5218 }
0x1733   : > { %6480 = vmatmul.mubr.msk.f32.vlgmr.msra.gmra.mxu1 %vm737_vm1, %v5219_v57 }
0x1780   : > { %v5213_v16 = vpop.f32.mrf.mxu0 }
0x1782   : > { %v6470_v32 = vpop.f32.mrf.mxu0 }
0x1788   : > { %v5366_v0 = vpop.f32.mrf.mxu0 }
0x178a   : > { %v6492_v28 = vpop.f32.mrf.mxu0 }
0x17f3   : > { %v5288_v48 = vpop.f32.mrf.mxu1 }
0x17f4   : > { %v5289_v47 = vadd.f32 %v5288_v48, %v5213_v16 }
0x17f5   : > { %v6481_v25 = vpop.f32.mrf.mxu1 }
0x17f6   : > { %v5370_v37 = vadd.f32 %v5366_v0, %v5289_v47 }
0x17f8   : > { %v5378_v56 = vadd.f32 %v5669_v29, %v5370_v37 }
0x17fa   : > { %v5386_v1 = vmul.f32 %v5670_v24, %v5378_v56 }
0x17fc   : > { %v5394_v58 = vadd.f32 %v5671_v7, %v5386_v1 }
0x17fe   : > { %v5395_v15 = vmax.f32 %v5394_v58, 0.0 }
0x1800   : > { %v5403_v8 = vmul.f32 %v5672_v20, %v5395_v15 }
0x1802   : > { %v5405_v4 = vsel %vm5404_vm11, %v5403_v8, 0.0 }
0x1803   : > { %5406 = vadd.xlane.f32.xlu1 %v5405_v4 }
0x188c   : > { %v5407_v61 = vpop.xlane.xlu1 %5406 }
0x188d   : > { %v5415_v35 = vadd.f32 %v5673_v21, %v5407_v61 }
0x188f   : > { %v5674_v59 = vmul.f32 -1.442695, %v5415_v35 }
0x1891   : > { %6769 = vpow2.f32 %v5674_v59 }
0x189e   : > { %v6770_v38 = vpop.eup %6769 }
0x189f   : > { %v5419_v30 = vadd.f32 1.0, %v6770_v38 }
0x18a1   : > { %6771 = vrcp.f32 %v5419_v30 }
0x18ae   : > { %v6772_v39 = vpop.eup %6771 }
0x18af   : > { %5422 = vst.msk [vmem:[%s708_s3] sm:$0xff] %vm5031_vm2, %v6772_v39 }
0x18b0 PF: > { %s8520_s20 = sld [smem:[#allocation20_spill]]  ;;  %s8523_s0 = smov %s7000_s19 }
0x18b1   : > { %s8521_s5 = sld [smem:[#allocation19_spill]] }
0x18b2   : > { %s8522_s1 = sld [smem:[#allocation21_spill]] }
0x18b6   : > { %p37_p0 = scmp.ge.s32.totalorder %s8520_s20, 4  }
0x18b7   : > { %s8524_s19 = smov %s8521_s5 }
0x18b8   :  { %39 = sbr.rel (!%p37_p0) target bundleno = 18 (0x12), region = 164 }
0x18bd   :  { %5442 = vsyncpa [#allocation5], 1 }
0x18be   :  { %5444 = vsyncpa [#allocation5 + $0x1], 1 }
0x18bf   :  { %5445 = vsyncpa [#allocation7], 1 }
0x18c0   :  { %5447 = vsyncpa [#allocation7 + $0x1], 1 }
0x18c1   :  { %5448 = vsyncpa [#allocation10], 1 }
0x18c2   :  { %5449 = vsyncpa [#allocation13], 1 }

</bundles_post_ra>
